<compile_context>
chip_gen: v7x
topology: tpu7x:2x2x1
jax: 0.10.0
libtpu: 0.0.40
codegen_flags: <defaults>
</compile_context>

<pallas_src>
import jax
import jax.numpy as jnp
from jax.experimental import pallas as pl
from jax.experimental.pallas import tpu as pltpu


_LANE = 128
_VMEM_LIMIT = 32 * 1024 * 1024   # above v5e's 16 MiB default, within v7x's 64 MiB


def _round_up(x, m):
    return -(-x // m) * m


# ----------------------------- Pallas kernels --------------------------------

def _conv_gemm_kernel(xs_ref, w_ref, b_ref, o_ref):
    """Lane-dense conv-as-GEMM: o = bf16(W @ patches + bias).

    xs_ref: (Kp, tM)   bf16  K-major patch columns for this M tile
    w_ref:  (Cout, Kp) bf16  resident across the whole grid
    b_ref:  (Cout, 1)  f32   resident
    o_ref:  (Cout, tM) bf16
    """
    acc = jnp.dot(w_ref[...], xs_ref[...], preferred_element_type=jnp.float32)
    o_ref[...] = (acc + b_ref[...]).astype(o_ref.dtype)


def _fc_fused_kernel(x_ref, w1_ref, b1_ref, w2_ref, b2_ref, o_ref):
    """Fused fc1 -> ReLU -> fc2 in a single grid step (all operands resident)."""
    h = jnp.dot(x_ref[...], w1_ref[...], preferred_element_type=jnp.float32)
    h = jnp.maximum(h + b1_ref[...], 0.0)
    o_ref[...] = jnp.dot(h.astype(jnp.bfloat16), w2_ref[...],
                         preferred_element_type=jnp.float32) + b2_ref[...]


# ----------------------------- conv wrapper -----------------------------------

def _pick_tile_m(m_total, min_steps=4, max_tile=4096):
    """Largest multiple-of-128 divisor of m_total giving >= min_steps grid steps."""
    target = max(_LANE, min(max_tile, m_total // min_steps))
    best = _LANE
    d = _LANE
    while d <= target:
        if m_total % d == 0:
            best = d
        d += _LANE
    return best


def conv2d_chw(x, w, b, stride):
    """Valid conv (kh x kw) on channel-major input: (Cin, B, H, W) -> (Cout, B, Ho, Wo).

    Lowered to one lane-dense Pallas GEMM over the densely packed output space
    (M = Ho*Wo per batch, padded only at the per-batch total to a multiple of
    128, batch folded into the lane/M axis).
    """
    Cin, B, H, W = x.shape
    Cout, _, kh, kw = w.shape
    Ho = (H - kh) // stride + 1
    Wo = (W - kw) // stride + 1
    K = Cin * kh * kw
    Kp = _round_up(K, 16)              # bf16 sublane packing
    M = Ho * Wo
    Mp = _round_up(M, _LANE)           # dense-M padding only (no per-row padding)
    Mtot = B * Mp

    # K-major patch tensor, one fused XLA pass (strided slices + stack + pad):
    #   xs[(di*kw+dj)*Cin + ci, b*Mp + ho*Wo + wo] = x[ci, b, s*ho+di, s*wo+dj]
    taps = [x[:, :, di:di + stride * Ho:stride, dj:dj + stride * Wo:stride]
            for di in range(kh) for dj in range(kw)]
    xs = jnp.stack(taps, axis=0).astype(jnp.bfloat16).reshape(K, B, M)
    xs = jnp.pad(xs, ((0, Kp - K), (0, 0), (0, Mp - M))).reshape(Kp, Mtot)

    # Weight matrix (Cout, Kp), K ordered as (di, dj, ci) to match xs.
    wmat = jnp.pad(
        w.transpose(0, 2, 3, 1).reshape(Cout, K).astype(jnp.bfloat16),
        ((0, 0), (0, Kp - K)))
    bvec = b.astype(jnp.float32).reshape(Cout, 1)

    tM = _pick_tile_m(Mtot)
    out = pl.pallas_call(
        _conv_gemm_kernel,
        out_shape=jax.ShapeDtypeStruct((Cout, Mtot), jnp.bfloat16),
        grid=(Mtot // tM,),
        in_specs=[
            pl.BlockSpec((Kp, tM), lambda mi: (0, mi)),
            pl.BlockSpec((Cout, Kp), lambda mi: (0, 0)),   # resident
            pl.BlockSpec((Cout, 1), lambda mi: (0, 0)),    # resident
        ],
        out_specs=pl.BlockSpec((Cout, tM), lambda mi: (0, mi)),
        compiler_params=pltpu.CompilerParams(
            dimension_semantics=("parallel",),
            vmem_limit_bytes=_VMEM_LIMIT),
    )(xs, wmat, bvec)

    # Padded M columns (m >= Ho*Wo) hold bias-only values; slice them off before
    # any pooling/reduction ever sees them.
    return out.reshape(Cout, B, Mp)[:, :, :M].reshape(Cout, B, Ho, Wo)


# ----------------------------- pooling glue (XLA) -----------------------------

def maxpool2d_3(x):
    """MaxPool2d(kernel_size=3) (stride=3, floor mode) on channel-major (C,B,H,W)."""
    C, B, H, W = x.shape
    Hp, Wp = H // 3, W // 3
    x = x[:, :, :Hp * 3, :Wp * 3].reshape(C, B, Hp, 3, Wp, 3)
    return jnp.max(x, axis=(3, 5))                       # (C, B, Hp, Wp)


def adaptive_avg_pool2d(x, out_h, out_w):
    """AdaptiveAvgPool2d((out_h, out_w)) on channel-major (C,B,H,W), PyTorch binning."""
    C, B, H, W = x.shape
    if (H, W) == (out_h, out_w):
        return x                                          # identity (current config)
    if H % out_h == 0 and W % out_w == 0:
        return jnp.mean(
            x.reshape(C, B, out_h, H // out_h, out_w, W // out_w), axis=(3, 5))
    rows = []
    for i in range(out_h):
        h0, h1 = (i * H) // out_h, -(-((i + 1) * H) // out_h)
        cols = []
        for j in range(out_w):
            w0, w1 = (j * W) // out_w, -(-((j + 1) * W) // out_w)
            cols.append(jnp.mean(x[:, :, h0:h1, w0:w1], axis=(2, 3)))
        rows.append(jnp.stack(cols, axis=-1))
    return jnp.stack(rows, axis=-2)


# ----------------------------- fused FC head ----------------------------------

def fc_head(x, w1, b1, w2, b2):
    """Fused Linear(1024,256) + ReLU + Linear(256,num_classes), one pallas_call.

    GEMM operands in bf16, accumulation in f32 (preferred_element_type).
    """
    B, Din = x.shape
    Dh = w1.shape[0]
    Nc = w2.shape[0]
    Bp = _round_up(max(B, 16), 16)
    Np = _round_up(max(Nc, _LANE), _LANE)

    xp = jnp.pad(x.astype(jnp.bfloat16), ((0, Bp - B), (0, 0)))
    w1m = w1.astype(jnp.bfloat16).T                            # (Din, Dh)
    b1m = b1.astype(jnp.float32).reshape(1, Dh)
    w2m = jnp.pad(w2.astype(jnp.bfloat16).T, ((0, 0), (0, Np - Nc)))
    b2m = jnp.pad(b2.astype(jnp.float32).reshape(1, Nc), ((0, 0), (0, Np - Nc)))

    out = pl.pallas_call(
        _fc_fused_kernel,
        out_shape=jax.ShapeDtypeStruct((Bp, Np), jnp.float32),
        compiler_params=pltpu.CompilerParams(vmem_limit_bytes=_VMEM_LIMIT),
    )(xp, w1m, b1m, w2m, b2m)
    return out[:B, :Nc]


# ----------------------------- forward pass -----------------------------------

def forward(params, x):
    # Channel-major (Cin, B, H, W) bf16 layout through the conv chain -> no big
    # transposes between layers; cheap single transpose of the raw input.
    x = jnp.transpose(x.astype(jnp.bfloat16), (1, 0, 2, 3))
    # conv1 -> pool1 ; Dropout(p=0.2) is identity at inference.
    x = conv2d_chw(x, params["conv1_w"], params["conv1_b"], stride=2)
    x = maxpool2d_3(x)
    # conv2 -> pool2 ; dropout again identity.
    x = conv2d_chw(x, params["conv2_w"], params["conv2_b"], stride=2)
    x = maxpool2d_3(x)
    x = adaptive_avg_pool2d(x, 4, 4)                      # identity for 4x4 input
    x = jnp.transpose(x, (1, 0, 2, 3))                    # (B, 64, 4, 4) tiny
    x = x.reshape(x.shape[0], -1)                         # (B, 1024), NCHW order
    return fc_head(x, params["fc1_w"], params["fc1_b"],
                   params["fc2_w"], params["fc2_b"])


# ----------------------------- main --------------------------------------------

if __name__ == "__main__":
    in_ch, num_classes = 22, 2
    B, H, W = 2, 151, 151   # 151x151 -> conv1 75 -> pool 25 -> conv2 12 -> pool 4

    key = jax.random.PRNGKey(0)
    ks = jax.random.split(key, 9)
    x = jax.random.normal(ks[0], (B, in_ch, H, W), jnp.float32)

    params = dict(
        conv1_w=jax.random.normal(ks[1], (32, in_ch, 3, 3), jnp.float32) * 0.05,
        conv1_b=jax.random.normal(ks[2], (32,), jnp.float32) * 0.05,
        conv2_w=jax.random.normal(ks[3], (64, 32, 3, 3), jnp.float32) * 0.05,
        conv2_b=jax.random.normal(ks[4], (64,), jnp.float32) * 0.05,
        fc1_w=jax.random.normal(ks[5], (256, 1024), jnp.float32) * 0.03,
        fc1_b=jax.random.normal(ks[6], (256,), jnp.float32) * 0.03,
        fc2_w=jax.random.normal(ks[7], (num_classes, 256), jnp.float32) * 0.06,
        fc2_b=jax.random.normal(ks[8], (num_classes,), jnp.float32) * 0.06,
    )

    fwd = jax.jit(forward)
    out = jax.block_until_ready(fwd(params, x))
    assert out.shape == (B, num_classes), out.shape
    assert jnp.all(jnp.isfinite(out))
    print("KERNEL_OK")
</pallas_src>

<mosaic_0001>
module attributes {stable_mosaic.version = 11 : i64} {
  func.func @_conv_gemm_kernel(%arg0: i32, %arg1: memref<208x2816xbf16, #tpu.memory_space<vmem>>, %arg2: memref<32x208xbf16, #tpu.memory_space<vmem>>, %arg3: memref<32x1xf32, #tpu.memory_space<vmem>>, %arg4: memref<32x2816xbf16, #tpu.memory_space<vmem>>) attributes {dimension_semantics = [#tpu.dimension_semantics<parallel>], iteration_bounds = array<i64: 4>, scalar_prefetch = 0 : i64, scratch_operands = 0 : i64, tpu.core_type = #tpu.core_type<tc>, window_params = [{transform_indices = @transform_0, window_bounds = array<i64: 208, 2816>}, {pipeline_mode = #tpu.pipeline_mode<synchronous>, transform_indices = @transform_1, window_bounds = array<i64: 32, 208>}, {pipeline_mode = #tpu.pipeline_mode<synchronous>, transform_indices = @transform_2, window_bounds = array<i64: 32, 1>}, {transform_indices = @transform_3, window_bounds = array<i64: 32, 2816>}]} {
    %c0 = arith.constant 0 : index
    %c0_0 = arith.constant 0 : index
    %0 = vector.load %arg2[%c0, %c0_0] : memref<32x208xbf16, #tpu.memory_space<vmem>>, vector<32x208xbf16>
    %c0_1 = arith.constant 0 : index
    %c0_2 = arith.constant 0 : index
    %1 = vector.load %arg1[%c0_1, %c0_2] : memref<208x2816xbf16, #tpu.memory_space<vmem>>, vector<208x2816xbf16>
    %cst = arith.constant dense<0.000000e+00> : vector<32x2816xf32>
    %2 = tpu.matmul %0, %1, %cst {dimension_numbers = #tpu.dot_dimension_numbers<[1], [0], [0], [1], [0, 0, 1, 1], [], []>} : vector<32x208xbf16>, vector<208x2816xbf16>, vector<32x2816xf32> -> vector<32x2816xf32>
    %c0_3 = arith.constant 0 : index
    %c0_4 = arith.constant 0 : index
    %3 = vector.load %arg3[%c0_3, %c0_4] : memref<32x1xf32, #tpu.memory_space<vmem>>, vector<32x1xf32>
    %4 = vector.broadcast %3 : vector<32x1xf32> to vector<32x2816xf32>
    %5 = arith.addf %2, %4 : vector<32x2816xf32>
    %6 = arith.truncf %5 : vector<32x2816xf32> to vector<32x2816xbf16>
    %c0_5 = arith.constant 0 : index
    %c0_6 = arith.constant 0 : index
    %7 = vector.load %arg4[%c0_5, %c0_6] : memref<32x2816xbf16, #tpu.memory_space<vmem>>, vector<32x2816xbf16>
    tpu.vector_store %arg4[%c0_5, %c0_6], %6 {strides = array<i32>} : memref<32x2816xbf16, #tpu.memory_space<vmem>>, vector<32x2816xbf16>,
    return
  }
  func.func @transform_0(%arg0: i32) -> (i32, i32) {
    %c0_i32 = arith.constant 0 : i32
    %c0_i32_0 = arith.constant 0 : i32
    return %c0_i32, %arg0 : i32, i32
  }
  func.func @transform_1(%arg0: i32) -> (i32, i32) {
    %c0_i32 = arith.constant 0 : i32
    %c0_i32_0 = arith.constant 0 : i32
    %c0_i32_1 = arith.constant 0 : i32
    return %c0_i32, %c0_i32_0 : i32, i32
  }
  func.func @transform_2(%arg0: i32) -> (i32, i32) {
    %c0_i32 = arith.constant 0 : i32
    %c0_i32_0 = arith.constant 0 : i32
    %c0_i32_1 = arith.constant 0 : i32
    return %c0_i32, %c0_i32_0 : i32, i32
  }
  func.func @transform_3(%arg0: i32) -> (i32, i32) {
    %c0_i32 = arith.constant 0 : i32
    %c0_i32_0 = arith.constant 0 : i32
    return %c0_i32, %arg0 : i32, i32
  }
}

module attributes {stable_mosaic.version = 11 : i64} {
  func.func @_conv_gemm_kernel(%arg0: i32, %arg1: memref<288x128xbf16, #tpu.memory_space<vmem>>, %arg2: memref<64x288xbf16, #tpu.memory_space<vmem>>, %arg3: memref<64x1xf32, #tpu.memory_space<vmem>>, %arg4: memref<64x128xbf16, #tpu.memory_space<vmem>>) attributes {dimension_semantics = [#tpu.dimension_semantics<parallel>], iteration_bounds = array<i64: 4>, scalar_prefetch = 0 : i64, scratch_operands = 0 : i64, tpu.core_type = #tpu.core_type<tc>, window_params = [{transform_indices = @transform_0, window_bounds = array<i64: 288, 128>}, {pipeline_mode = #tpu.pipeline_mode<synchronous>, transform_indices = @transform_1, window_bounds = array<i64: 64, 288>}, {pipeline_mode = #tpu.pipeline_mode<synchronous>, transform_indices = @transform_2, window_bounds = array<i64: 64, 1>}, {transform_indices = @transform_3, window_bounds = array<i64: 64, 128>}]} {
    %c0 = arith.constant 0 : index
    %c0_0 = arith.constant 0 : index
    %0 = vector.load %arg2[%c0, %c0_0] : memref<64x288xbf16, #tpu.memory_space<vmem>>, vector<64x288xbf16>
    %c0_1 = arith.constant 0 : index
    %c0_2 = arith.constant 0 : index
    %1 = vector.load %arg1[%c0_1, %c0_2] : memref<288x128xbf16, #tpu.memory_space<vmem>>, vector<288x128xbf16>
    %cst = arith.constant dense<0.000000e+00> : vector<64x128xf32>
    %2 = tpu.matmul %0, %1, %cst {dimension_numbers = #tpu.dot_dimension_numbers<[1], [0], [0], [1], [0, 0, 1, 1], [], []>} : vector<64x288xbf16>, vector<288x128xbf16>, vector<64x128xf32> -> vector<64x128xf32>
    %c0_3 = arith.constant 0 : index
    %c0_4 = arith.constant 0 : index
    %3 = vector.load %arg3[%c0_3, %c0_4] : memref<64x1xf32, #tpu.memory_space<vmem>>, vector<64x1xf32>
    %4 = vector.broadcast %3 : vector<64x1xf32> to vector<64x128xf32>
    %5 = arith.addf %2, %4 : vector<64x128xf32>
    %6 = arith.truncf %5 : vector<64x128xf32> to vector<64x128xbf16>
    %c0_5 = arith.constant 0 : index
    %c0_6 = arith.constant 0 : index
    %7 = vector.load %arg4[%c0_5, %c0_6] : memref<64x128xbf16, #tpu.memory_space<vmem>>, vector<64x128xbf16>
    tpu.vector_store %arg4[%c0_5, %c0_6], %6 {strides = array<i32>} : memref<64x128xbf16, #tpu.memory_space<vmem>>, vector<64x128xbf16>,
    return
  }
  func.func @transform_0(%arg0: i32) -> (i32, i32) {
    %c0_i32 = arith.constant 0 : i32
    %c0_i32_0 = arith.constant 0 : i32
    return %c0_i32, %arg0 : i32, i32
  }
  func.func @transform_1(%arg0: i32) -> (i32, i32) {
    %c0_i32 = arith.constant 0 : i32
    %c0_i32_0 = arith.constant 0 : i32
    %c0_i32_1 = arith.constant 0 : i32
    return %c0_i32, %c0_i32_0 : i32, i32
  }
  func.func @transform_2(%arg0: i32) -> (i32, i32) {
    %c0_i32 = arith.constant 0 : i32
    %c0_i32_0 = arith.constant 0 : i32
    %c0_i32_1 = arith.constant 0 : i32
    return %c0_i32, %c0_i32_0 : i32, i32
  }
  func.func @transform_3(%arg0: i32) -> (i32, i32) {
    %c0_i32 = arith.constant 0 : i32
    %c0_i32_0 = arith.constant 0 : i32
    return %c0_i32, %arg0 : i32, i32
  }
}

module attributes {stable_mosaic.version = 11 : i64} {
  func.func @_fc_fused_kernel(%arg0: memref<16x1024xbf16, #tpu.memory_space<vmem>>, %arg1: memref<1024x256xbf16, #tpu.memory_space<vmem>>, %arg2: memref<1x256xf32, #tpu.memory_space<vmem>>, %arg3: memref<256x128xbf16, #tpu.memory_space<vmem>>, %arg4: memref<1x128xf32, #tpu.memory_space<vmem>>, %arg5: memref<16x128xf32, #tpu.memory_space<vmem>>) attributes {dimension_semantics = [], scalar_prefetch = 0 : i64, scratch_operands = 0 : i64, tpu.core_type = #tpu.core_type<tc>} {
    %c0 = arith.constant 0 : index
    %c0_0 = arith.constant 0 : index
    %0 = vector.load %arg0[%c0, %c0_0] : memref<16x1024xbf16, #tpu.memory_space<vmem>>, vector<16x1024xbf16>
    %c0_1 = arith.constant 0 : index
    %c0_2 = arith.constant 0 : index
    %1 = vector.load %arg1[%c0_1, %c0_2] : memref<1024x256xbf16, #tpu.memory_space<vmem>>, vector<1024x256xbf16>
    %cst = arith.constant dense<0.000000e+00> : vector<16x256xf32>
    %2 = tpu.matmul %0, %1, %cst {dimension_numbers = #tpu.dot_dimension_numbers<[1], [0], [0], [1], [0, 0, 1, 1], [], []>} : vector<16x1024xbf16>, vector<1024x256xbf16>, vector<16x256xf32> -> vector<16x256xf32>
    %c0_3 = arith.constant 0 : index
    %c0_4 = arith.constant 0 : index
    %3 = vector.load %arg2[%c0_3, %c0_4] : memref<1x256xf32, #tpu.memory_space<vmem>>, vector<1x256xf32>
    %4 = vector.broadcast %3 : vector<1x256xf32> to vector<16x256xf32>
    %5 = arith.addf %2, %4 : vector<16x256xf32>
    %cst_5 = arith.constant 0.000000e+00 : f32
    %6 = vector.broadcast %cst_5 : f32 to vector<16x256xf32>
    %7 = arith.maximumf %5, %6 : vector<16x256xf32>
    %8 = arith.truncf %7 : vector<16x256xf32> to vector<16x256xbf16>
    %c0_6 = arith.constant 0 : index
    %c0_7 = arith.constant 0 : index
    %9 = vector.load %arg3[%c0_6, %c0_7] : memref<256x128xbf16, #tpu.memory_space<vmem>>, vector<256x128xbf16>
    %cst_8 = arith.constant dense<0.000000e+00> : vector<16x128xf32>
    %10 = tpu.matmul %8, %9, %cst_8 {dimension_numbers = #tpu.dot_dimension_numbers<[1], [0], [0], [1], [0, 0, 1, 1], [], []>} : vector<16x256xbf16>, vector<256x128xbf16>, vector<16x128xf32> -> vector<16x128xf32>
    %c0_9 = arith.constant 0 : index
    %c0_10 = arith.constant 0 : index
    %11 = vector.load %arg4[%c0_9, %c0_10] : memref<1x128xf32, #tpu.memory_space<vmem>>, vector<1x128xf32>
    %12 = vector.broadcast %11 : vector<1x128xf32> to vector<16x128xf32>
    %13 = arith.addf %10, %12 : vector<16x128xf32>
    %c0_11 = arith.constant 0 : index
    %c0_12 = arith.constant 0 : index
    %14 = vector.load %arg5[%c0_11, %c0_12] : memref<16x128xf32, #tpu.memory_space<vmem>>, vector<16x128xf32>
    tpu.vector_store %arg5[%c0_11, %c0_12], %13 {strides = array<i32>} : memref<16x128xf32, #tpu.memory_space<vmem>>, vector<16x128xf32>,
    return
  }
}

</mosaic_0001>

<bundles_post_ra>
// kernel: forward.3
= control target key start
LH: loop header
LB: loop body
LE: loop exit
PB: predicated region body
PF: predicated region fallthrough
CT: control target
= control target key end

     0   :  { %s4538_s12 = smov 0   ;;  %s4540_s13 = smov 0   ;;  %s5819_s0 = inlined_call_operand.vmem [shape: bf16[208,11264], index: 0, kind: input, shape index: {}]   ;;  %s5820_s1 = inlined_call_operand.vmem [shape: bf16[32,208], index: 1, kind: input, shape index: {}]   ;;  %s5821_s2 = inlined_call_operand.vmem [shape: f32[32,1], index: 2, kind: input, shape index: {}]   ;;  %s5822_s3 = inlined_call_operand.vmem [shape: bf16[32,11264], index: 3, kind: output, shape index: {}]  }
   0x1   :  { %s4542_s14 = smov 0  }
   0x2 LB: > { %s3587_s15 = sadd.s32 4294967295, %s4515_s14   ;;  %s4555_s16 = sadd.s32 1, %s4515_s14   ;;  %s4515_s14 = sphi %s4542_s14, %s5826_s14   ;;  %s4511_s13 = sphi %s4540_s13, %s5825_s13   ;;  %s4507_s12 = sphi %s4538_s12, %s5824_s12  }
   0x3   : > { %s17_s17 = ssub.s32 %s4515_s14, %s4555_s16  ;;  %s20_s18 = sadd.s32 1, %s4511_s13 }
   0x4   : > { %p18_p0 = scmp.eq.s32.totalorder %s17_s17, 0  ;;  %p27_p1 = scmp.ne.s32.totalorder %s4511_s13, %s4507_s12 }
   0x5   : > { %p28_p2 = scmp.eq.s32.totalorder %s4515_s14, 0  ;;  %p99_p3 = scmp.eq.s32.totalorder %s3587_s15, 3 }
   0x6   : > { %s4566_s19 = scalar_select %p18_p0, %s4511_s13, %s20_s18  }
   0x7   : > { %p29_p4 = por %p28_p2, %p27_p1  ;;  %p4568_p5 = por %p99_p3, %p27_p1 }
   0x8   : > { %p3590_p6 = scmp.ge.s32.totalorder %s4515_s14, 4 }
   0xa   : > { %127 = sbr.rel (%p3590_p6) target bundleno = 165 (0xa5), region = 24 }
  0x11   : > { %130 = sbr.rel (!%p29_p4) target bundleno = 165 (0xa5), region = 28  ;;  %s132_s21 = sand.u32 (%p29_p4), 1, %s4511_s13  }
  0x12   : > { %s3952_s22 = smul.u32 (%p29_p4), 88, %s4515_s14 }
  0x13   : > { %s4024_s23 = smul.u32 (%p29_p4), 2288, %s132_s21 }
  0x14   : > { %s4578_s26 = scalar_lea.vmem (%p29_p4), %s5819_s0, %s3952_s22 }
  0x15   : > { %v150_v0 = vld [vmem:[%s4578_s26] sm:$0xff] (%p29_p4)  ;;  %v152_v1 = vld [vmem:[%s4578_s26 + $0x8] sm:$0xff] (%p29_p4)  ;;  %v154_v2 = vld [vmem:[%s4578_s26 + $0x10] sm:$0xff] (%p29_p4)  ;;  %s4583_s27 = scalar_lea.vmem (%p29_p4), [#allocation2], %s4024_s23 }
  0x16   : > { %151 = vst [vmem:[%s4583_s27] sm:$0xff] (%p29_p4), %v150_v0  ;;  %153 = vst [vmem:[%s4583_s27 + $0x8] sm:$0xff] (%p29_p4), %v152_v1  ;;  %v156_v3 = vld [vmem:[%s4578_s26 + $0x18] sm:$0xff] (%p29_p4)  ;;  %v158_v4 = vld [vmem:[%s4578_s26 + $0x20] sm:$0xff] (%p29_p4) }
  0x17   : > { %155 = vst [vmem:[%s4583_s27 + $0x10] sm:$0xff] (%p29_p4), %v154_v2  ;;  %v160_v5 = vld [vmem:[%s4578_s26 + $0x28] sm:$0xff] (%p29_p4)  ;;  %157 = vst [vmem:[%s4583_s27 + $0x18] sm:$0xff] (%p29_p4), %v156_v3  ;;  %v162_v6 = vld [vmem:[%s4578_s26 + $0x30] sm:$0xff] (%p29_p4) }
  0x18   : > { %159 = vst [vmem:[%s4583_s27 + $0x20] sm:$0xff] %v158_v4  ;;  %161 = vst [vmem:[%s4583_s27 + $0x28] sm:$0xff] %v160_v5  ;;  %v164_v7 = vld [vmem:[%s4578_s26 + $0x38] sm:$0xff]  ;;  %v166_v8 = vld [vmem:[%s4578_s26 + $0x40] sm:$0xff] }
  0x19   : > { %163 = vst [vmem:[%s4583_s27 + $0x30] sm:$0xff] %v162_v6  ;;  %165 = vst [vmem:[%s4583_s27 + $0x38] sm:$0xff] %v164_v7  ;;  %v168_v9 = vld [vmem:[%s4578_s26 + $0x48] sm:$0xff]  ;;  %v170_v10 = vld [vmem:[%s4578_s26 + $0x50] sm:$0xff] }
  0x1a   : > { %167 = vst [vmem:[%s4583_s27 + $0x40] sm:$0xff] %v166_v8  ;;  %v172_v11 = vld [vmem:[%s4578_s26 + $0x160] sm:$0xff]  ;;  %169 = vst [vmem:[%s4583_s27 + $0x48] sm:$0xff] %v168_v9  ;;  %v174_v12 = vld [vmem:[%s4578_s26 + $0x168] sm:$0xff] }
  0x1b   : > { %171 = vst [vmem:[%s4583_s27 + $0x50] sm:$0xff] %v170_v10  ;;  %173 = vst [vmem:[%s4583_s27 + $0x58] sm:$0xff] %v172_v11  ;;  %v176_v13 = vld [vmem:[%s4578_s26 + $0x170] sm:$0xff]  ;;  %v178_v14 = vld [vmem:[%s4578_s26 + $0x178] sm:$0xff] }
  0x1c   : > { %175 = vst [vmem:[%s4583_s27 + $0x60] sm:$0xff] %v174_v12  ;;  %177 = vst [vmem:[%s4583_s27 + $0x68] sm:$0xff] %v176_v13  ;;  %v180_v15 = vld [vmem:[%s4578_s26 + $0x180] sm:$0xff]  ;;  %v182_v16 = vld [vmem:[%s4578_s26 + $0x188] sm:$0xff] }
  0x1d   : > { %179 = vst [vmem:[%s4583_s27 + $0x70] sm:$0xff] %v178_v14  ;;  %v184_v17 = vld [vmem:[%s4578_s26 + $0x190] sm:$0xff]  ;;  %181 = vst [vmem:[%s4583_s27 + $0x78] sm:$0xff] %v180_v15  ;;  %v186_v18 = vld [vmem:[%s4578_s26 + $0x198] sm:$0xff] }
  0x1e   : > { %183 = vst [vmem:[%s4583_s27 + $0x80] sm:$0xff] %v182_v16  ;;  %185 = vst [vmem:[%s4583_s27 + $0x88] sm:$0xff] %v184_v17  ;;  %v188_v19 = vld [vmem:[%s4578_s26 + $0x1a0] sm:$0xff]  ;;  %v190_v20 = vld [vmem:[%s4578_s26 + $0x1a8] sm:$0xff] }
  0x1f   : > { %187 = vst [vmem:[%s4583_s27 + $0x90] sm:$0xff] %v186_v18  ;;  %189 = vst [vmem:[%s4583_s27 + $0x98] sm:$0xff] %v188_v19  ;;  %v192_v21 = vld [vmem:[%s4578_s26 + $0x1b0] sm:$0xff]  ;;  %v194_v22 = vld [vmem:[%s4578_s26 + $0x2c0] sm:$0xff] }
  0x20   : > { %191 = vst [vmem:[%s4583_s27 + $0xa0] sm:$0xff] %v190_v20  ;;  %v196_v23 = vld [vmem:[%s4578_s26 + $0x2c8] sm:$0xff]  ;;  %193 = vst [vmem:[%s4583_s27 + $0xa8] sm:$0xff] %v192_v21  ;;  %v198_v24 = vld [vmem:[%s4578_s26 + $0x2d0] sm:$0xff] }
  0x21   : > { %195 = vst [vmem:[%s4583_s27 + $0xb0] sm:$0xff] %v194_v22  ;;  %197 = vst [vmem:[%s4583_s27 + $0xb8] sm:$0xff] %v196_v23  ;;  %v200_v25 = vld [vmem:[%s4578_s26 + $0x2d8] sm:$0xff]  ;;  %v202_v26 = vld [vmem:[%s4578_s26 + $0x2e0] sm:$0xff] }
  0x22   : > { %199 = vst [vmem:[%s4583_s27 + $0xc0] sm:$0xff] %v198_v24  ;;  %201 = vst [vmem:[%s4583_s27 + $0xc8] sm:$0xff] %v200_v25  ;;  %v204_v27 = vld [vmem:[%s4578_s26 + $0x2e8] sm:$0xff]  ;;  %v206_v28 = vld [vmem:[%s4578_s26 + $0x2f0] sm:$0xff] }
  0x23   : > { %203 = vst [vmem:[%s4583_s27 + $0xd0] sm:$0xff] %v202_v26  ;;  %v208_v29 = vld [vmem:[%s4578_s26 + $0x2f8] sm:$0xff]  ;;  %205 = vst [vmem:[%s4583_s27 + $0xd8] sm:$0xff] %v204_v27  ;;  %v210_v30 = vld [vmem:[%s4578_s26 + $0x300] sm:$0xff] }
  0x24   : > { %207 = vst [vmem:[%s4583_s27 + $0xe0] sm:$0xff] %v206_v28  ;;  %209 = vst [vmem:[%s4583_s27 + $0xe8] sm:$0xff] %v208_v29  ;;  %v212_v31 = vld [vmem:[%s4578_s26 + $0x308] sm:$0xff]  ;;  %v214_v32 = vld [vmem:[%s4578_s26 + $0x310] sm:$0xff] }
  0x25   : > { %211 = vst [vmem:[%s4583_s27 + $0xf0] sm:$0xff] %v210_v30  ;;  %213 = vst [vmem:[%s4583_s27 + $0xf8] sm:$0xff] %v212_v31  ;;  %v216_v33 = vld [vmem:[%s4578_s26 + $0x420] sm:$0xff]  ;;  %v218_v34 = vld [vmem:[%s4578_s26 + $0x428] sm:$0xff] }
  0x26   : > { %215 = vst [vmem:[%s4583_s27 + $0x100] sm:$0xff] %v214_v32  ;;  %v220_v35 = vld [vmem:[%s4578_s26 + $0x430] sm:$0xff]  ;;  %217 = vst [vmem:[%s4583_s27 + $0x108] sm:$0xff] %v216_v33  ;;  %v222_v36 = vld [vmem:[%s4578_s26 + $0x438] sm:$0xff] }
  0x27   : > { %219 = vst [vmem:[%s4583_s27 + $0x110] sm:$0xff] %v218_v34  ;;  %221 = vst [vmem:[%s4583_s27 + $0x118] sm:$0xff] %v220_v35  ;;  %v224_v37 = vld [vmem:[%s4578_s26 + $0x440] sm:$0xff]  ;;  %v226_v38 = vld [vmem:[%s4578_s26 + $0x448] sm:$0xff] }
  0x28   : > { %223 = vst [vmem:[%s4583_s27 + $0x120] sm:$0xff] %v222_v36  ;;  %225 = vst [vmem:[%s4583_s27 + $0x128] sm:$0xff] %v224_v37  ;;  %v228_v39 = vld [vmem:[%s4578_s26 + $0x450] sm:$0xff]  ;;  %v230_v40 = vld [vmem:[%s4578_s26 + $0x458] sm:$0xff] }
  0x29   : > { %227 = vst [vmem:[%s4583_s27 + $0x130] sm:$0xff] %v226_v38  ;;  %v232_v41 = vld [vmem:[%s4578_s26 + $0x460] sm:$0xff]  ;;  %229 = vst [vmem:[%s4583_s27 + $0x138] sm:$0xff] %v228_v39  ;;  %v234_v42 = vld [vmem:[%s4578_s26 + $0x468] sm:$0xff] }
  0x2a   : > { %231 = vst [vmem:[%s4583_s27 + $0x140] sm:$0xff] %v230_v40  ;;  %233 = vst [vmem:[%s4583_s27 + $0x148] sm:$0xff] %v232_v41  ;;  %v236_v43 = vld [vmem:[%s4578_s26 + $0x470] sm:$0xff]  ;;  %v238_v44 = vld [vmem:[%s4578_s26 + $0x580] sm:$0xff] }
  0x2b   : > { %235 = vst [vmem:[%s4583_s27 + $0x150] sm:$0xff] %v234_v42  ;;  %237 = vst [vmem:[%s4583_s27 + $0x158] sm:$0xff] %v236_v43  ;;  %v240_v45 = vld [vmem:[%s4578_s26 + $0x588] sm:$0xff]  ;;  %v242_v46 = vld [vmem:[%s4578_s26 + $0x590] sm:$0xff] }
  0x2c   : > { %239 = vst [vmem:[%s4583_s27 + $0x160] sm:$0xff] %v238_v44  ;;  %v244_v47 = vld [vmem:[%s4578_s26 + $0x598] sm:$0xff]  ;;  %241 = vst [vmem:[%s4583_s27 + $0x168] sm:$0xff] %v240_v45  ;;  %v246_v48 = vld [vmem:[%s4578_s26 + $0x5a0] sm:$0xff] }
  0x2d   : > { %243 = vst [vmem:[%s4583_s27 + $0x170] sm:$0xff] %v242_v46  ;;  %245 = vst [vmem:[%s4583_s27 + $0x178] sm:$0xff] %v244_v47  ;;  %v248_v49 = vld [vmem:[%s4578_s26 + $0x5a8] sm:$0xff]  ;;  %v250_v50 = vld [vmem:[%s4578_s26 + $0x5b0] sm:$0xff] }
  0x2e   : > { %247 = vst [vmem:[%s4583_s27 + $0x180] sm:$0xff] %v246_v48  ;;  %249 = vst [vmem:[%s4583_s27 + $0x188] sm:$0xff] %v248_v49  ;;  %v252_v51 = vld [vmem:[%s4578_s26 + $0x5b8] sm:$0xff]  ;;  %v254_v52 = vld [vmem:[%s4578_s26 + $0x5c0] sm:$0xff] }
  0x2f   : > { %251 = vst [vmem:[%s4583_s27 + $0x190] sm:$0xff] %v250_v50  ;;  %v256_v53 = vld [vmem:[%s4578_s26 + $0x5c8] sm:$0xff]  ;;  %253 = vst [vmem:[%s4583_s27 + $0x198] sm:$0xff] %v252_v51  ;;  %v258_v54 = vld [vmem:[%s4578_s26 + $0x5d0] sm:$0xff] }
  0x30   : > { %255 = vst [vmem:[%s4583_s27 + $0x1a0] sm:$0xff] %v254_v52  ;;  %257 = vst [vmem:[%s4583_s27 + $0x1a8] sm:$0xff] %v256_v53  ;;  %v260_v55 = vld [vmem:[%s4578_s26 + $0x6e0] sm:$0xff]  ;;  %v262_v56 = vld [vmem:[%s4578_s26 + $0x6e8] sm:$0xff] }
  0x31   : > { %259 = vst [vmem:[%s4583_s27 + $0x1b0] sm:$0xff] %v258_v54  ;;  %261 = vst [vmem:[%s4583_s27 + $0x1b8] sm:$0xff] %v260_v55  ;;  %v264_v57 = vld [vmem:[%s4578_s26 + $0x6f0] sm:$0xff]  ;;  %v266_v58 = vld [vmem:[%s4578_s26 + $0x6f8] sm:$0xff] }
  0x32   : > { %263 = vst [vmem:[%s4583_s27 + $0x1c0] sm:$0xff] %v262_v56  ;;  %v268_v59 = vld [vmem:[%s4578_s26 + $0x700] sm:$0xff]  ;;  %265 = vst [vmem:[%s4583_s27 + $0x1c8] sm:$0xff] %v264_v57  ;;  %v270_v60 = vld [vmem:[%s4578_s26 + $0x708] sm:$0xff] }
  0x33   : > { %267 = vst [vmem:[%s4583_s27 + $0x1d0] sm:$0xff] %v266_v58  ;;  %269 = vst [vmem:[%s4583_s27 + $0x1d8] sm:$0xff] %v268_v59  ;;  %v272_v61 = vld [vmem:[%s4578_s26 + $0x710] sm:$0xff]  ;;  %v274_v62 = vld [vmem:[%s4578_s26 + $0x718] sm:$0xff] }
  0x34   : > { %271 = vst [vmem:[%s4583_s27 + $0x1e0] sm:$0xff] %v270_v60  ;;  %273 = vst [vmem:[%s4583_s27 + $0x1e8] sm:$0xff] %v272_v61  ;;  %v276_v63 = vld [vmem:[%s4578_s26 + $0x720] sm:$0xff]  ;;  %v278_v0 = vld [vmem:[%s4578_s26 + $0x728] sm:$0xff] }
  0x35   : > { %275 = vst [vmem:[%s4583_s27 + $0x1f0] sm:$0xff] %v274_v62  ;;  %v280_v1 = vld [vmem:[%s4578_s26 + $0x730] sm:$0xff]  ;;  %277 = vst [vmem:[%s4583_s27 + $0x1f8] sm:$0xff] %v276_v63  ;;  %v282_v2 = vld [vmem:[%s4578_s26 + $0x840] sm:$0xff] }
  0x36   : > { %279 = vst [vmem:[%s4583_s27 + $0x200] sm:$0xff] %v278_v0  ;;  %281 = vst [vmem:[%s4583_s27 + $0x208] sm:$0xff] %v280_v1  ;;  %v284_v3 = vld [vmem:[%s4578_s26 + $0x848] sm:$0xff]  ;;  %v286_v4 = vld [vmem:[%s4578_s26 + $0x850] sm:$0xff] }
  0x37   : > { %283 = vst [vmem:[%s4583_s27 + $0x210] sm:$0xff] %v282_v2  ;;  %285 = vst [vmem:[%s4583_s27 + $0x218] sm:$0xff] %v284_v3  ;;  %v288_v5 = vld [vmem:[%s4578_s26 + $0x858] sm:$0xff]  ;;  %v290_v6 = vld [vmem:[%s4578_s26 + $0x860] sm:$0xff] }
  0x38   : > { %287 = vst [vmem:[%s4583_s27 + $0x220] sm:$0xff] %v286_v4  ;;  %v292_v7 = vld [vmem:[%s4578_s26 + $0x868] sm:$0xff]  ;;  %289 = vst [vmem:[%s4583_s27 + $0x228] sm:$0xff] %v288_v5  ;;  %v294_v8 = vld [vmem:[%s4578_s26 + $0x870] sm:$0xff] }
  0x39   : > { %291 = vst [vmem:[%s4583_s27 + $0x230] sm:$0xff] %v290_v6  ;;  %293 = vst [vmem:[%s4583_s27 + $0x238] sm:$0xff] %v292_v7  ;;  %v296_v9 = vld [vmem:[%s4578_s26 + $0x878] sm:$0xff]  ;;  %v298_v10 = vld [vmem:[%s4578_s26 + $0x880] sm:$0xff] }
  0x3a   : > { %295 = vst [vmem:[%s4583_s27 + $0x240] sm:$0xff] %v294_v8  ;;  %297 = vst [vmem:[%s4583_s27 + $0x248] sm:$0xff] %v296_v9  ;;  %v300_v11 = vld [vmem:[%s4578_s26 + $0x888] sm:$0xff]  ;;  %v302_v12 = vld [vmem:[%s4578_s26 + $0x890] sm:$0xff] }
  0x3b   : > { %299 = vst [vmem:[%s4583_s27 + $0x250] sm:$0xff] %v298_v10  ;;  %v304_v13 = vld [vmem:[%s4578_s26 + $0x9a0] sm:$0xff]  ;;  %301 = vst [vmem:[%s4583_s27 + $0x258] sm:$0xff] %v300_v11  ;;  %v306_v14 = vld [vmem:[%s4578_s26 + $0x9a8] sm:$0xff] }
  0x3c   : > { %303 = vst [vmem:[%s4583_s27 + $0x260] sm:$0xff] %v302_v12  ;;  %305 = vst [vmem:[%s4583_s27 + $0x268] sm:$0xff] %v304_v13  ;;  %v308_v15 = vld [vmem:[%s4578_s26 + $0x9b0] sm:$0xff]  ;;  %v310_v16 = vld [vmem:[%s4578_s26 + $0x9b8] sm:$0xff] }
  0x3d   : > { %307 = vst [vmem:[%s4583_s27 + $0x270] sm:$0xff] %v306_v14  ;;  %309 = vst [vmem:[%s4583_s27 + $0x278] sm:$0xff] %v308_v15  ;;  %v312_v17 = vld [vmem:[%s4578_s26 + $0x9c0] sm:$0xff]  ;;  %v314_v18 = vld [vmem:[%s4578_s26 + $0x9c8] sm:$0xff] }
  0x3e   : > { %311 = vst [vmem:[%s4583_s27 + $0x280] sm:$0xff] %v310_v16  ;;  %v316_v19 = vld [vmem:[%s4578_s26 + $0x9d0] sm:$0xff]  ;;  %313 = vst [vmem:[%s4583_s27 + $0x288] sm:$0xff] %v312_v17  ;;  %v318_v20 = vld [vmem:[%s4578_s26 + $0x9d8] sm:$0xff] }
  0x3f   : > { %315 = vst [vmem:[%s4583_s27 + $0x290] sm:$0xff] %v314_v18  ;;  %317 = vst [vmem:[%s4583_s27 + $0x298] sm:$0xff] %v316_v19  ;;  %v320_v21 = vld [vmem:[%s4578_s26 + $0x9e0] sm:$0xff]  ;;  %v322_v22 = vld [vmem:[%s4578_s26 + $0x9e8] sm:$0xff] }
  0x40   : > { %319 = vst [vmem:[%s4583_s27 + $0x2a0] sm:$0xff] %v318_v20  ;;  %321 = vst [vmem:[%s4583_s27 + $0x2a8] sm:$0xff] %v320_v21  ;;  %v324_v23 = vld [vmem:[%s4578_s26 + $0x9f0] sm:$0xff]  ;;  %v326_v24 = vld [vmem:[%s4578_s26 + $0xb00] sm:$0xff] }
  0x41   : > { %323 = vst [vmem:[%s4583_s27 + $0x2b0] sm:$0xff] %v322_v22  ;;  %v328_v25 = vld [vmem:[%s4578_s26 + $0xb08] sm:$0xff]  ;;  %325 = vst [vmem:[%s4583_s27 + $0x2b8] sm:$0xff] %v324_v23  ;;  %v330_v26 = vld [vmem:[%s4578_s26 + $0xb10] sm:$0xff] }
  0x42   : > { %327 = vst [vmem:[%s4583_s27 + $0x2c0] sm:$0xff] %v326_v24  ;;  %329 = vst [vmem:[%s4583_s27 + $0x2c8] sm:$0xff] %v328_v25  ;;  %v332_v27 = vld [vmem:[%s4578_s26 + $0xb18] sm:$0xff]  ;;  %v334_v28 = vld [vmem:[%s4578_s26 + $0xb20] sm:$0xff] }
  0x43   : > { %331 = vst [vmem:[%s4583_s27 + $0x2d0] sm:$0xff] %v330_v26  ;;  %333 = vst [vmem:[%s4583_s27 + $0x2d8] sm:$0xff] %v332_v27  ;;  %v336_v29 = vld [vmem:[%s4578_s26 + $0xb28] sm:$0xff]  ;;  %v338_v30 = vld [vmem:[%s4578_s26 + $0xb30] sm:$0xff] }
  0x44   : > { %335 = vst [vmem:[%s4583_s27 + $0x2e0] sm:$0xff] %v334_v28  ;;  %v340_v31 = vld [vmem:[%s4578_s26 + $0xb38] sm:$0xff]  ;;  %337 = vst [vmem:[%s4583_s27 + $0x2e8] sm:$0xff] %v336_v29  ;;  %v342_v32 = vld [vmem:[%s4578_s26 + $0xb40] sm:$0xff] }
  0x45   : > { %339 = vst [vmem:[%s4583_s27 + $0x2f0] sm:$0xff] %v338_v30  ;;  %341 = vst [vmem:[%s4583_s27 + $0x2f8] sm:$0xff] %v340_v31  ;;  %v344_v33 = vld [vmem:[%s4578_s26 + $0xb48] sm:$0xff]  ;;  %v346_v34 = vld [vmem:[%s4578_s26 + $0xb50] sm:$0xff] }
  0x46   : > { %343 = vst [vmem:[%s4583_s27 + $0x300] sm:$0xff] %v342_v32  ;;  %345 = vst [vmem:[%s4583_s27 + $0x308] sm:$0xff] %v344_v33  ;;  %v348_v35 = vld [vmem:[%s4578_s26 + $0xc60] sm:$0xff]  ;;  %v350_v36 = vld [vmem:[%s4578_s26 + $0xc68] sm:$0xff] }
  0x47   : > { %347 = vst [vmem:[%s4583_s27 + $0x310] sm:$0xff] %v346_v34  ;;  %v352_v37 = vld [vmem:[%s4578_s26 + $0xc70] sm:$0xff]  ;;  %349 = vst [vmem:[%s4583_s27 + $0x318] sm:$0xff] %v348_v35  ;;  %v354_v38 = vld [vmem:[%s4578_s26 + $0xc78] sm:$0xff] }
  0x48   : > { %351 = vst [vmem:[%s4583_s27 + $0x320] sm:$0xff] %v350_v36  ;;  %353 = vst [vmem:[%s4583_s27 + $0x328] sm:$0xff] %v352_v37  ;;  %v356_v39 = vld [vmem:[%s4578_s26 + $0xc80] sm:$0xff]  ;;  %v358_v40 = vld [vmem:[%s4578_s26 + $0xc88] sm:$0xff] }
  0x49   : > { %355 = vst [vmem:[%s4583_s27 + $0x330] sm:$0xff] %v354_v38  ;;  %357 = vst [vmem:[%s4583_s27 + $0x338] sm:$0xff] %v356_v39  ;;  %v360_v41 = vld [vmem:[%s4578_s26 + $0xc90] sm:$0xff]  ;;  %v362_v42 = vld [vmem:[%s4578_s26 + $0xc98] sm:$0xff] }
  0x4a   : > { %359 = vst [vmem:[%s4583_s27 + $0x340] sm:$0xff] %v358_v40  ;;  %v364_v43 = vld [vmem:[%s4578_s26 + $0xca0] sm:$0xff]  ;;  %361 = vst [vmem:[%s4583_s27 + $0x348] sm:$0xff] %v360_v41  ;;  %v366_v44 = vld [vmem:[%s4578_s26 + $0xca8] sm:$0xff] }
  0x4b   : > { %363 = vst [vmem:[%s4583_s27 + $0x350] sm:$0xff] %v362_v42  ;;  %365 = vst [vmem:[%s4583_s27 + $0x358] sm:$0xff] %v364_v43  ;;  %v368_v45 = vld [vmem:[%s4578_s26 + $0xcb0] sm:$0xff]  ;;  %v370_v46 = vld [vmem:[%s4578_s26 + $0xdc0] sm:$0xff] }
  0x4c   : > { %367 = vst [vmem:[%s4583_s27 + $0x360] sm:$0xff] %v366_v44  ;;  %369 = vst [vmem:[%s4583_s27 + $0x368] sm:$0xff] %v368_v45  ;;  %v372_v47 = vld [vmem:[%s4578_s26 + $0xdc8] sm:$0xff]  ;;  %v374_v48 = vld [vmem:[%s4578_s26 + $0xdd0] sm:$0xff] }
  0x4d   : > { %371 = vst [vmem:[%s4583_s27 + $0x370] sm:$0xff] %v370_v46  ;;  %v376_v49 = vld [vmem:[%s4578_s26 + $0xdd8] sm:$0xff]  ;;  %373 = vst [vmem:[%s4583_s27 + $0x378] sm:$0xff] %v372_v47  ;;  %v378_v50 = vld [vmem:[%s4578_s26 + $0xde0] sm:$0xff] }
  0x4e   : > { %375 = vst [vmem:[%s4583_s27 + $0x380] sm:$0xff] %v374_v48  ;;  %377 = vst [vmem:[%s4583_s27 + $0x388] sm:$0xff] %v376_v49  ;;  %v380_v51 = vld [vmem:[%s4578_s26 + $0xde8] sm:$0xff]  ;;  %v382_v52 = vld [vmem:[%s4578_s26 + $0xdf0] sm:$0xff] }
  0x4f   : > { %379 = vst [vmem:[%s4583_s27 + $0x390] sm:$0xff] %v378_v50  ;;  %381 = vst [vmem:[%s4583_s27 + $0x398] sm:$0xff] %v380_v51  ;;  %v384_v53 = vld [vmem:[%s4578_s26 + $0xdf8] sm:$0xff]  ;;  %v386_v54 = vld [vmem:[%s4578_s26 + $0xe00] sm:$0xff] }
  0x50   : > { %383 = vst [vmem:[%s4583_s27 + $0x3a0] sm:$0xff] %v382_v52  ;;  %v388_v55 = vld [vmem:[%s4578_s26 + $0xe08] sm:$0xff]  ;;  %385 = vst [vmem:[%s4583_s27 + $0x3a8] sm:$0xff] %v384_v53  ;;  %v390_v56 = vld [vmem:[%s4578_s26 + $0xe10] sm:$0xff] }
  0x51   : > { %387 = vst [vmem:[%s4583_s27 + $0x3b0] sm:$0xff] %v386_v54  ;;  %389 = vst [vmem:[%s4583_s27 + $0x3b8] sm:$0xff] %v388_v55  ;;  %v392_v57 = vld [vmem:[%s4578_s26 + $0xf20] sm:$0xff]  ;;  %v394_v58 = vld [vmem:[%s4578_s26 + $0xf28] sm:$0xff] }
  0x52   : > { %391 = vst [vmem:[%s4583_s27 + $0x3c0] sm:$0xff] %v390_v56  ;;  %393 = vst [vmem:[%s4583_s27 + $0x3c8] sm:$0xff] %v392_v57  ;;  %v396_v59 = vld [vmem:[%s4578_s26 + $0xf30] sm:$0xff]  ;;  %v398_v60 = vld [vmem:[%s4578_s26 + $0xf38] sm:$0xff] }
  0x53   : > { %395 = vst [vmem:[%s4583_s27 + $0x3d0] sm:$0xff] %v394_v58  ;;  %v400_v61 = vld [vmem:[%s4578_s26 + $0xf40] sm:$0xff]  ;;  %397 = vst [vmem:[%s4583_s27 + $0x3d8] sm:$0xff] %v396_v59  ;;  %v402_v62 = vld [vmem:[%s4578_s26 + $0xf48] sm:$0xff] }
  0x54   : > { %399 = vst [vmem:[%s4583_s27 + $0x3e0] sm:$0xff] %v398_v60  ;;  %401 = vst [vmem:[%s4583_s27 + $0x3e8] sm:$0xff] %v400_v61  ;;  %v404_v63 = vld [vmem:[%s4578_s26 + $0xf50] sm:$0xff]  ;;  %v406_v0 = vld [vmem:[%s4578_s26 + $0xf58] sm:$0xff] }
  0x55   : > { %403 = vst [vmem:[%s4583_s27 + $0x3f0] sm:$0xff] %v402_v62  ;;  %405 = vst [vmem:[%s4583_s27 + $0x3f8] sm:$0xff] %v404_v63  ;;  %v408_v1 = vld [vmem:[%s4578_s26 + $0xf60] sm:$0xff]  ;;  %v410_v2 = vld [vmem:[%s4578_s26 + $0xf68] sm:$0xff] }
  0x56   : > { %407 = vst [vmem:[%s4583_s27 + $0x400] sm:$0xff] %v406_v0  ;;  %v412_v3 = vld [vmem:[%s4578_s26 + $0xf70] sm:$0xff]  ;;  %409 = vst [vmem:[%s4583_s27 + $0x408] sm:$0xff] %v408_v1  ;;  %v414_v4 = vld [vmem:[%s4578_s26 + $0x1080] sm:$0xff] }
  0x57   : > { %411 = vst [vmem:[%s4583_s27 + $0x410] sm:$0xff] %v410_v2  ;;  %413 = vst [vmem:[%s4583_s27 + $0x418] sm:$0xff] %v412_v3  ;;  %v416_v5 = vld [vmem:[%s4578_s26 + $0x1088] sm:$0xff]  ;;  %v418_v6 = vld [vmem:[%s4578_s26 + $0x1090] sm:$0xff] }
  0x58   : > { %415 = vst [vmem:[%s4583_s27 + $0x420] sm:$0xff] %v414_v4  ;;  %417 = vst [vmem:[%s4583_s27 + $0x428] sm:$0xff] %v416_v5  ;;  %v420_v7 = vld [vmem:[%s4578_s26 + $0x1098] sm:$0xff]  ;;  %v422_v8 = vld [vmem:[%s4578_s26 + $0x10a0] sm:$0xff] }
  0x59   : > { %419 = vst [vmem:[%s4583_s27 + $0x430] sm:$0xff] %v418_v6  ;;  %v424_v9 = vld [vmem:[%s4578_s26 + $0x10a8] sm:$0xff]  ;;  %421 = vst [vmem:[%s4583_s27 + $0x438] sm:$0xff] %v420_v7  ;;  %v426_v10 = vld [vmem:[%s4578_s26 + $0x10b0] sm:$0xff] }
  0x5a   : > { %423 = vst [vmem:[%s4583_s27 + $0x440] sm:$0xff] %v422_v8  ;;  %425 = vst [vmem:[%s4583_s27 + $0x448] sm:$0xff] %v424_v9  ;;  %v428_v11 = vld [vmem:[%s4578_s26 + $0x10b8] sm:$0xff]  ;;  %v430_v12 = vld [vmem:[%s4578_s26 + $0x10c0] sm:$0xff] }
  0x5b   : > { %427 = vst [vmem:[%s4583_s27 + $0x450] sm:$0xff] %v426_v10  ;;  %429 = vst [vmem:[%s4583_s27 + $0x458] sm:$0xff] %v428_v11  ;;  %v432_v13 = vld [vmem:[%s4578_s26 + $0x10c8] sm:$0xff]  ;;  %v434_v14 = vld [vmem:[%s4578_s26 + $0x10d0] sm:$0xff] }
  0x5c   : > { %431 = vst [vmem:[%s4583_s27 + $0x460] sm:$0xff] %v430_v12  ;;  %v436_v15 = vld [vmem:[%s4578_s26 + $0x11e0] sm:$0xff]  ;;  %433 = vst [vmem:[%s4583_s27 + $0x468] sm:$0xff] %v432_v13  ;;  %v438_v16 = vld [vmem:[%s4578_s26 + $0x11e8] sm:$0xff] }
  0x5d   : > { %435 = vst [vmem:[%s4583_s27 + $0x470] sm:$0xff] %v434_v14  ;;  %437 = vst [vmem:[%s4583_s27 + $0x478] sm:$0xff] %v436_v15  ;;  %v440_v17 = vld [vmem:[%s4578_s26 + $0x11f0] sm:$0xff]  ;;  %v442_v18 = vld [vmem:[%s4578_s26 + $0x11f8] sm:$0xff] }
  0x5e   : > { %439 = vst [vmem:[%s4583_s27 + $0x480] sm:$0xff] %v438_v16  ;;  %441 = vst [vmem:[%s4583_s27 + $0x488] sm:$0xff] %v440_v17  ;;  %v444_v19 = vld [vmem:[%s4578_s26 + $0x1200] sm:$0xff]  ;;  %v446_v20 = vld [vmem:[%s4578_s26 + $0x1208] sm:$0xff] }
  0x5f   : > { %443 = vst [vmem:[%s4583_s27 + $0x490] sm:$0xff] %v442_v18  ;;  %v448_v21 = vld [vmem:[%s4578_s26 + $0x1210] sm:$0xff]  ;;  %445 = vst [vmem:[%s4583_s27 + $0x498] sm:$0xff] %v444_v19  ;;  %v450_v22 = vld [vmem:[%s4578_s26 + $0x1218] sm:$0xff] }
  0x60   : > { %447 = vst [vmem:[%s4583_s27 + $0x4a0] sm:$0xff] %v446_v20  ;;  %449 = vst [vmem:[%s4583_s27 + $0x4a8] sm:$0xff] %v448_v21  ;;  %v452_v23 = vld [vmem:[%s4578_s26 + $0x1220] sm:$0xff]  ;;  %v454_v24 = vld [vmem:[%s4578_s26 + $0x1228] sm:$0xff] }
  0x61   : > { %451 = vst [vmem:[%s4583_s27 + $0x4b0] sm:$0xff] %v450_v22  ;;  %453 = vst [vmem:[%s4583_s27 + $0x4b8] sm:$0xff] %v452_v23  ;;  %v456_v25 = vld [vmem:[%s4578_s26 + $0x1230] sm:$0xff]  ;;  %v458_v26 = vld [vmem:[%s4578_s26 + $0x1340] sm:$0xff] }
  0x62   : > { %455 = vst [vmem:[%s4583_s27 + $0x4c0] sm:$0xff] %v454_v24  ;;  %v460_v27 = vld [vmem:[%s4578_s26 + $0x1348] sm:$0xff]  ;;  %457 = vst [vmem:[%s4583_s27 + $0x4c8] sm:$0xff] %v456_v25  ;;  %v462_v28 = vld [vmem:[%s4578_s26 + $0x1350] sm:$0xff] }
  0x63   : > { %459 = vst [vmem:[%s4583_s27 + $0x4d0] sm:$0xff] %v458_v26  ;;  %461 = vst [vmem:[%s4583_s27 + $0x4d8] sm:$0xff] %v460_v27  ;;  %v464_v29 = vld [vmem:[%s4578_s26 + $0x1358] sm:$0xff]  ;;  %v466_v30 = vld [vmem:[%s4578_s26 + $0x1360] sm:$0xff] }
  0x64   : > { %463 = vst [vmem:[%s4583_s27 + $0x4e0] sm:$0xff] %v462_v28  ;;  %465 = vst [vmem:[%s4583_s27 + $0x4e8] sm:$0xff] %v464_v29  ;;  %v468_v31 = vld [vmem:[%s4578_s26 + $0x1368] sm:$0xff]  ;;  %v470_v32 = vld [vmem:[%s4578_s26 + $0x1370] sm:$0xff] }
  0x65   : > { %467 = vst [vmem:[%s4583_s27 + $0x4f0] sm:$0xff] %v466_v30  ;;  %v472_v33 = vld [vmem:[%s4578_s26 + $0x1378] sm:$0xff]  ;;  %469 = vst [vmem:[%s4583_s27 + $0x4f8] sm:$0xff] %v468_v31  ;;  %v474_v34 = vld [vmem:[%s4578_s26 + $0x1380] sm:$0xff] }
  0x66   : > { %471 = vst [vmem:[%s4583_s27 + $0x500] sm:$0xff] %v470_v32  ;;  %473 = vst [vmem:[%s4583_s27 + $0x508] sm:$0xff] %v472_v33  ;;  %v476_v35 = vld [vmem:[%s4578_s26 + $0x1388] sm:$0xff]  ;;  %v478_v36 = vld [vmem:[%s4578_s26 + $0x1390] sm:$0xff] }
  0x67   : > { %475 = vst [vmem:[%s4583_s27 + $0x510] sm:$0xff] %v474_v34  ;;  %477 = vst [vmem:[%s4583_s27 + $0x518] sm:$0xff] %v476_v35  ;;  %v480_v37 = vld [vmem:[%s4578_s26 + $0x14a0] sm:$0xff]  ;;  %v482_v38 = vld [vmem:[%s4578_s26 + $0x14a8] sm:$0xff] }
  0x68   : > { %479 = vst [vmem:[%s4583_s27 + $0x520] sm:$0xff] %v478_v36  ;;  %v484_v39 = vld [vmem:[%s4578_s26 + $0x14b0] sm:$0xff]  ;;  %481 = vst [vmem:[%s4583_s27 + $0x528] sm:$0xff] %v480_v37  ;;  %v486_v40 = vld [vmem:[%s4578_s26 + $0x14b8] sm:$0xff] }
  0x69   : > { %483 = vst [vmem:[%s4583_s27 + $0x530] sm:$0xff] %v482_v38  ;;  %485 = vst [vmem:[%s4583_s27 + $0x538] sm:$0xff] %v484_v39  ;;  %v488_v41 = vld [vmem:[%s4578_s26 + $0x14c0] sm:$0xff]  ;;  %v490_v42 = vld [vmem:[%s4578_s26 + $0x14c8] sm:$0xff] }
  0x6a   : > { %487 = vst [vmem:[%s4583_s27 + $0x540] sm:$0xff] %v486_v40  ;;  %489 = vst [vmem:[%s4583_s27 + $0x548] sm:$0xff] %v488_v41  ;;  %v492_v43 = vld [vmem:[%s4578_s26 + $0x14d0] sm:$0xff]  ;;  %v494_v44 = vld [vmem:[%s4578_s26 + $0x14d8] sm:$0xff] }
  0x6b   : > { %491 = vst [vmem:[%s4583_s27 + $0x550] sm:$0xff] %v490_v42  ;;  %v496_v45 = vld [vmem:[%s4578_s26 + $0x14e0] sm:$0xff]  ;;  %493 = vst [vmem:[%s4583_s27 + $0x558] sm:$0xff] %v492_v43  ;;  %v498_v46 = vld [vmem:[%s4578_s26 + $0x14e8] sm:$0xff] }
  0x6c   : > { %495 = vst [vmem:[%s4583_s27 + $0x560] sm:$0xff] %v494_v44  ;;  %497 = vst [vmem:[%s4583_s27 + $0x568] sm:$0xff] %v496_v45  ;;  %v500_v47 = vld [vmem:[%s4578_s26 + $0x14f0] sm:$0xff]  ;;  %v502_v48 = vld [vmem:[%s4578_s26 + $0x1600] sm:$0xff] }
  0x6d   : > { %499 = vst [vmem:[%s4583_s27 + $0x570] sm:$0xff] %v498_v46  ;;  %501 = vst [vmem:[%s4583_s27 + $0x578] sm:$0xff] %v500_v47  ;;  %v504_v49 = vld [vmem:[%s4578_s26 + $0x1608] sm:$0xff]  ;;  %v506_v50 = vld [vmem:[%s4578_s26 + $0x1610] sm:$0xff] }
  0x6e   : > { %503 = vst [vmem:[%s4583_s27 + $0x580] sm:$0xff] %v502_v48  ;;  %v508_v51 = vld [vmem:[%s4578_s26 + $0x1618] sm:$0xff]  ;;  %505 = vst [vmem:[%s4583_s27 + $0x588] sm:$0xff] %v504_v49  ;;  %v510_v52 = vld [vmem:[%s4578_s26 + $0x1620] sm:$0xff] }
  0x6f   : > { %507 = vst [vmem:[%s4583_s27 + $0x590] sm:$0xff] %v506_v50  ;;  %509 = vst [vmem:[%s4583_s27 + $0x598] sm:$0xff] %v508_v51  ;;  %v512_v53 = vld [vmem:[%s4578_s26 + $0x1628] sm:$0xff]  ;;  %v514_v54 = vld [vmem:[%s4578_s26 + $0x1630] sm:$0xff] }
  0x70   : > { %511 = vst [vmem:[%s4583_s27 + $0x5a0] sm:$0xff] %v510_v52  ;;  %513 = vst [vmem:[%s4583_s27 + $0x5a8] sm:$0xff] %v512_v53  ;;  %v516_v55 = vld [vmem:[%s4578_s26 + $0x1638] sm:$0xff]  ;;  %v518_v56 = vld [vmem:[%s4578_s26 + $0x1640] sm:$0xff] }
  0x71   : > { %515 = vst [vmem:[%s4583_s27 + $0x5b0] sm:$0xff] %v514_v54  ;;  %v520_v57 = vld [vmem:[%s4578_s26 + $0x1648] sm:$0xff]  ;;  %517 = vst [vmem:[%s4583_s27 + $0x5b8] sm:$0xff] %v516_v55  ;;  %v522_v58 = vld [vmem:[%s4578_s26 + $0x1650] sm:$0xff] }
  0x72   : > { %519 = vst [vmem:[%s4583_s27 + $0x5c0] sm:$0xff] %v518_v56  ;;  %521 = vst [vmem:[%s4583_s27 + $0x5c8] sm:$0xff] %v520_v57  ;;  %v524_v59 = vld [vmem:[%s4578_s26 + $0x1760] sm:$0xff]  ;;  %v526_v60 = vld [vmem:[%s4578_s26 + $0x1768] sm:$0xff] }
  0x73   : > { %523 = vst [vmem:[%s4583_s27 + $0x5d0] sm:$0xff] %v522_v58  ;;  %525 = vst [vmem:[%s4583_s27 + $0x5d8] sm:$0xff] %v524_v59  ;;  %v528_v61 = vld [vmem:[%s4578_s26 + $0x1770] sm:$0xff]  ;;  %v530_v62 = vld [vmem:[%s4578_s26 + $0x1778] sm:$0xff] }
  0x74   : > { %527 = vst [vmem:[%s4583_s27 + $0x5e0] sm:$0xff] %v526_v60  ;;  %v532_v63 = vld [vmem:[%s4578_s26 + $0x1780] sm:$0xff]  ;;  %529 = vst [vmem:[%s4583_s27 + $0x5e8] sm:$0xff] %v528_v61  ;;  %v534_v0 = vld [vmem:[%s4578_s26 + $0x1788] sm:$0xff] }
  0x75   : > { %531 = vst [vmem:[%s4583_s27 + $0x5f0] sm:$0xff] %v530_v62  ;;  %533 = vst [vmem:[%s4583_s27 + $0x5f8] sm:$0xff] %v532_v63  ;;  %v536_v1 = vld [vmem:[%s4578_s26 + $0x1790] sm:$0xff]  ;;  %v538_v2 = vld [vmem:[%s4578_s26 + $0x1798] sm:$0xff] }
  0x76   : > { %535 = vst [vmem:[%s4583_s27 + $0x600] sm:$0xff] %v534_v0  ;;  %537 = vst [vmem:[%s4583_s27 + $0x608] sm:$0xff] %v536_v1  ;;  %v540_v3 = vld [vmem:[%s4578_s26 + $0x17a0] sm:$0xff]  ;;  %v542_v4 = vld [vmem:[%s4578_s26 + $0x17a8] sm:$0xff] }
  0x77   : > { %539 = vst [vmem:[%s4583_s27 + $0x610] sm:$0xff] %v538_v2  ;;  %v544_v5 = vld [vmem:[%s4578_s26 + $0x17b0] sm:$0xff]  ;;  %541 = vst [vmem:[%s4583_s27 + $0x618] sm:$0xff] %v540_v3  ;;  %v546_v6 = vld [vmem:[%s4578_s26 + $0x18c0] sm:$0xff] }
  0x78   : > { %543 = vst [vmem:[%s4583_s27 + $0x620] sm:$0xff] %v542_v4  ;;  %545 = vst [vmem:[%s4583_s27 + $0x628] sm:$0xff] %v544_v5  ;;  %v548_v7 = vld [vmem:[%s4578_s26 + $0x18c8] sm:$0xff]  ;;  %v550_v8 = vld [vmem:[%s4578_s26 + $0x18d0] sm:$0xff] }
  0x79   : > { %547 = vst [vmem:[%s4583_s27 + $0x630] sm:$0xff] %v546_v6  ;;  %549 = vst [vmem:[%s4583_s27 + $0x638] sm:$0xff] %v548_v7  ;;  %v552_v9 = vld [vmem:[%s4578_s26 + $0x18d8] sm:$0xff]  ;;  %v554_v10 = vld [vmem:[%s4578_s26 + $0x18e0] sm:$0xff] }
  0x7a   : > { %551 = vst [vmem:[%s4583_s27 + $0x640] sm:$0xff] %v550_v8  ;;  %v556_v11 = vld [vmem:[%s4578_s26 + $0x18e8] sm:$0xff]  ;;  %553 = vst [vmem:[%s4583_s27 + $0x648] sm:$0xff] %v552_v9  ;;  %v558_v12 = vld [vmem:[%s4578_s26 + $0x18f0] sm:$0xff] }
  0x7b   : > { %555 = vst [vmem:[%s4583_s27 + $0x650] sm:$0xff] %v554_v10  ;;  %557 = vst [vmem:[%s4583_s27 + $0x658] sm:$0xff] %v556_v11  ;;  %v560_v13 = vld [vmem:[%s4578_s26 + $0x18f8] sm:$0xff]  ;;  %v562_v14 = vld [vmem:[%s4578_s26 + $0x1900] sm:$0xff] }
  0x7c   : > { %559 = vst [vmem:[%s4583_s27 + $0x660] sm:$0xff] %v558_v12  ;;  %561 = vst [vmem:[%s4583_s27 + $0x668] sm:$0xff] %v560_v13  ;;  %v564_v15 = vld [vmem:[%s4578_s26 + $0x1908] sm:$0xff]  ;;  %v566_v16 = vld [vmem:[%s4578_s26 + $0x1910] sm:$0xff] }
  0x7d   : > { %563 = vst [vmem:[%s4583_s27 + $0x670] sm:$0xff] %v562_v14  ;;  %v568_v17 = vld [vmem:[%s4578_s26 + $0x1a20] sm:$0xff]  ;;  %565 = vst [vmem:[%s4583_s27 + $0x678] sm:$0xff] %v564_v15  ;;  %v570_v18 = vld [vmem:[%s4578_s26 + $0x1a28] sm:$0xff] }
  0x7e   : > { %567 = vst [vmem:[%s4583_s27 + $0x680] sm:$0xff] %v566_v16  ;;  %569 = vst [vmem:[%s4583_s27 + $0x688] sm:$0xff] %v568_v17  ;;  %v572_v19 = vld [vmem:[%s4578_s26 + $0x1a30] sm:$0xff]  ;;  %v574_v20 = vld [vmem:[%s4578_s26 + $0x1a38] sm:$0xff] }
  0x7f   : > { %571 = vst [vmem:[%s4583_s27 + $0x690] sm:$0xff] %v570_v18  ;;  %573 = vst [vmem:[%s4583_s27 + $0x698] sm:$0xff] %v572_v19  ;;  %v576_v21 = vld [vmem:[%s4578_s26 + $0x1a40] sm:$0xff]  ;;  %v578_v22 = vld [vmem:[%s4578_s26 + $0x1a48] sm:$0xff] }
  0x80   : > { %575 = vst [vmem:[%s4583_s27 + $0x6a0] sm:$0xff] %v574_v20  ;;  %v580_v23 = vld [vmem:[%s4578_s26 + $0x1a50] sm:$0xff]  ;;  %577 = vst [vmem:[%s4583_s27 + $0x6a8] sm:$0xff] %v576_v21  ;;  %v582_v24 = vld [vmem:[%s4578_s26 + $0x1a58] sm:$0xff] }
  0x81   : > { %579 = vst [vmem:[%s4583_s27 + $0x6b0] sm:$0xff] %v578_v22  ;;  %581 = vst [vmem:[%s4583_s27 + $0x6b8] sm:$0xff] %v580_v23  ;;  %v584_v25 = vld [vmem:[%s4578_s26 + $0x1a60] sm:$0xff]  ;;  %v586_v26 = vld [vmem:[%s4578_s26 + $0x1a68] sm:$0xff] }
  0x82   : > { %583 = vst [vmem:[%s4583_s27 + $0x6c0] sm:$0xff] %v582_v24  ;;  %585 = vst [vmem:[%s4583_s27 + $0x6c8] sm:$0xff] %v584_v25  ;;  %v588_v27 = vld [vmem:[%s4578_s26 + $0x1a70] sm:$0xff]  ;;  %v590_v28 = vld [vmem:[%s4578_s26 + $0x1b80] sm:$0xff] }
  0x83   : > { %587 = vst [vmem:[%s4583_s27 + $0x6d0] sm:$0xff] %v586_v26  ;;  %v592_v29 = vld [vmem:[%s4578_s26 + $0x1b88] sm:$0xff]  ;;  %589 = vst [vmem:[%s4583_s27 + $0x6d8] sm:$0xff] %v588_v27  ;;  %v594_v30 = vld [vmem:[%s4578_s26 + $0x1b90] sm:$0xff] }
  0x84   : > { %591 = vst [vmem:[%s4583_s27 + $0x6e0] sm:$0xff] %v590_v28  ;;  %593 = vst [vmem:[%s4583_s27 + $0x6e8] sm:$0xff] %v592_v29  ;;  %v596_v31 = vld [vmem:[%s4578_s26 + $0x1b98] sm:$0xff]  ;;  %v598_v32 = vld [vmem:[%s4578_s26 + $0x1ba0] sm:$0xff] }
  0x85   : > { %595 = vst [vmem:[%s4583_s27 + $0x6f0] sm:$0xff] %v594_v30  ;;  %597 = vst [vmem:[%s4583_s27 + $0x6f8] sm:$0xff] %v596_v31  ;;  %v600_v33 = vld [vmem:[%s4578_s26 + $0x1ba8] sm:$0xff]  ;;  %v602_v34 = vld [vmem:[%s4578_s26 + $0x1bb0] sm:$0xff] }
  0x86   : > { %599 = vst [vmem:[%s4583_s27 + $0x700] sm:$0xff] %v598_v32  ;;  %v604_v35 = vld [vmem:[%s4578_s26 + $0x1bb8] sm:$0xff]  ;;  %601 = vst [vmem:[%s4583_s27 + $0x708] sm:$0xff] %v600_v33  ;;  %v606_v36 = vld [vmem:[%s4578_s26 + $0x1bc0] sm:$0xff] }
  0x87   : > { %603 = vst [vmem:[%s4583_s27 + $0x710] sm:$0xff] %v602_v34  ;;  %605 = vst [vmem:[%s4583_s27 + $0x718] sm:$0xff] %v604_v35  ;;  %v608_v37 = vld [vmem:[%s4578_s26 + $0x1bc8] sm:$0xff]  ;;  %v610_v38 = vld [vmem:[%s4578_s26 + $0x1bd0] sm:$0xff] }
  0x88   : > { %607 = vst [vmem:[%s4583_s27 + $0x720] sm:$0xff] %v606_v36  ;;  %609 = vst [vmem:[%s4583_s27 + $0x728] sm:$0xff] %v608_v37  ;;  %v612_v39 = vld [vmem:[%s4578_s26 + $0x1ce0] sm:$0xff]  ;;  %v614_v40 = vld [vmem:[%s4578_s26 + $0x1ce8] sm:$0xff] }
  0x89   : > { %611 = vst [vmem:[%s4583_s27 + $0x730] sm:$0xff] %v610_v38  ;;  %v616_v41 = vld [vmem:[%s4578_s26 + $0x1cf0] sm:$0xff]  ;;  %613 = vst [vmem:[%s4583_s27 + $0x738] sm:$0xff] %v612_v39  ;;  %v618_v42 = vld [vmem:[%s4578_s26 + $0x1cf8] sm:$0xff] }
  0x8a   : > { %615 = vst [vmem:[%s4583_s27 + $0x740] sm:$0xff] %v614_v40  ;;  %617 = vst [vmem:[%s4583_s27 + $0x748] sm:$0xff] %v616_v41  ;;  %v620_v43 = vld [vmem:[%s4578_s26 + $0x1d00] sm:$0xff]  ;;  %v622_v44 = vld [vmem:[%s4578_s26 + $0x1d08] sm:$0xff] }
  0x8b   : > { %619 = vst [vmem:[%s4583_s27 + $0x750] sm:$0xff] %v618_v42  ;;  %621 = vst [vmem:[%s4583_s27 + $0x758] sm:$0xff] %v620_v43  ;;  %v624_v45 = vld [vmem:[%s4578_s26 + $0x1d10] sm:$0xff]  ;;  %v626_v46 = vld [vmem:[%s4578_s26 + $0x1d18] sm:$0xff] }
  0x8c   : > { %623 = vst [vmem:[%s4583_s27 + $0x760] sm:$0xff] %v622_v44  ;;  %v628_v47 = vld [vmem:[%s4578_s26 + $0x1d20] sm:$0xff]  ;;  %625 = vst [vmem:[%s4583_s27 + $0x768] sm:$0xff] %v624_v45  ;;  %v630_v48 = vld [vmem:[%s4578_s26 + $0x1d28] sm:$0xff] }
  0x8d   : > { %627 = vst [vmem:[%s4583_s27 + $0x770] sm:$0xff] %v626_v46  ;;  %629 = vst [vmem:[%s4583_s27 + $0x778] sm:$0xff] %v628_v47  ;;  %v632_v49 = vld [vmem:[%s4578_s26 + $0x1d30] sm:$0xff]  ;;  %v634_v50 = vld [vmem:[%s4578_s26 + $0x1e40] sm:$0xff] }
  0x8e   : > { %631 = vst [vmem:[%s4583_s27 + $0x780] sm:$0xff] %v630_v48  ;;  %633 = vst [vmem:[%s4583_s27 + $0x788] sm:$0xff] %v632_v49  ;;  %v636_v51 = vld [vmem:[%s4578_s26 + $0x1e48] sm:$0xff]  ;;  %v638_v52 = vld [vmem:[%s4578_s26 + $0x1e50] sm:$0xff] }
  0x8f   : > { %635 = vst [vmem:[%s4583_s27 + $0x790] sm:$0xff] %v634_v50  ;;  %v640_v53 = vld [vmem:[%s4578_s26 + $0x1e58] sm:$0xff]  ;;  %637 = vst [vmem:[%s4583_s27 + $0x798] sm:$0xff] %v636_v51  ;;  %v642_v54 = vld [vmem:[%s4578_s26 + $0x1e60] sm:$0xff] }
  0x90   : > { %639 = vst [vmem:[%s4583_s27 + $0x7a0] sm:$0xff] %v638_v52  ;;  %641 = vst [vmem:[%s4583_s27 + $0x7a8] sm:$0xff] %v640_v53  ;;  %v644_v55 = vld [vmem:[%s4578_s26 + $0x1e68] sm:$0xff]  ;;  %v646_v56 = vld [vmem:[%s4578_s26 + $0x1e70] sm:$0xff] }
  0x91   : > { %643 = vst [vmem:[%s4583_s27 + $0x7b0] sm:$0xff] %v642_v54  ;;  %645 = vst [vmem:[%s4583_s27 + $0x7b8] sm:$0xff] %v644_v55  ;;  %v648_v57 = vld [vmem:[%s4578_s26 + $0x1e78] sm:$0xff]  ;;  %v650_v58 = vld [vmem:[%s4578_s26 + $0x1e80] sm:$0xff] }
  0x92   : > { %647 = vst [vmem:[%s4583_s27 + $0x7c0] sm:$0xff] %v646_v56  ;;  %v652_v59 = vld [vmem:[%s4578_s26 + $0x1e88] sm:$0xff]  ;;  %649 = vst [vmem:[%s4583_s27 + $0x7c8] sm:$0xff] %v648_v57  ;;  %v654_v60 = vld [vmem:[%s4578_s26 + $0x1e90] sm:$0xff] }
  0x93   : > { %651 = vst [vmem:[%s4583_s27 + $0x7d0] sm:$0xff] %v650_v58  ;;  %653 = vst [vmem:[%s4583_s27 + $0x7d8] sm:$0xff] %v652_v59  ;;  %v656_v61 = vld [vmem:[%s4578_s26 + $0x1fa0] sm:$0xff]  ;;  %v658_v62 = vld [vmem:[%s4578_s26 + $0x1fa8] sm:$0xff] }
  0x94   : > { %655 = vst [vmem:[%s4583_s27 + $0x7e0] sm:$0xff] %v654_v60  ;;  %657 = vst [vmem:[%s4583_s27 + $0x7e8] sm:$0xff] %v656_v61  ;;  %v660_v63 = vld [vmem:[%s4578_s26 + $0x1fb0] sm:$0xff]  ;;  %v662_v0 = vld [vmem:[%s4578_s26 + $0x1fb8] sm:$0xff] }
  0x95   : > { %659 = vst [vmem:[%s4583_s27 + $0x7f0] sm:$0xff] %v658_v62  ;;  %v664_v1 = vld [vmem:[%s4578_s26 + $0x1fc0] sm:$0xff]  ;;  %661 = vst [vmem:[%s4583_s27 + $0x7f8] sm:$0xff] %v660_v63  ;;  %v666_v2 = vld [vmem:[%s4578_s26 + $0x1fc8] sm:$0xff] }
  0x96   : > { %663 = vst [vmem:[%s4583_s27 + $0x800] sm:$0xff] %v662_v0  ;;  %665 = vst [vmem:[%s4583_s27 + $0x808] sm:$0xff] %v664_v1  ;;  %v668_v3 = vld [vmem:[%s4578_s26 + $0x1fd0] sm:$0xff]  ;;  %v670_v4 = vld [vmem:[%s4578_s26 + $0x1fd8] sm:$0xff] }
  0x97   : > { %667 = vst [vmem:[%s4583_s27 + $0x810] sm:$0xff] %v666_v2  ;;  %669 = vst [vmem:[%s4583_s27 + $0x818] sm:$0xff] %v668_v3  ;;  %v672_v5 = vld [vmem:[%s4578_s26 + $0x1fe0] sm:$0xff]  ;;  %v674_v6 = vld [vmem:[%s4578_s26 + $0x1fe8] sm:$0xff] }
  0x98   : > { %671 = vst [vmem:[%s4583_s27 + $0x820] sm:$0xff] %v670_v4  ;;  %v676_v7 = vld [vmem:[%s4578_s26 + $0x1ff0] sm:$0xff]  ;;  %673 = vst [vmem:[%s4583_s27 + $0x828] sm:$0xff] %v672_v5  ;;  %v678_v8 = vld [vmem:[%s4578_s26 + $0x2100] sm:$0xff] }
  0x99   : > { %675 = vst [vmem:[%s4583_s27 + $0x830] sm:$0xff] %v674_v6  ;;  %677 = vst [vmem:[%s4583_s27 + $0x838] sm:$0xff] %v676_v7  ;;  %v680_v9 = vld [vmem:[%s4578_s26 + $0x2108] sm:$0xff]  ;;  %v682_v10 = vld [vmem:[%s4578_s26 + $0x2110] sm:$0xff] }
  0x9a   : > { %679 = vst [vmem:[%s4583_s27 + $0x840] sm:$0xff] %v678_v8  ;;  %681 = vst [vmem:[%s4583_s27 + $0x848] sm:$0xff] %v680_v9  ;;  %v684_v11 = vld [vmem:[%s4578_s26 + $0x2118] sm:$0xff]  ;;  %v686_v12 = vld [vmem:[%s4578_s26 + $0x2120] sm:$0xff] }
  0x9b   : > { %683 = vst [vmem:[%s4583_s27 + $0x850] sm:$0xff] %v682_v10  ;;  %v688_v13 = vld [vmem:[%s4578_s26 + $0x2128] sm:$0xff]  ;;  %685 = vst [vmem:[%s4583_s27 + $0x858] sm:$0xff] %v684_v11  ;;  %v690_v14 = vld [vmem:[%s4578_s26 + $0x2130] sm:$0xff] }
  0x9c   : > { %687 = vst [vmem:[%s4583_s27 + $0x860] sm:$0xff] %v686_v12  ;;  %689 = vst [vmem:[%s4583_s27 + $0x868] sm:$0xff] %v688_v13  ;;  %v692_v15 = vld [vmem:[%s4578_s26 + $0x2138] sm:$0xff]  ;;  %v694_v16 = vld [vmem:[%s4578_s26 + $0x2140] sm:$0xff] }
  0x9d   : > { %691 = vst [vmem:[%s4583_s27 + $0x870] sm:$0xff] %v690_v14  ;;  %693 = vst [vmem:[%s4583_s27 + $0x878] sm:$0xff] %v692_v15  ;;  %v696_v17 = vld [vmem:[%s4578_s26 + $0x2148] sm:$0xff]  ;;  %v698_v18 = vld [vmem:[%s4578_s26 + $0x2150] sm:$0xff] }
  0x9e   : > { %695 = vst [vmem:[%s4583_s27 + $0x880] sm:$0xff] %v694_v16  ;;  %v700_v19 = vld [vmem:[%s4578_s26 + $0x2260] sm:$0xff]  ;;  %697 = vst [vmem:[%s4583_s27 + $0x888] sm:$0xff] %v696_v17  ;;  %v702_v20 = vld [vmem:[%s4578_s26 + $0x2268] sm:$0xff] }
  0x9f   : > { %699 = vst [vmem:[%s4583_s27 + $0x890] sm:$0xff] %v698_v18  ;;  %701 = vst [vmem:[%s4583_s27 + $0x898] sm:$0xff] %v700_v19  ;;  %v704_v21 = vld [vmem:[%s4578_s26 + $0x2270] sm:$0xff]  ;;  %v706_v22 = vld [vmem:[%s4578_s26 + $0x2278] sm:$0xff] }
  0xa0   : > { %703 = vst [vmem:[%s4583_s27 + $0x8a0] sm:$0xff] %v702_v20  ;;  %705 = vst [vmem:[%s4583_s27 + $0x8a8] sm:$0xff] %v704_v21  ;;  %v708_v23 = vld [vmem:[%s4578_s26 + $0x2280] sm:$0xff]  ;;  %v710_v24 = vld [vmem:[%s4578_s26 + $0x2288] sm:$0xff] }
  0xa1   : > { %707 = vst [vmem:[%s4583_s27 + $0x8b0] sm:$0xff] %v706_v22  ;;  %v712_v25 = vld [vmem:[%s4578_s26 + $0x2290] sm:$0xff]  ;;  %709 = vst [vmem:[%s4583_s27 + $0x8b8] sm:$0xff] %v708_v23  ;;  %v714_v26 = vld [vmem:[%s4578_s26 + $0x2298] sm:$0xff] }
  0xa2   : > { %711 = vst [vmem:[%s4583_s27 + $0x8c0] sm:$0xff] %v710_v24  ;;  %713 = vst [vmem:[%s4583_s27 + $0x8c8] sm:$0xff] %v712_v25  ;;  %v716_v27 = vld [vmem:[%s4578_s26 + $0x22a0] sm:$0xff]  ;;  %v718_v28 = vld [vmem:[%s4578_s26 + $0x22a8] sm:$0xff] }
  0xa3   : > { %715 = vst [vmem:[%s4583_s27 + $0x8d0] sm:$0xff] %v714_v26  ;;  %717 = vst [vmem:[%s4583_s27 + $0x8d8] sm:$0xff] %v716_v27  ;;  %v720_v29 = vld [vmem:[%s4578_s26 + $0x22b0] sm:$0xff] }
  0xa4   : > { %719 = vst [vmem:[%s4583_s27 + $0x8e0] sm:$0xff] %v718_v28  ;;  %721 = vst [vmem:[%s4583_s27 + $0x8e8] sm:$0xff] %v720_v29 }
  0xa5 PF: > { %p3592_p7 = scmp.ge.s32.totalorder %s4515_s14, 1  ;;  %p726_p8 = scmp.lt.s32.totalorder %s4515_s14, 5 }
  0xa7   : > { %p727_p9 = pnand %p3592_p7, %p726_p8 }
  0xa8   : > { %s733_s28 = sand.u32 (!%p727_p9), 1, %s4507_s12   ;;  %v5160_v30 = vld [vmem:[%s5820_s1 + $0x4] ss:$8 sps:$4 sm:$0xff] (!%p727_p9)   ;;  %vm2520_vm0 = vcmask (!%p727_p9), 654336   ;;  %v4517_v40 = vmov (!%p727_p9), 0  }
  0xa9   : > { %730 = sbr.rel (%p727_p9) target bundleno = 715 (0x2cb), region = 51  ;;  %3883 = vmatprep.mubr.msk.bf16.mxu0 (!%p727_p9), %vm2520_vm0, %v5160_v30  ;;  %3885 = vmatprep.mubr.msk.bf16.mxu1 (!%p727_p9), %vm2520_vm0, %v5160_v30  ;;  %v5227_v22 = vld [vmem:[%s5820_s1] ss:$8 sps:$4 sm:$0xff] (!%p727_p9)   ;;  %v5236_v27 = vld [vmem:[%s5820_s1 + $0x14] ss:$8 sps:$4 sm:$0xff] (!%p727_p9)  }
  0xaa   : > { %s4025_s4 = smul.u32 (!%p727_p9), 2288, %s733_s28  ;;  %4052 = vset.pattern.permute.xlu0 (!%p727_p9), %v4517_v40  ;;  %4053 = vset.pattern.permute.xlu1 (!%p727_p9), %v4517_v40 }
  0xab   : > { %s5535_s10 = smul.u32 (!%p727_p9), 352, %s733_s28 }
  0xac   : > { %s5168_s5 = scalar_lea.vmem (!%p727_p9), [#allocation2], %s4025_s4 }
  0xad   : > { %v4054_v31 = vld [vmem:[%s5168_s5 + $0x4] ss:$88 sps:$4 sm:$0xff] (!%p727_p9)   ;;  %v4058_v33 = vld [vmem:[%s5168_s5] ss:$88 sps:$4 sm:$0xff] (!%p727_p9)   ;;  %v4060_v35 = vld [vmem:[%s5168_s5 + $0xb4] ss:$88 sps:$4 sm:$0xff] (!%p727_p9)  }
  0xae   : > { %v4056_v32 = vld [vmem:[%s5168_s5 + $0xc] ss:$88 sps:$4 sm:$0xff] (!%p727_p9)   ;;  %2527 = vmatprep.subr.bf16.mxu0 (!%p727_p9), %v4054_v31  ;;  %v4059_v34 = vld [vmem:[%s5168_s5 + $0x8] ss:$88 sps:$4 sm:$0xff] (!%p727_p9)   ;;  %v4062_v36 = vld [vmem:[%s5168_s5 + $0xbc] ss:$88 sps:$4 sm:$0xff] (!%p727_p9)  }
  0xaf   : > { %2580 = vmatprep.subr.bf16.mxu1 (!%p727_p9), %v4056_v32  ;;  %2528 = vmatpush1.bf16.msra.mxu0 (!%p727_p9), %v4058_v33  ;;  %v4064_v37 = vld [vmem:[%s5168_s5 + $0xb0] ss:$88 sps:$4 sm:$0xff] (!%p727_p9)   ;;  %v4066_v39 = vld [vmem:[%s5168_s5 + $0x164] ss:$88 sps:$4 sm:$0xff] (!%p727_p9)   ;;  %v4070_v42 = vld [vmem:[%s5168_s5 + $0x160] ss:$88 sps:$4 sm:$0xff] (!%p727_p9)  }
  0xb0   : > { %2581 = vmatpush1.bf16.msra.mxu1 %v4059_v34  ;;  %2529 = vmatprep.subr.bf16.mxu0 %v4060_v35  ;;  %v4065_v38 = vld [vmem:[%s5168_s5 + $0xb8] ss:$88 sps:$4 sm:$0xff]   ;;  %v4068_v41 = vld [vmem:[%s5168_s5 + $0x16c] ss:$88 sps:$4 sm:$0xff]   ;;  %v4071_v43 = vld [vmem:[%s5168_s5 + $0x168] ss:$88 sps:$4 sm:$0xff]  }
  0xb1   : > { %2582 = vmatprep.subr.bf16.mxu1 %v4062_v36  ;;  %v4072_v44 = vld [vmem:[%s5168_s5 + $0x214] ss:$88 sps:$4 sm:$0xff]   ;;  %v4076_v46 = vld [vmem:[%s5168_s5 + $0x210] ss:$88 sps:$4 sm:$0xff]   ;;  %v4078_v48 = vld [vmem:[%s5168_s5 + $0x2c4] ss:$88 sps:$4 sm:$0xff]  }
  0xb2   : > { %v4074_v45 = vld [vmem:[%s5168_s5 + $0x21c] ss:$88 sps:$4 sm:$0xff]   ;;  %v4077_v47 = vld [vmem:[%s5168_s5 + $0x218] ss:$88 sps:$4 sm:$0xff]   ;;  %v4080_v49 = vld [vmem:[%s5168_s5 + $0x2cc] ss:$88 sps:$4 sm:$0xff]  }
  0xb3   : > { %2530 = vmatpush1.bf16.msra.mxu0 %v4064_v37  ;;  %v4082_v50 = vld [vmem:[%s5168_s5 + $0x2c0] ss:$88 sps:$4 sm:$0xff]   ;;  %v4084_v52 = vld [vmem:[%s5168_s5 + $0x374] ss:$88 sps:$4 sm:$0xff]   ;;  %v4088_v54 = vld [vmem:[%s5168_s5 + $0x370] ss:$88 sps:$4 sm:$0xff]  }
  0xb4   : > { %2583 = vmatpush1.bf16.msra.mxu1 %v4065_v38  ;;  %2531 = vmatprep.subr.bf16.mxu0 %v4066_v39  ;;  %v4083_v51 = vld [vmem:[%s5168_s5 + $0x2c8] ss:$88 sps:$4 sm:$0xff]   ;;  %v4086_v53 = vld [vmem:[%s5168_s5 + $0x37c] ss:$88 sps:$4 sm:$0xff]   ;;  %v4089_v55 = vld [vmem:[%s5168_s5 + $0x378] ss:$88 sps:$4 sm:$0xff]  }
  0xb5   : > { %2584 = vmatprep.subr.bf16.mxu1 %v4068_v41  ;;  %v4090_v56 = vld [vmem:[%s5168_s5 + $0x424] ss:$88 sps:$4 sm:$0xff]   ;;  %v4094_v58 = vld [vmem:[%s5168_s5 + $0x420] ss:$88 sps:$4 sm:$0xff]   ;;  %v4096_v60 = vld [vmem:[%s5168_s5 + $0x4d4] ss:$88 sps:$4 sm:$0xff]  }
  0xb6   : > { %v4092_v57 = vld [vmem:[%s5168_s5 + $0x42c] ss:$88 sps:$4 sm:$0xff]   ;;  %v4095_v59 = vld [vmem:[%s5168_s5 + $0x428] ss:$88 sps:$4 sm:$0xff]   ;;  %v4098_v61 = vld [vmem:[%s5168_s5 + $0x4dc] ss:$88 sps:$4 sm:$0xff]  }
  0xb7   : > { %2532 = vmatpush1.bf16.msra.mxu0 %v4070_v42  ;;  %v4100_v62 = vld [vmem:[%s5168_s5 + $0x4d0] ss:$88 sps:$4 sm:$0xff]   ;;  %v4102_v0 = vld [vmem:[%s5168_s5 + $0x584] ss:$88 sps:$4 sm:$0xff]   ;;  %v4106_v2 = vld [vmem:[%s5168_s5 + $0x580] ss:$88 sps:$4 sm:$0xff]  }
  0xb8   : > { %2585 = vmatpush1.bf16.msra.mxu1 %v4071_v43  ;;  %2533 = vmatprep.subr.bf16.mxu0 %v4072_v44  ;;  %v4101_v63 = vld [vmem:[%s5168_s5 + $0x4d8] ss:$88 sps:$4 sm:$0xff]   ;;  %v4104_v1 = vld [vmem:[%s5168_s5 + $0x58c] ss:$88 sps:$4 sm:$0xff]   ;;  %v4107_v3 = vld [vmem:[%s5168_s5 + $0x588] ss:$88 sps:$4 sm:$0xff]  }
  0xb9   : > { %2586 = vmatprep.subr.bf16.mxu1 %v4074_v45  ;;  %v4108_v4 = vld [vmem:[%s5168_s5 + $0x634] ss:$88 sps:$4 sm:$0xff]   ;;  %v4112_v6 = vld [vmem:[%s5168_s5 + $0x630] ss:$88 sps:$4 sm:$0xff]   ;;  %v4114_v8 = vld [vmem:[%s5168_s5 + $0x6e4] ss:$88 sps:$4 sm:$0xff]  }
  0xba   : > { %v4110_v5 = vld [vmem:[%s5168_s5 + $0x63c] ss:$88 sps:$4 sm:$0xff]   ;;  %v4113_v7 = vld [vmem:[%s5168_s5 + $0x638] ss:$88 sps:$4 sm:$0xff]   ;;  %v4116_v9 = vld [vmem:[%s5168_s5 + $0x6ec] ss:$88 sps:$4 sm:$0xff]  }
  0xbb   : > { %2534 = vmatpush1.bf16.msra.mxu0 %v4076_v46  ;;  %v4118_v10 = vld [vmem:[%s5168_s5 + $0x6e0] ss:$88 sps:$4 sm:$0xff]   ;;  %v4120_v12 = vld [vmem:[%s5168_s5 + $0x794] ss:$88 sps:$4 sm:$0xff]   ;;  %v4124_v14 = vld [vmem:[%s5168_s5 + $0x790] ss:$88 sps:$4 sm:$0xff]  }
  0xbc   : > { %2587 = vmatpush1.bf16.msra.mxu1 %v4077_v47  ;;  %2535 = vmatprep.subr.bf16.mxu0 %v4078_v48  ;;  %v4119_v11 = vld [vmem:[%s5168_s5 + $0x6e8] ss:$88 sps:$4 sm:$0xff]   ;;  %v4122_v13 = vld [vmem:[%s5168_s5 + $0x79c] ss:$88 sps:$4 sm:$0xff]   ;;  %v4125_v15 = vld [vmem:[%s5168_s5 + $0x798] ss:$88 sps:$4 sm:$0xff]  }
  0xbd   : > { %2588 = vmatprep.subr.bf16.mxu1 %v4080_v49  ;;  %v4126_v16 = vld [vmem:[%s5168_s5 + $0x844] ss:$88 sps:$4 sm:$0xff]   ;;  %v4130_v18 = vld [vmem:[%s5168_s5 + $0x840] ss:$88 sps:$4 sm:$0xff]   ;;  %v4137_v20 = vld [vmem:[%s5168_s5 + $0x14] ss:$88 sps:$4 sm:$0xff]  }
  0xbe   : > { %v4128_v17 = vld [vmem:[%s5168_s5 + $0x84c] ss:$88 sps:$4 sm:$0xff]   ;;  %v4131_v19 = vld [vmem:[%s5168_s5 + $0x848] ss:$88 sps:$4 sm:$0xff]   ;;  %v4140_v21 = vld [vmem:[%s5168_s5 + $0x1c] ss:$88 sps:$4 sm:$0xff]  }
  0xbf   : > { %2536 = vmatpush1.bf16.msra.mxu0 %v4082_v50  ;;  %v4135_v23 = vld [vmem:[%s5168_s5 + $0x10] ss:$88 sps:$4 sm:$0xff]   ;;  %v4143_v25 = vld [vmem:[%s5168_s5 + $0xc4] ss:$88 sps:$4 sm:$0xff]   ;;  %v4141_v28 = vld [vmem:[%s5168_s5 + $0xc0] ss:$88 sps:$4 sm:$0xff]  }
  0xc0   : > { %2589 = vmatpush1.bf16.msra.mxu1 %v4083_v51  ;;  %2537 = vmatprep.subr.bf16.mxu0 %v4084_v52  ;;  %v4138_v24 = vld [vmem:[%s5168_s5 + $0x18] ss:$88 sps:$4 sm:$0xff]   ;;  %v4146_v26 = vld [vmem:[%s5168_s5 + $0xcc] ss:$88 sps:$4 sm:$0xff]   ;;  %v4144_v29 = vld [vmem:[%s5168_s5 + $0xc8] ss:$88 sps:$4 sm:$0xff]  }
  0xc1   : > { %2590 = vmatprep.subr.bf16.mxu1 %v4086_v53  ;;  %v4149_v31 = vld [vmem:[%s5168_s5 + $0x174] ss:$88 sps:$4 sm:$0xff]   ;;  %v5251_v33 = vld [vmem:[%s5820_s1 + $0x10] ss:$8 sps:$4 sm:$0xff]   ;;  %v4155_v36 = vld [vmem:[%s5168_s5 + $0x224] ss:$88 sps:$4 sm:$0xff]  }
  0xc2   : > { %v4152_v32 = vld [vmem:[%s5168_s5 + $0x17c] ss:$88 sps:$4 sm:$0xff]   ;;  %v4147_v34 = vld [vmem:[%s5168_s5 + $0x170] ss:$88 sps:$4 sm:$0xff]   ;;  %v4158_v37 = vld [vmem:[%s5168_s5 + $0x22c] ss:$88 sps:$4 sm:$0xff]  }
  0xc3   : > { %2538 = vmatpush1.bf16.msra.mxu0 %v4088_v54  ;;  %v4150_v35 = vld [vmem:[%s5168_s5 + $0x178] ss:$88 sps:$4 sm:$0xff]   ;;  %v4156_v39 = vld [vmem:[%s5168_s5 + $0x228] ss:$88 sps:$4 sm:$0xff]   ;;  %v4161_v40 = vld [vmem:[%s5168_s5 + $0x2d4] ss:$88 sps:$4 sm:$0xff]  }
  0xc4   : > { %2591 = vmatpush1.bf16.msra.mxu1 %v4089_v55  ;;  %2539 = vmatprep.subr.bf16.mxu0 %v4090_v56  ;;  %v4153_v38 = vld [vmem:[%s5168_s5 + $0x220] ss:$88 sps:$4 sm:$0xff]   ;;  %v4164_v41 = vld [vmem:[%s5168_s5 + $0x2dc] ss:$88 sps:$4 sm:$0xff]   ;;  %v4159_v42 = vld [vmem:[%s5168_s5 + $0x2d0] ss:$88 sps:$4 sm:$0xff]  }
  0xc5   : > { %2592 = vmatprep.subr.bf16.mxu1 %v4092_v57  ;;  %v4162_v43 = vld [vmem:[%s5168_s5 + $0x2d8] ss:$88 sps:$4 sm:$0xff]   ;;  %v4167_v44 = vld [vmem:[%s5168_s5 + $0x384] ss:$88 sps:$4 sm:$0xff]   ;;  %v4168_v47 = vld [vmem:[%s5168_s5 + $0x388] ss:$88 sps:$4 sm:$0xff]  }
  0xc6   : > { %v4170_v45 = vld [vmem:[%s5168_s5 + $0x38c] ss:$88 sps:$4 sm:$0xff]   ;;  %v4165_v46 = vld [vmem:[%s5168_s5 + $0x380] ss:$88 sps:$4 sm:$0xff]   ;;  %v4176_v49 = vld [vmem:[%s5168_s5 + $0x43c] ss:$88 sps:$4 sm:$0xff]  }
  0xc7   : > { %2540 = vmatpush1.bf16.msra.mxu0 %v4094_v58  ;;  %v4173_v48 = vld [vmem:[%s5168_s5 + $0x434] ss:$88 sps:$4 sm:$0xff]   ;;  %v4171_v50 = vld [vmem:[%s5168_s5 + $0x430] ss:$88 sps:$4 sm:$0xff]   ;;  %v4179_v52 = vld [vmem:[%s5168_s5 + $0x4e4] ss:$88 sps:$4 sm:$0xff]  }
  0xc8   : > { %2593 = vmatpush1.bf16.msra.mxu1 %v4095_v59  ;;  %2541 = vmatprep.subr.bf16.mxu0 %v4096_v60  ;;  %v4174_v51 = vld [vmem:[%s5168_s5 + $0x438] ss:$88 sps:$4 sm:$0xff]   ;;  %v4182_v53 = vld [vmem:[%s5168_s5 + $0x4ec] ss:$88 sps:$4 sm:$0xff]   ;;  %v4180_v55 = vld [vmem:[%s5168_s5 + $0x4e8] ss:$88 sps:$4 sm:$0xff]  }
  0xc9   : > { %2594 = vmatprep.subr.bf16.mxu1 %v4098_v61  ;;  %v4177_v54 = vld [vmem:[%s5168_s5 + $0x4e0] ss:$88 sps:$4 sm:$0xff]   ;;  %v4185_v56 = vld [vmem:[%s5168_s5 + $0x594] ss:$88 sps:$4 sm:$0xff]   ;;  %v4183_v58 = vld [vmem:[%s5168_s5 + $0x590] ss:$88 sps:$4 sm:$0xff]  }
  0xca   : > { %v4188_v57 = vld [vmem:[%s5168_s5 + $0x59c] ss:$88 sps:$4 sm:$0xff]   ;;  %v4186_v59 = vld [vmem:[%s5168_s5 + $0x598] ss:$88 sps:$4 sm:$0xff]   ;;  %v4194_v61 = vld [vmem:[%s5168_s5 + $0x64c] ss:$88 sps:$4 sm:$0xff]  }
  0xcb   : > { %2542 = vmatpush1.bf16.msra.mxu0 %v4100_v62  ;;  %v4191_v60 = vld [vmem:[%s5168_s5 + $0x644] ss:$88 sps:$4 sm:$0xff]   ;;  %v4189_v62 = vld [vmem:[%s5168_s5 + $0x640] ss:$88 sps:$4 sm:$0xff]   ;;  %s5559_s12 = scalar_lea.vmem [#allocation3], %s5535_s10  ;;  %s3997_s28 = smul.u32 (%p4568_p5), 88, %s3587_s15 }
  0xcc   : > { %2595 = vmatpush1.bf16.msra.mxu1 %v4101_v63  ;;  %2543 = vmatprep.subr.bf16.mxu0 %v4102_v0  ;;  %v4192_v63 = vld [vmem:[%s5168_s5 + $0x648] ss:$88 sps:$4 sm:$0xff]   ;;  %v4197_v0 = vld [vmem:[%s5168_s5 + $0x6f4] ss:$88 sps:$4 sm:$0xff]  }
  0xcd   : > { %2596 = vmatprep.subr.bf16.mxu1 %v4104_v1  ;;  %v4200_v1 = vld [vmem:[%s5168_s5 + $0x6fc] ss:$88 sps:$4 sm:$0xff]  }
  0xcf   : > { %2544 = vmatpush1.bf16.msra.mxu0 %v4106_v2  ;;  %v1048_v2 = vld [vmem:[%s5821_s2] sm:$0xff] }
  0xd0   : > { %2597 = vmatpush1.bf16.msra.mxu1 %v4107_v3  ;;  %2545 = vmatprep.subr.bf16.mxu0 %v4108_v4  ;;  %v4195_v3 = vld [vmem:[%s5168_s5 + $0x6f0] ss:$88 sps:$4 sm:$0xff]  }
  0xd1   : > { %2598 = vmatprep.subr.bf16.mxu1 %v4110_v5  ;;  %1054 = vperm.xlu0 %4052, %v1048_v2   ;;  %v4198_v4 = vld [vmem:[%s5168_s5 + $0x6f8] ss:$88 sps:$4 sm:$0xff]   ;;  %v4206_v5 = vld [vmem:[%s5168_s5 + $0x7a4] ss:$88 sps:$4 sm:$0xff]  }
  0xd2   : > { %v4285_v2 = vld [vmem:[%s5168_s5 + $0x7b8] ss:$88 sps:$4 sm:$0xff]  }
  0xd3   : > { %2546 = vmatpush1.bf16.msra.mxu0 %v4112_v6  ;;  %v4209_v6 = vld [vmem:[%s5168_s5 + $0x7ac] ss:$88 sps:$4 sm:$0xff]  }
  0xd4   : > { %2599 = vmatpush1.bf16.msra.mxu1 %v4113_v7  ;;  %2547 = vmatprep.subr.bf16.mxu0 %v4114_v8  ;;  %v1049_v7 = vld [vmem:[%s5821_s2 + $0x8] sm:$0xff] }
  0xd5   : > { %2600 = vmatprep.subr.bf16.mxu1 %v4116_v9  ;;  %1059 = vperm.xlu0 %4052, %v1049_v7   ;;  %v4204_v8 = vld [vmem:[%s5168_s5 + $0x7a0] ss:$88 sps:$4 sm:$0xff]   ;;  %v4296_v7 = vld [vmem:[%s5168_s5 + $0x34] ss:$88 sps:$4 sm:$0xff]  }
  0xd6   : > { %v4207_v9 = vld [vmem:[%s5168_s5 + $0x7a8] ss:$88 sps:$4 sm:$0xff]  }
  0xd7   : > { %2548 = vmatpush1.bf16.msra.mxu0 %v4118_v10  ;;  %v4212_v10 = vld [vmem:[%s5168_s5 + $0x854] ss:$88 sps:$4 sm:$0xff]  }
  0xd8   : > { %2601 = vmatpush1.bf16.msra.mxu1 %v4119_v11  ;;  %2549 = vmatprep.subr.bf16.mxu0 %v4120_v12  ;;  %v4215_v11 = vld [vmem:[%s5168_s5 + $0x85c] ss:$88 sps:$4 sm:$0xff]   ;;  %v4210_v12 = vld [vmem:[%s5168_s5 + $0x850] ss:$88 sps:$4 sm:$0xff]  }
  0xd9   : > { %2602 = vmatprep.subr.bf16.mxu1 %v4122_v13  ;;  %v4213_v13 = vld [vmem:[%s5168_s5 + $0x858] ss:$88 sps:$4 sm:$0xff]  }
  0xdb   : > { %2550 = vmatpush1.bf16.msra.mxu0 %v4124_v14  ;;  %v4218_v14 = vld [vmem:[%s5168_s5 + $0x24] ss:$88 sps:$4 sm:$0xff]  }
  0xdc   : > { %2603 = vmatpush1.bf16.msra.mxu1 %v4125_v15  ;;  %2551 = vmatprep.subr.bf16.mxu0 %v4126_v16  ;;  %v4221_v15 = vld [vmem:[%s5168_s5 + $0x2c] ss:$88 sps:$4 sm:$0xff]   ;;  %v4216_v16 = vld [vmem:[%s5168_s5 + $0x20] ss:$88 sps:$4 sm:$0xff]  }
  0xdd   : > { %2604 = vmatprep.subr.bf16.mxu1 %v4128_v17  ;;  %v4219_v17 = vld [vmem:[%s5168_s5 + $0x28] ss:$88 sps:$4 sm:$0xff]  }
  0xdf   : > { %2552 = vmatpush1.bf16.msra.mxu0 %v4130_v18  ;;  %v4224_v18 = vld [vmem:[%s5168_s5 + $0xd4] ss:$88 sps:$4 sm:$0xff]  }
  0xe0   : > { %2605 = vmatpush1.bf16.msra.mxu1 %v4131_v19  ;;  %2633 = vmatprep.subr.bf16.mxu0 %v4137_v20  ;;  %v4227_v19 = vld [vmem:[%s5168_s5 + $0xdc] ss:$88 sps:$4 sm:$0xff]   ;;  %v4222_v20 = vld [vmem:[%s5168_s5 + $0xd0] ss:$88 sps:$4 sm:$0xff]  }
  0xe1   : > { %2686 = vmatprep.subr.bf16.mxu1 %v4140_v21  ;;  %v4225_v21 = vld [vmem:[%s5168_s5 + $0xd8] ss:$88 sps:$4 sm:$0xff]  }
  0xe2   : > { %2560 = vmatmul.mubr.bf16.vlgmr.msra.gmra.mrb[0].mxu0 %v5227_v22 }
  0xe3   : > { %2613 = vmatmul.mubr.bf16.vlgmr.msra.gmra.mrb[0].mxu1 %v5227_v22  ;;  %2634 = vmatpush1.bf16.msra.mxu0 %v4135_v23  ;;  %v4230_v23 = vld [vmem:[%s5168_s5 + $0x184] ss:$88 sps:$4 sm:$0xff]  }
  0xe4   : > { %2687 = vmatpush1.bf16.msra.mxu1 %v4138_v24  ;;  %2635 = vmatprep.subr.bf16.mxu0 %v4143_v25  ;;  %v4233_v24 = vld [vmem:[%s5168_s5 + $0x18c] ss:$88 sps:$4 sm:$0xff]   ;;  %v4228_v25 = vld [vmem:[%s5168_s5 + $0x180] ss:$88 sps:$4 sm:$0xff]  }
  0xe5   : > { %2688 = vmatprep.subr.bf16.mxu1 %v4146_v26  ;;  %3884 = vmatprep.mubr.msk.bf16.mxu0 %vm2520_vm0, %v5236_v27  ;;  %v4231_v26 = vld [vmem:[%s5168_s5 + $0x188] ss:$88 sps:$4 sm:$0xff]  }
  0xe6   : > { %3886 = vmatprep.mubr.msk.bf16.mxu1 %vm2520_vm0, %v5236_v27 }
  0xe7   : > { %2636 = vmatpush1.bf16.msra.mxu0 %v4141_v28  ;;  %v4236_v28 = vld [vmem:[%s5168_s5 + $0x234] ss:$88 sps:$4 sm:$0xff]  }
  0xe8   : > { %2689 = vmatpush1.bf16.msra.mxu1 %v4144_v29  ;;  %2637 = vmatprep.subr.bf16.mxu0 %v4149_v31  ;;  %v4239_v29 = vld [vmem:[%s5168_s5 + $0x23c] ss:$88 sps:$4 sm:$0xff]   ;;  %v4234_v31 = vld [vmem:[%s5168_s5 + $0x230] ss:$88 sps:$4 sm:$0xff]  }
  0xe9   : > { %2690 = vmatprep.subr.bf16.mxu1 %v4152_v32  ;;  %v4237_v32 = vld [vmem:[%s5168_s5 + $0x238] ss:$88 sps:$4 sm:$0xff]  }
  0xea   : > { %2570 = vmatmul.mubr.bf16.gmra.mrb[4].mxu0 %v5251_v33 }
  0xeb   : > { %2623 = vmatmul.mubr.bf16.gmra.mrb[4].mxu1 %v5251_v33  ;;  %2638 = vmatpush1.bf16.msra.mxu0 %v4147_v34  ;;  %v4242_v34 = vld [vmem:[%s5168_s5 + $0x2e4] ss:$88 sps:$4 sm:$0xff]  }
  0xec   : > { %2691 = vmatpush1.bf16.msra.mxu1 %v4150_v35  ;;  %2639 = vmatprep.subr.bf16.mxu0 %v4155_v36  ;;  %v4245_v35 = vld [vmem:[%s5168_s5 + $0x2ec] ss:$88 sps:$4 sm:$0xff]   ;;  %v4240_v36 = vld [vmem:[%s5168_s5 + $0x2e0] ss:$88 sps:$4 sm:$0xff]  }
  0xed   : > { %2692 = vmatprep.subr.bf16.mxu1 %v4158_v37  ;;  %3887 = vmatprep.mubr.msk.bf16.mxu0 %vm2520_vm0, %v5160_v30  ;;  %v4243_v37 = vld [vmem:[%s5168_s5 + $0x2e8] ss:$88 sps:$4 sm:$0xff]  }
  0xee   : > { %3889 = vmatprep.mubr.msk.bf16.mxu1 %vm2520_vm0, %v5160_v30 }
  0xef   : > { %2640 = vmatpush1.bf16.msra.mxu0 %v4153_v38  ;;  %v4248_v38 = vld [vmem:[%s5168_s5 + $0x394] ss:$88 sps:$4 sm:$0xff]  }
  0xf0   : > { %2693 = vmatpush1.bf16.msra.mxu1 %v4156_v39  ;;  %2641 = vmatprep.subr.bf16.mxu0 %v4161_v40  ;;  %v1050_v39 = vld [vmem:[%s5821_s2 + $0x10] sm:$0xff] }
  0xf1   : > { %2694 = vmatprep.subr.bf16.mxu1 %v4164_v41  ;;  %v4251_v40 = vld [vmem:[%s5168_s5 + $0x39c] ss:$88 sps:$4 sm:$0xff]   ;;  %1064 = vperm.xlu1 %4053, %v1050_v39   ;;  %v4246_v41 = vld [vmem:[%s5168_s5 + $0x390] ss:$88 sps:$4 sm:$0xff]   ;;  %v4336_v39 = vld [vmem:[%s5168_s5 + $0x500] ss:$88 sps:$4 sm:$0xff]  }
  0xf3   : > { %2642 = vmatpush1.bf16.msra.mxu0 %v4159_v42  ;;  %v1051_v42 = vld [vmem:[%s5821_s2 + $0x18] sm:$0xff] }
  0xf4   : > { %2695 = vmatpush1.bf16.msra.mxu1 %v4162_v43  ;;  %2643 = vmatprep.subr.bf16.mxu0 %v4167_v44  ;;  %v4254_v43 = vld [vmem:[%s5168_s5 + $0x444] ss:$88 sps:$4 sm:$0xff]  }
  0xf5   : > { %2696 = vmatprep.subr.bf16.mxu1 %v4170_v45  ;;  %v4257_v44 = vld [vmem:[%s5168_s5 + $0x44c] ss:$88 sps:$4 sm:$0xff]   ;;  %1069 = vperm.xlu1 %4053, %v1051_v42   ;;  %v4252_v45 = vld [vmem:[%s5168_s5 + $0x440] ss:$88 sps:$4 sm:$0xff]   ;;  %v4342_v42 = vld [vmem:[%s5168_s5 + $0x5b0] ss:$88 sps:$4 sm:$0xff]  }
  0xf7   : > { %2644 = vmatpush1.bf16.msra.mxu0 %v4165_v46  ;;  %v4255_v46 = vld [vmem:[%s5168_s5 + $0x448] ss:$88 sps:$4 sm:$0xff]  }
  0xf8   : > { %2697 = vmatpush1.bf16.msra.mxu1 %v4168_v47  ;;  %2645 = vmatprep.subr.bf16.mxu0 %v4173_v48  ;;  %v4260_v47 = vld [vmem:[%s5168_s5 + $0x4f4] ss:$88 sps:$4 sm:$0xff]  }
  0xf9   : > { %2698 = vmatprep.subr.bf16.mxu1 %v4176_v49  ;;  %v4263_v48 = vld [vmem:[%s5168_s5 + $0x4fc] ss:$88 sps:$4 sm:$0xff]   ;;  %v4258_v49 = vld [vmem:[%s5168_s5 + $0x4f0] ss:$88 sps:$4 sm:$0xff]  }
  0xfb   : > { %2646 = vmatpush1.bf16.msra.mxu0 %v4171_v50  ;;  %v4261_v50 = vld [vmem:[%s5168_s5 + $0x4f8] ss:$88 sps:$4 sm:$0xff]  }
  0xfc   : > { %2699 = vmatpush1.bf16.msra.mxu1 %v4174_v51  ;;  %2647 = vmatprep.subr.bf16.mxu0 %v4179_v52  ;;  %v4266_v51 = vld [vmem:[%s5168_s5 + $0x5a4] ss:$88 sps:$4 sm:$0xff]  }
  0xfd   : > { %2700 = vmatprep.subr.bf16.mxu1 %v4182_v53  ;;  %v4269_v52 = vld [vmem:[%s5168_s5 + $0x5ac] ss:$88 sps:$4 sm:$0xff]   ;;  %v4264_v53 = vld [vmem:[%s5168_s5 + $0x5a0] ss:$88 sps:$4 sm:$0xff]  }
  0xff   : > { %2648 = vmatpush1.bf16.msra.mxu0 %v4177_v54  ;;  %v4267_v54 = vld [vmem:[%s5168_s5 + $0x5a8] ss:$88 sps:$4 sm:$0xff]  }
 0x100   : > { %2701 = vmatpush1.bf16.msra.mxu1 %v4180_v55  ;;  %2649 = vmatprep.subr.bf16.mxu0 %v4185_v56  ;;  %v4272_v55 = vld [vmem:[%s5168_s5 + $0x654] ss:$88 sps:$4 sm:$0xff]  }
 0x101   : > { %2702 = vmatprep.subr.bf16.mxu1 %v4188_v57  ;;  %v4275_v56 = vld [vmem:[%s5168_s5 + $0x65c] ss:$88 sps:$4 sm:$0xff]   ;;  %v4270_v57 = vld [vmem:[%s5168_s5 + $0x650] ss:$88 sps:$4 sm:$0xff]  }
 0x103   : > { %2650 = vmatpush1.bf16.msra.mxu0 %v4183_v58  ;;  %v4273_v58 = vld [vmem:[%s5168_s5 + $0x658] ss:$88 sps:$4 sm:$0xff]  }
 0x104   : > { %2703 = vmatpush1.bf16.msra.mxu1 %v4186_v59  ;;  %2651 = vmatprep.subr.bf16.mxu0 %v4191_v60  ;;  %v4278_v59 = vld [vmem:[%s5168_s5 + $0x704] ss:$88 sps:$4 sm:$0xff]  }
 0x105   : > { %2704 = vmatprep.subr.bf16.mxu1 %v4194_v61  ;;  %v4281_v60 = vld [vmem:[%s5168_s5 + $0x70c] ss:$88 sps:$4 sm:$0xff]   ;;  %v4276_v61 = vld [vmem:[%s5168_s5 + $0x700] ss:$88 sps:$4 sm:$0xff]  }
 0x107   : > { %2652 = vmatpush1.bf16.msra.mxu0 %v4189_v62  ;;  %v4279_v62 = vld [vmem:[%s5168_s5 + $0x708] ss:$88 sps:$4 sm:$0xff]  }
 0x108   : > { %2705 = vmatpush1.bf16.msra.mxu1 %v4192_v63  ;;  %2653 = vmatprep.subr.bf16.mxu0 %v4197_v0  ;;  %v4284_v63 = vld [vmem:[%s5168_s5 + $0x7b4] ss:$88 sps:$4 sm:$0xff]  }
 0x109   : > { %2706 = vmatprep.subr.bf16.mxu1 %v4200_v1  ;;  %v4287_v0 = vld [vmem:[%s5168_s5 + $0x7bc] ss:$88 sps:$4 sm:$0xff]   ;;  %v4282_v1 = vld [vmem:[%s5168_s5 + $0x7b0] ss:$88 sps:$4 sm:$0xff]  }
 0x10b   : > { %2654 = vmatpush1.bf16.msra.mxu0 %v4195_v3  ;;  %v4290_v3 = vld [vmem:[%s5168_s5 + $0x864] ss:$88 sps:$4 sm:$0xff]  }
 0x10c   : > { %2707 = vmatpush1.bf16.msra.mxu1 %v4198_v4  ;;  %2655 = vmatprep.subr.bf16.mxu0 %v4206_v5  ;;  %v4293_v4 = vld [vmem:[%s5168_s5 + $0x86c] ss:$88 sps:$4 sm:$0xff]   ;;  %v4288_v5 = vld [vmem:[%s5168_s5 + $0x860] ss:$88 sps:$4 sm:$0xff]  }
 0x10d   : > { %2708 = vmatprep.subr.bf16.mxu1 %v4209_v6  ;;  %v4291_v6 = vld [vmem:[%s5168_s5 + $0x868] ss:$88 sps:$4 sm:$0xff]  }
 0x10f   : > { %2656 = vmatpush1.bf16.msra.mxu0 %v4204_v8  ;;  %v4299_v8 = vld [vmem:[%s5168_s5 + $0x3c] ss:$88 sps:$4 sm:$0xff]  }
 0x110   : > { %2709 = vmatpush1.bf16.msra.mxu1 %v4207_v9  ;;  %2657 = vmatprep.subr.bf16.mxu0 %v4212_v10  ;;  %v4294_v9 = vld [vmem:[%s5168_s5 + $0x30] ss:$88 sps:$4 sm:$0xff]  }
 0x111   : > { %2710 = vmatprep.subr.bf16.mxu1 %v4215_v11  ;;  %v4297_v10 = vld [vmem:[%s5168_s5 + $0x38] ss:$88 sps:$4 sm:$0xff]   ;;  %v4302_v11 = vld [vmem:[%s5168_s5 + $0xe4] ss:$88 sps:$4 sm:$0xff]  }
 0x113   : > { %2658 = vmatpush1.bf16.msra.mxu0 %v4210_v12  ;;  %v4305_v12 = vld [vmem:[%s5168_s5 + $0xec] ss:$88 sps:$4 sm:$0xff]  }
 0x114   : > { %2711 = vmatpush1.bf16.msra.mxu1 %v4213_v13  ;;  %2739 = vmatprep.subr.bf16.mxu0 %v4218_v14  ;;  %v4300_v13 = vld [vmem:[%s5168_s5 + $0xe0] ss:$88 sps:$4 sm:$0xff]  }
 0x115   : > { %2792 = vmatprep.subr.bf16.mxu1 %v4221_v15  ;;  %v4303_v14 = vld [vmem:[%s5168_s5 + $0xe8] ss:$88 sps:$4 sm:$0xff]   ;;  %v4308_v15 = vld [vmem:[%s5168_s5 + $0x194] ss:$88 sps:$4 sm:$0xff]  }
 0x116   : > { %2666 = vmatmul.mubr.bf16.vlgmr.msra.gmra.mrb[8].mxu0 %v5227_v22 }
 0x117   : > { %2719 = vmatmul.mubr.bf16.vlgmr.msra.gmra.mrb[8].mxu1 %v5227_v22  ;;  %2740 = vmatpush1.bf16.msra.mxu0 %v4216_v16  ;;  %v4311_v16 = vld [vmem:[%s5168_s5 + $0x19c] ss:$88 sps:$4 sm:$0xff]  }
 0x118   : > { %2793 = vmatpush1.bf16.msra.mxu1 %v4219_v17  ;;  %2741 = vmatprep.subr.bf16.mxu0 %v4224_v18  ;;  %v4306_v17 = vld [vmem:[%s5168_s5 + $0x190] ss:$88 sps:$4 sm:$0xff]   ;;  %v4314_v18 = vld [vmem:[%s5168_s5 + $0x244] ss:$88 sps:$4 sm:$0xff]  }
 0x119   : > { %2794 = vmatprep.subr.bf16.mxu1 %v4227_v19  ;;  %3888 = vmatprep.mubr.msk.bf16.mxu0 %vm2520_vm0, %v5236_v27  ;;  %v4317_v19 = vld [vmem:[%s5168_s5 + $0x24c] ss:$88 sps:$4 sm:$0xff]  }
 0x11a   : > { %3890 = vmatprep.mubr.msk.bf16.mxu1 %vm2520_vm0, %v5236_v27 }
 0x11b   : > { %2742 = vmatpush1.bf16.msra.mxu0 %v4222_v20  ;;  %v4312_v20 = vld [vmem:[%s5168_s5 + $0x240] ss:$88 sps:$4 sm:$0xff]  }
 0x11c   : > { %2795 = vmatpush1.bf16.msra.mxu1 %v4225_v21  ;;  %2743 = vmatprep.subr.bf16.mxu0 %v4230_v23  ;;  %v4315_v21 = vld [vmem:[%s5168_s5 + $0x248] ss:$88 sps:$4 sm:$0xff]   ;;  %v4323_v23 = vld [vmem:[%s5168_s5 + $0x2fc] ss:$88 sps:$4 sm:$0xff]  }
 0x11d   : > { %2796 = vmatprep.subr.bf16.mxu1 %v4233_v24  ;;  %v5406_v24 = vld [vmem:[%s5820_s1 + $0x4] ss:$8 sps:$4 sm:$0xff]  }
 0x11e   : > { %2676 = vmatmul.mubr.bf16.gmra.mrb[12].mxu0 %v5251_v33 }
 0x11f   : > { %2729 = vmatmul.mubr.bf16.gmra.mrb[12].mxu1 %v5251_v33  ;;  %2744 = vmatpush1.bf16.msra.mxu0 %v4228_v25  ;;  %v4321_v25 = vld [vmem:[%s5168_s5 + $0x2f8] ss:$88 sps:$4 sm:$0xff]  }
 0x120   : > { %2797 = vmatpush1.bf16.msra.mxu1 %v4231_v26  ;;  %2745 = vmatprep.subr.bf16.mxu0 %v4236_v28  ;;  %v4326_v26 = vld [vmem:[%s5168_s5 + $0x3a4] ss:$88 sps:$4 sm:$0xff]  }
 0x121   : > { %2798 = vmatprep.subr.bf16.mxu1 %v4239_v29  ;;  %3891 = vmatprep.mubr.msk.bf16.mxu0 %vm2520_vm0, %v5160_v30  ;;  %v4329_v28 = vld [vmem:[%s5168_s5 + $0x3ac] ss:$88 sps:$4 sm:$0xff]   ;;  %v4324_v29 = vld [vmem:[%s5168_s5 + $0x3a0] ss:$88 sps:$4 sm:$0xff]  }
 0x122   : > { %3893 = vmatprep.mubr.msk.bf16.mxu1 %vm2520_vm0, %v5160_v30  ;;  %v4249_v30 = vld [vmem:[%s5168_s5 + $0x398] ss:$88 sps:$4 sm:$0xff]  }
 0x123   : > { %2746 = vmatpush1.bf16.msra.mxu0 %v4234_v31  ;;  %v4327_v31 = vld [vmem:[%s5168_s5 + $0x3a8] ss:$88 sps:$4 sm:$0xff]  }
 0x124   : > { %2799 = vmatpush1.bf16.msra.mxu1 %v4237_v32  ;;  %2747 = vmatprep.subr.bf16.mxu0 %v4242_v34  ;;  %v4332_v32 = vld [vmem:[%s5168_s5 + $0x454] ss:$88 sps:$4 sm:$0xff]  }
 0x125   : > { %2800 = vmatprep.subr.bf16.mxu1 %v4245_v35  ;;  %v4335_v34 = vld [vmem:[%s5168_s5 + $0x45c] ss:$88 sps:$4 sm:$0xff]   ;;  %v4330_v35 = vld [vmem:[%s5168_s5 + $0x450] ss:$88 sps:$4 sm:$0xff]  }
 0x127   : > { %2748 = vmatpush1.bf16.msra.mxu0 %v4240_v36  ;;  %v4333_v36 = vld [vmem:[%s5168_s5 + $0x458] ss:$88 sps:$4 sm:$0xff]  }
 0x128   : > { %2801 = vmatpush1.bf16.msra.mxu1 %v4243_v37  ;;  %2749 = vmatprep.subr.bf16.mxu0 %v4248_v38  ;;  %v4338_v37 = vld [vmem:[%s5168_s5 + $0x504] ss:$88 sps:$4 sm:$0xff]  }
 0x129   : > { %2802 = vmatprep.subr.bf16.mxu1 %v4251_v40  ;;  %v4341_v38 = vld [vmem:[%s5168_s5 + $0x50c] ss:$88 sps:$4 sm:$0xff]   ;;  %v4339_v40 = vld [vmem:[%s5168_s5 + $0x508] ss:$88 sps:$4 sm:$0xff]  }
 0x12b   : > { %2750 = vmatpush1.bf16.msra.mxu0 %v4246_v41  ;;  %v4344_v41 = vld [vmem:[%s5168_s5 + $0x5b4] ss:$88 sps:$4 sm:$0xff]  }
 0x12c   : > { %2803 = vmatpush1.bf16.msra.mxu1 %v4249_v30  ;;  %2751 = vmatprep.subr.bf16.mxu0 %v4254_v43  ;;  %v4347_v30 = vld [vmem:[%s5168_s5 + $0x5bc] ss:$88 sps:$4 sm:$0xff]   ;;  %v4345_v43 = vld [vmem:[%s5168_s5 + $0x5b8] ss:$88 sps:$4 sm:$0xff]  }
 0x12d   : > { %2804 = vmatprep.subr.bf16.mxu1 %v4257_v44  ;;  %v4350_v44 = vld [vmem:[%s5168_s5 + $0x664] ss:$88 sps:$4 sm:$0xff]  }
 0x12f   : > { %2752 = vmatpush1.bf16.msra.mxu0 %v4252_v45  ;;  %v4353_v45 = vld [vmem:[%s5168_s5 + $0x66c] ss:$88 sps:$4 sm:$0xff]  }
 0x130   : > { %2805 = vmatpush1.bf16.msra.mxu1 %v4255_v46  ;;  %2753 = vmatprep.subr.bf16.mxu0 %v4260_v47  ;;  %v4348_v46 = vld [vmem:[%s5168_s5 + $0x660] ss:$88 sps:$4 sm:$0xff]  }
 0x131   : > { %2806 = vmatprep.subr.bf16.mxu1 %v4263_v48  ;;  %v4351_v47 = vld [vmem:[%s5168_s5 + $0x668] ss:$88 sps:$4 sm:$0xff]   ;;  %v4356_v48 = vld [vmem:[%s5168_s5 + $0x714] ss:$88 sps:$4 sm:$0xff]  }
 0x133   : > { %2754 = vmatpush1.bf16.msra.mxu0 %v4258_v49  ;;  %v4359_v49 = vld [vmem:[%s5168_s5 + $0x71c] ss:$88 sps:$4 sm:$0xff]  }
 0x134   : > { %2807 = vmatpush1.bf16.msra.mxu1 %v4261_v50  ;;  %2755 = vmatprep.subr.bf16.mxu0 %v4266_v51  ;;  %v4354_v50 = vld [vmem:[%s5168_s5 + $0x710] ss:$88 sps:$4 sm:$0xff]  }
 0x135   : > { %2808 = vmatprep.subr.bf16.mxu1 %v4269_v52  ;;  %v4357_v51 = vld [vmem:[%s5168_s5 + $0x718] ss:$88 sps:$4 sm:$0xff]   ;;  %v4362_v52 = vld [vmem:[%s5168_s5 + $0x7c4] ss:$88 sps:$4 sm:$0xff]  }
 0x137   : > { %2756 = vmatpush1.bf16.msra.mxu0 %v4264_v53  ;;  %v4365_v53 = vld [vmem:[%s5168_s5 + $0x7cc] ss:$88 sps:$4 sm:$0xff]  }
 0x138   : > { %2809 = vmatpush1.bf16.msra.mxu1 %v4267_v54  ;;  %2757 = vmatprep.subr.bf16.mxu0 %v4272_v55  ;;  %v4360_v54 = vld [vmem:[%s5168_s5 + $0x7c0] ss:$88 sps:$4 sm:$0xff]  }
 0x139   : > { %2810 = vmatprep.subr.bf16.mxu1 %v4275_v56  ;;  %v4363_v55 = vld [vmem:[%s5168_s5 + $0x7c8] ss:$88 sps:$4 sm:$0xff]   ;;  %v4368_v56 = vld [vmem:[%s5168_s5 + $0x874] ss:$88 sps:$4 sm:$0xff]  }
 0x13b   : > { %2758 = vmatpush1.bf16.msra.mxu0 %v4270_v57  ;;  %v4371_v57 = vld [vmem:[%s5168_s5 + $0x87c] ss:$88 sps:$4 sm:$0xff]  }
 0x13c   : > { %2811 = vmatpush1.bf16.msra.mxu1 %v4273_v58  ;;  %2759 = vmatprep.subr.bf16.mxu0 %v4278_v59  ;;  %v4366_v58 = vld [vmem:[%s5168_s5 + $0x870] ss:$88 sps:$4 sm:$0xff]  }
 0x13d   : > { %2812 = vmatprep.subr.bf16.mxu1 %v4281_v60  ;;  %v4369_v59 = vld [vmem:[%s5168_s5 + $0x878] ss:$88 sps:$4 sm:$0xff]   ;;  %v4374_v60 = vld [vmem:[%s5168_s5 + $0x44] ss:$88 sps:$4 sm:$0xff]  }
 0x13f   : > { %2760 = vmatpush1.bf16.msra.mxu0 %v4276_v61  ;;  %v4377_v61 = vld [vmem:[%s5168_s5 + $0x4c] ss:$88 sps:$4 sm:$0xff]  }
 0x140   : > { %2813 = vmatpush1.bf16.msra.mxu1 %v4279_v62  ;;  %2761 = vmatprep.subr.bf16.mxu0 %v4284_v63  ;;  %v4372_v62 = vld [vmem:[%s5168_s5 + $0x40] ss:$88 sps:$4 sm:$0xff]  }
 0x141   : > { %2814 = vmatprep.subr.bf16.mxu1 %v4287_v0  ;;  %v4375_v63 = vld [vmem:[%s5168_s5 + $0x48] ss:$88 sps:$4 sm:$0xff]   ;;  %v4380_v0 = vld [vmem:[%s5168_s5 + $0xf4] ss:$88 sps:$4 sm:$0xff]  }
 0x143   : > { %2762 = vmatpush1.bf16.msra.mxu0 %v4282_v1  ;;  %v4383_v1 = vld [vmem:[%s5168_s5 + $0xfc] ss:$88 sps:$4 sm:$0xff]  }
 0x144   : > { %2815 = vmatpush1.bf16.msra.mxu1 %v4285_v2  ;;  %2763 = vmatprep.subr.bf16.mxu0 %v4290_v3  ;;  %v5455_v2 = vld [vmem:[%s5820_s1] ss:$8 sps:$4 sm:$0xff]  }
 0x145   : > { %2816 = vmatprep.subr.bf16.mxu1 %v4293_v4  ;;  %v4378_v3 = vld [vmem:[%s5168_s5 + $0xf0] ss:$88 sps:$4 sm:$0xff]  }
 0x146   : > { %v4381_v4 = vld [vmem:[%s5168_s5 + $0xf8] ss:$88 sps:$4 sm:$0xff]  }
 0x147   : > { %2764 = vmatpush1.bf16.msra.mxu0 %v4288_v5  ;;  %v4386_v5 = vld [vmem:[%s5168_s5 + $0x1a4] ss:$88 sps:$4 sm:$0xff]  }
 0x148   : > { %2817 = vmatpush1.bf16.msra.mxu1 %v4291_v6  ;;  %2845 = vmatprep.subr.bf16.mxu0 %v4296_v7  ;;  %v4389_v6 = vld [vmem:[%s5168_s5 + $0x1ac] ss:$88 sps:$4 sm:$0xff]  }
 0x149   : > { %2898 = vmatprep.subr.bf16.mxu1 %v4299_v8  ;;  %v5466_v7 = vld [vmem:[%s5820_s1 + $0x14] ss:$8 sps:$4 sm:$0xff]   ;;  %v4384_v8 = vld [vmem:[%s5168_s5 + $0x1a0] ss:$88 sps:$4 sm:$0xff]  }
 0x14a   : > { %2772 = vmatmul.mubr.bf16.vlgmr.msra.gmra.mrb[16].mxu0 %v5227_v22 }
 0x14b   : > { %2825 = vmatmul.mubr.bf16.vlgmr.msra.gmra.mrb[16].mxu1 %v5227_v22  ;;  %2846 = vmatpush1.bf16.msra.mxu0 %v4294_v9  ;;  %v4309_v22 = vld [vmem:[%s5168_s5 + $0x198] ss:$88 sps:$4 sm:$0xff]   ;;  %v4387_v9 = vld [vmem:[%s5168_s5 + $0x1a8] ss:$88 sps:$4 sm:$0xff]  }
 0x14c   : > { %2899 = vmatpush1.bf16.msra.mxu1 %v4297_v10  ;;  %2847 = vmatprep.subr.bf16.mxu0 %v4302_v11  ;;  %v4392_v10 = vld [vmem:[%s5168_s5 + $0x254] ss:$88 sps:$4 sm:$0xff]  }
 0x14d   : > { %2900 = vmatprep.subr.bf16.mxu1 %v4305_v12  ;;  %3892 = vmatprep.mubr.msk.bf16.mxu0 %vm2520_vm0, %v5236_v27  ;;  %v4395_v11 = vld [vmem:[%s5168_s5 + $0x25c] ss:$88 sps:$4 sm:$0xff]   ;;  %v5479_v12 = vld [vmem:[%s5820_s1 + $0x10] ss:$8 sps:$4 sm:$0xff]  }
 0x14e   : > { %3894 = vmatprep.mubr.msk.bf16.mxu1 %vm2520_vm0, %v5236_v27  ;;  %v4320_v27 = vld [vmem:[%s5168_s5 + $0x2f4] ss:$88 sps:$4 sm:$0xff]  }
 0x14f   : > { %2848 = vmatpush1.bf16.msra.mxu0 %v4300_v13  ;;  %v4390_v13 = vld [vmem:[%s5168_s5 + $0x250] ss:$88 sps:$4 sm:$0xff]  }
 0x150   : > { %2901 = vmatpush1.bf16.msra.mxu1 %v4303_v14  ;;  %2849 = vmatprep.subr.bf16.mxu0 %v4308_v15  ;;  %v4393_v14 = vld [vmem:[%s5168_s5 + $0x258] ss:$88 sps:$4 sm:$0xff]   ;;  %v4398_v15 = vld [vmem:[%s5168_s5 + $0x304] ss:$88 sps:$4 sm:$0xff]  }
 0x151   : > { %2902 = vmatprep.subr.bf16.mxu1 %v4311_v16  ;;  %v4401_v16 = vld [vmem:[%s5168_s5 + $0x30c] ss:$88 sps:$4 sm:$0xff]  }
 0x152   : > { %2782 = vmatmul.mubr.bf16.gmra.mrb[20].mxu0 %v5251_v33 }
 0x153   : > { %2835 = vmatmul.mubr.bf16.gmra.mrb[20].mxu1 %v5251_v33  ;;  %2850 = vmatpush1.bf16.msra.mxu0 %v4306_v17  ;;  %v4318_v33 = vld [vmem:[%s5168_s5 + $0x2f0] ss:$88 sps:$4 sm:$0xff]   ;;  %v4396_v17 = vld [vmem:[%s5168_s5 + $0x300] ss:$88 sps:$4 sm:$0xff]  }
 0x154   : > { %2903 = vmatpush1.bf16.msra.mxu1 %v4309_v22  ;;  %2851 = vmatprep.subr.bf16.mxu0 %v4314_v18  ;;  %v4399_v22 = vld [vmem:[%s5168_s5 + $0x308] ss:$88 sps:$4 sm:$0xff]   ;;  %v4404_v18 = vld [vmem:[%s5168_s5 + $0x3b4] ss:$88 sps:$4 sm:$0xff]  }
 0x155   : > { %2904 = vmatprep.subr.bf16.mxu1 %v4317_v19  ;;  %3895 = vmatprep.mubr.msk.bf16.mxu0 %vm2520_vm0, %v5406_v24  ;;  %v4407_v19 = vld [vmem:[%s5168_s5 + $0x3bc] ss:$88 sps:$4 sm:$0xff]  }
 0x156   : > { %3897 = vmatprep.mubr.msk.bf16.mxu1 %vm2520_vm0, %v5406_v24 }
 0x157   : > { %2852 = vmatpush1.bf16.msra.mxu0 %v4312_v20  ;;  %v4402_v20 = vld [vmem:[%s5168_s5 + $0x3b0] ss:$88 sps:$4 sm:$0xff]  }
 0x158   : > { %2905 = vmatpush1.bf16.msra.mxu1 %v4315_v21  ;;  %2853 = vmatprep.subr.bf16.mxu0 %v4320_v27  ;;  %v4405_v21 = vld [vmem:[%s5168_s5 + $0x3b8] ss:$88 sps:$4 sm:$0xff]   ;;  %v4410_v27 = vld [vmem:[%s5168_s5 + $0x464] ss:$88 sps:$4 sm:$0xff]  }
 0x159   : > { %2906 = vmatprep.subr.bf16.mxu1 %v4323_v23  ;;  %v4413_v23 = vld [vmem:[%s5168_s5 + $0x46c] ss:$88 sps:$4 sm:$0xff]  }
 0x15b   : > { %2854 = vmatpush1.bf16.msra.mxu0 %v4318_v33  ;;  %v4408_v33 = vld [vmem:[%s5168_s5 + $0x460] ss:$88 sps:$4 sm:$0xff]  }
 0x15c   : > { %2907 = vmatpush1.bf16.msra.mxu1 %v4321_v25  ;;  %2855 = vmatprep.subr.bf16.mxu0 %v4326_v26  ;;  %v4411_v25 = vld [vmem:[%s5168_s5 + $0x468] ss:$88 sps:$4 sm:$0xff]   ;;  %v4416_v26 = vld [vmem:[%s5168_s5 + $0x514] ss:$88 sps:$4 sm:$0xff]  }
 0x15d   : > { %2908 = vmatprep.subr.bf16.mxu1 %v4329_v28  ;;  %v4419_v28 = vld [vmem:[%s5168_s5 + $0x51c] ss:$88 sps:$4 sm:$0xff]  }
 0x15f   : > { %2856 = vmatpush1.bf16.msra.mxu0 %v4324_v29  ;;  %v4414_v29 = vld [vmem:[%s5168_s5 + $0x510] ss:$88 sps:$4 sm:$0xff]  }
 0x160   : > { %2909 = vmatpush1.bf16.msra.mxu1 %v4327_v31  ;;  %2857 = vmatprep.subr.bf16.mxu0 %v4332_v32  ;;  %v4417_v31 = vld [vmem:[%s5168_s5 + $0x518] ss:$88 sps:$4 sm:$0xff]   ;;  %v4422_v32 = vld [vmem:[%s5168_s5 + $0x5c4] ss:$88 sps:$4 sm:$0xff]  }
 0x161   : > { %2910 = vmatprep.subr.bf16.mxu1 %v4335_v34  ;;  %v4425_v34 = vld [vmem:[%s5168_s5 + $0x5cc] ss:$88 sps:$4 sm:$0xff]  }
 0x163   : > { %2858 = vmatpush1.bf16.msra.mxu0 %v4330_v35  ;;  %v4420_v35 = vld [vmem:[%s5168_s5 + $0x5c0] ss:$88 sps:$4 sm:$0xff]  }
 0x164   : > { %2911 = vmatpush1.bf16.msra.mxu1 %v4333_v36  ;;  %2859 = vmatprep.subr.bf16.mxu0 %v4338_v37  ;;  %v4423_v36 = vld [vmem:[%s5168_s5 + $0x5c8] ss:$88 sps:$4 sm:$0xff]   ;;  %v4428_v37 = vld [vmem:[%s5168_s5 + $0x674] ss:$88 sps:$4 sm:$0xff]  }
 0x165   : > { %2912 = vmatprep.subr.bf16.mxu1 %v4341_v38  ;;  %v4431_v38 = vld [vmem:[%s5168_s5 + $0x67c] ss:$88 sps:$4 sm:$0xff]  }
 0x167   : > { %2860 = vmatpush1.bf16.msra.mxu0 %v4336_v39  ;;  %v4426_v39 = vld [vmem:[%s5168_s5 + $0x670] ss:$88 sps:$4 sm:$0xff]  }
 0x168   : > { %2913 = vmatpush1.bf16.msra.mxu1 %v4339_v40  ;;  %2861 = vmatprep.subr.bf16.mxu0 %v4344_v41  ;;  %v4429_v40 = vld [vmem:[%s5168_s5 + $0x678] ss:$88 sps:$4 sm:$0xff]   ;;  %v4434_v41 = vld [vmem:[%s5168_s5 + $0x724] ss:$88 sps:$4 sm:$0xff]  }
 0x169   : > { %2914 = vmatprep.subr.bf16.mxu1 %v4347_v30  ;;  %v4437_v30 = vld [vmem:[%s5168_s5 + $0x72c] ss:$88 sps:$4 sm:$0xff]  }
 0x16b   : > { %2862 = vmatpush1.bf16.msra.mxu0 %v4342_v42  ;;  %v4432_v42 = vld [vmem:[%s5168_s5 + $0x720] ss:$88 sps:$4 sm:$0xff]  }
 0x16c   : > { %2915 = vmatpush1.bf16.msra.mxu1 %v4345_v43  ;;  %2863 = vmatprep.subr.bf16.mxu0 %v4350_v44  ;;  %v4435_v43 = vld [vmem:[%s5168_s5 + $0x728] ss:$88 sps:$4 sm:$0xff]   ;;  %v4440_v44 = vld [vmem:[%s5168_s5 + $0x7d4] ss:$88 sps:$4 sm:$0xff]  }
 0x16d   : > { %2916 = vmatprep.subr.bf16.mxu1 %v4353_v45  ;;  %v4443_v45 = vld [vmem:[%s5168_s5 + $0x7dc] ss:$88 sps:$4 sm:$0xff]  }
 0x16f   : > { %2864 = vmatpush1.bf16.msra.mxu0 %v4348_v46  ;;  %v4438_v46 = vld [vmem:[%s5168_s5 + $0x7d0] ss:$88 sps:$4 sm:$0xff]  }
 0x170   : > { %2917 = vmatpush1.bf16.msra.mxu1 %v4351_v47  ;;  %2865 = vmatprep.subr.bf16.mxu0 %v4356_v48  ;;  %v4441_v47 = vld [vmem:[%s5168_s5 + $0x7d8] ss:$88 sps:$4 sm:$0xff]   ;;  %v4446_v48 = vld [vmem:[%s5168_s5 + $0x884] ss:$88 sps:$4 sm:$0xff]  }
 0x171   : > { %2918 = vmatprep.subr.bf16.mxu1 %v4359_v49  ;;  %v4449_v49 = vld [vmem:[%s5168_s5 + $0x88c] ss:$88 sps:$4 sm:$0xff]  }
 0x173   : > { %2866 = vmatpush1.bf16.msra.mxu0 %v4354_v50  ;;  %v4444_v50 = vld [vmem:[%s5168_s5 + $0x880] ss:$88 sps:$4 sm:$0xff]  }
 0x174   : > { %2919 = vmatpush1.bf16.msra.mxu1 %v4357_v51  ;;  %2867 = vmatprep.subr.bf16.mxu0 %v4362_v52  ;;  %v4447_v51 = vld [vmem:[%s5168_s5 + $0x888] ss:$88 sps:$4 sm:$0xff]   ;;  %v4452_v52 = vld [vmem:[%s5168_s5 + $0x54] ss:$88 sps:$4 sm:$0xff]  }
 0x175   : > { %2920 = vmatprep.subr.bf16.mxu1 %v4365_v53  ;;  %v5526_v53 = vpop.permute.xlu0 %1054 }
 0x177   : > { %2868 = vmatpush1.bf16.msra.mxu0 %v4360_v54  ;;  %v4450_v54 = vld [vmem:[%s5168_s5 + $0x50] ss:$88 sps:$4 sm:$0xff]  }
 0x178   : > { %2921 = vmatpush1.bf16.msra.mxu1 %v4363_v55  ;;  %2869 = vmatprep.subr.bf16.mxu0 %v4368_v56  ;;  %v4455_v55 = vld [vmem:[%s5168_s5 + $0x104] ss:$88 sps:$4 sm:$0xff]   ;;  %v4453_v56 = vld [vmem:[%s5168_s5 + $0x100] ss:$88 sps:$4 sm:$0xff]  }
 0x179   : > { %2922 = vmatprep.subr.bf16.mxu1 %v4371_v57  ;;  %v5537_v57 = vpop.permute.xlu0 %1059 }
 0x17b   : > { %2870 = vmatpush1.bf16.msra.mxu0 %v4366_v58  ;;  %v4458_v58 = vld [vmem:[%s5168_s5 + $0x1b4] ss:$88 sps:$4 sm:$0xff]  }
 0x17c   : > { %2923 = vmatpush1.bf16.msra.mxu1 %v4369_v59  ;;  %2951 = vmatprep.subr.bf16.mxu0 %v4374_v60  ;;  %v5540_v59 = vpop.permute.xlu1 %1064 }
 0x17d   : > { %3004 = vmatprep.subr.bf16.mxu1 %v4377_v61 }
 0x17e   : > { %2878 = vmatmul.mubr.bf16.vlgmr.msra.gmra.mrb[24].mxu0 %v5455_v2 }
 0x17f   : > { %2931 = vmatmul.mubr.bf16.vlgmr.msra.gmra.mrb[24].mxu1 %v5455_v2  ;;  %2952 = vmatpush1.bf16.msra.mxu0 %v4372_v62 }
 0x180   : > { %3005 = vmatpush1.bf16.msra.mxu1 %v4375_v63  ;;  %2953 = vmatprep.subr.bf16.mxu0 %v4380_v0 }
 0x181   : > { %3006 = vmatprep.subr.bf16.mxu1 %v4383_v1  ;;  %3896 = vmatprep.mubr.msk.bf16.mxu0 %vm2520_vm0, %v5466_v7 }
 0x182   : > { %3898 = vmatprep.mubr.msk.bf16.mxu1 %vm2520_vm0, %v5466_v7 }
 0x183   : > { %2954 = vmatpush1.bf16.msra.mxu0 %v4378_v3 }
 0x184   : > { %3007 = vmatpush1.bf16.msra.mxu1 %v4381_v4  ;;  %2955 = vmatprep.subr.bf16.mxu0 %v4386_v5 }
 0x185   : > { %3008 = vmatprep.subr.bf16.mxu1 %v4389_v6 }
 0x186   : > { %2888 = vmatmul.mubr.bf16.gmra.mrb[28].mxu0 %v5479_v12 }
 0x187   : > { %2941 = vmatmul.mubr.bf16.gmra.mrb[28].mxu1 %v5479_v12  ;;  %2956 = vmatpush1.bf16.msra.mxu0 %v4384_v8  ;;  %v4456_v8 = vld [vmem:[%s5168_s5 + $0x1b0] ss:$88 sps:$4 sm:$0xff]  }
 0x188   : > { %3009 = vmatpush1.bf16.msra.mxu1 %v4387_v9  ;;  %2957 = vmatprep.subr.bf16.mxu0 %v4392_v10 }
 0x189   : > { %3010 = vmatprep.subr.bf16.mxu1 %v4395_v11  ;;  %3899 = vmatprep.mubr.msk.bf16.mxu0 %vm2520_vm0, %v5406_v24 }
 0x18a   : > { %3901 = vmatprep.mubr.msk.bf16.mxu1 %vm2520_vm0, %v5406_v24 }
 0x18b   : > { %2958 = vmatpush1.bf16.msra.mxu0 %v4390_v13 }
 0x18c   : > { %3011 = vmatpush1.bf16.msra.mxu1 %v4393_v14  ;;  %2959 = vmatprep.subr.bf16.mxu0 %v4398_v15  ;;  %v4461_v14 = vld [vmem:[%s5168_s5 + $0x264] ss:$88 sps:$4 sm:$0xff]  }
 0x18d   : > { %3012 = vmatprep.subr.bf16.mxu1 %v4401_v16 }
 0x18f   : > { %2960 = vmatpush1.bf16.msra.mxu0 %v4396_v17 }
 0x190   : > { %3013 = vmatpush1.bf16.msra.mxu1 %v4399_v22  ;;  %2961 = vmatprep.subr.bf16.mxu0 %v4404_v18 }
 0x191   : > { %3014 = vmatprep.subr.bf16.mxu1 %v4407_v19 }
 0x193   : > { %2962 = vmatpush1.bf16.msra.mxu0 %v4402_v20  ;;  %v4459_v20 = vld [vmem:[%s5168_s5 + $0x260] ss:$88 sps:$4 sm:$0xff]  }
 0x194   : > { %3015 = vmatpush1.bf16.msra.mxu1 %v4405_v21  ;;  %2963 = vmatprep.subr.bf16.mxu0 %v4410_v27  ;;  %v4464_v21 = vld [vmem:[%s5168_s5 + $0x314] ss:$88 sps:$4 sm:$0xff]   ;;  %v5565_v27 = vpop.permute.xlu1 %1069 }
 0x195   : > { %3016 = vmatprep.subr.bf16.mxu1 %v4413_v23 }
 0x197   : > { %2964 = vmatpush1.bf16.msra.mxu0 %v4408_v33 }
 0x198   : > { %3017 = vmatpush1.bf16.msra.mxu1 %v4411_v25  ;;  %2965 = vmatprep.subr.bf16.mxu0 %v4416_v26 }
 0x199   : > { %3018 = vmatprep.subr.bf16.mxu1 %v4419_v28 }
 0x19b   : > { %2966 = vmatpush1.bf16.msra.mxu0 %v4414_v29 }
 0x19c   : > { %3019 = vmatpush1.bf16.msra.mxu1 %v4417_v31  ;;  %2967 = vmatprep.subr.bf16.mxu0 %v4422_v32  ;;  %v4462_v31 = vld [vmem:[%s5168_s5 + $0x310] ss:$88 sps:$4 sm:$0xff]  }
 0x19d   : > { %3020 = vmatprep.subr.bf16.mxu1 %v4425_v34 }
 0x19f   : > { %2968 = vmatpush1.bf16.msra.mxu0 %v4420_v35 }
 0x1a0   : > { %3021 = vmatpush1.bf16.msra.mxu1 %v4423_v36  ;;  %2969 = vmatprep.subr.bf16.mxu0 %v4428_v37 }
 0x1a1   : > { %3022 = vmatprep.subr.bf16.mxu1 %v4431_v38 }
 0x1a3   : > { %2970 = vmatpush1.bf16.msra.mxu0 %v4426_v39 }
 0x1a4   : > { %3023 = vmatpush1.bf16.msra.mxu1 %v4429_v40  ;;  %2971 = vmatprep.subr.bf16.mxu0 %v4434_v41 }
 0x1a5   : > { %3024 = vmatprep.subr.bf16.mxu1 %v4437_v30 }
 0x1a7   : > { %2972 = vmatpush1.bf16.msra.mxu0 %v4432_v42 }
 0x1a8   : > { %3025 = vmatpush1.bf16.msra.mxu1 %v4435_v43  ;;  %2973 = vmatprep.subr.bf16.mxu0 %v4440_v44  ;;  %v4465_v43 = vld [vmem:[%s5168_s5 + $0x3c0] ss:$88 sps:$4 sm:$0xff]  }
 0x1a9   : > { %3026 = vmatprep.subr.bf16.mxu1 %v4443_v45 }
 0x1ab   : > { %2974 = vmatpush1.bf16.msra.mxu0 %v4438_v46  ;;  %v4470_v46 = vld [vmem:[%s5168_s5 + $0x474] ss:$88 sps:$4 sm:$0xff]  }
 0x1ac   : > { %3027 = vmatpush1.bf16.msra.mxu1 %v4441_v47  ;;  %2975 = vmatprep.subr.bf16.mxu0 %v4446_v48  ;;  %v4468_v47 = vld [vmem:[%s5168_s5 + $0x470] ss:$88 sps:$4 sm:$0xff]   ;;  %v4473_v48 = vld [vmem:[%s5168_s5 + $0x524] ss:$88 sps:$4 sm:$0xff]  }
 0x1ad   : > { %3028 = vmatprep.subr.bf16.mxu1 %v4449_v49  ;;  %v4471_v49 = vld [vmem:[%s5168_s5 + $0x520] ss:$88 sps:$4 sm:$0xff]  }
 0x1af   : > { %2976 = vmatpush1.bf16.msra.mxu0 %v4444_v50  ;;  %v4476_v50 = vld [vmem:[%s5168_s5 + $0x5d4] ss:$88 sps:$4 sm:$0xff]  }
 0x1b0   : > { %3029 = vmatpush1.bf16.msra.mxu1 %v4447_v51  ;;  %3057 = vmatprep.subr.bf16.mxu0 %v4452_v52  ;;  %v4474_v51 = vld [vmem:[%s5168_s5 + $0x5d0] ss:$88 sps:$4 sm:$0xff]  }
 0x1b1   : > { %3998 = vmatprep.subr.bf16.mxu1 %v4452_v52  ;;  %v4479_v52 = vld [vmem:[%s5168_s5 + $0x684] ss:$88 sps:$4 sm:$0xff]  }
 0x1b2   : > { %2984 = vmatmul.mubr.bf16.vlgmr.msra.gmra.mrb[32].mxu0 %v5455_v2 }
 0x1b3   : > { %3037 = vmatmul.mubr.bf16.vlgmr.msra.gmra.mrb[32].mxu1 %v5455_v2  ;;  %3058 = vmatpush1.bf16.msra.mxu0 %v4450_v54 }
 0x1b4   : > { %4011 = vmatpush1.bf16.msra.mxu1 %v4450_v54  ;;  %3059 = vmatprep.subr.bf16.mxu0 %v4455_v55  ;;  %v4477_v54 = vld [vmem:[%s5168_s5 + $0x680] ss:$88 sps:$4 sm:$0xff]  }
 0x1b5   : > { %3999 = vmatprep.subr.bf16.mxu1 %v4455_v55  ;;  %v2561_v60 = vpop.f32.mrb[0].mxu0  ;;  %3900 = vmatprep.mubr.msk.bf16.mxu0 %vm2520_vm0, %v5466_v7  ;;  %v4482_v55 = vld [vmem:[%s5168_s5 + $0x734] ss:$88 sps:$4 sm:$0xff]  }
 0x1b6   : > { %v2614_v61 = vpop.f32.mrb[0].mxu1  ;;  %3902 = vmatprep.mubr.msk.bf16.mxu1 %vm2520_vm0, %v5466_v7  ;;  %v2562_v62 = vadd.f32 %v2561_v60, %v5526_v53  ;;  %v2563_v0 = vpop.f32.mrb[1].mxu0  ;;  %v4483_v60 = vld [vmem:[%s5168_s5 + $0x7e0] ss:$88 sps:$4 sm:$0xff]  }
 0x1b7   : > { %v2615_v63 = vadd.f32 %v2614_v61, %v5526_v53  ;;  %v2616_v1 = vpop.f32.mrb[1].mxu1  ;;  %v2564_v3 = vadd.f32 %v2563_v0, %v5526_v53  ;;  %v2565_v5 = vpop.f32.mrb[2].mxu0  ;;  %3060 = vmatpush1.bf16.msra.mxu0 %v4453_v56  ;;  %v4488_v61 = vld [vmem:[%s5168_s5 + $0x894] ss:$88 sps:$4 sm:$0xff]  }
 0x1b8   : > { %v2617_v4 = vadd.f32 %v2616_v1, %v5526_v53  ;;  %v2618_v6 = vpop.f32.mrb[2].mxu1  ;;  %4012 = vmatpush1.bf16.msra.mxu1 %v4453_v56  ;;  %v2566_v9 = vadd.f32 %v2565_v5, %v5537_v57  ;;  %v2567_v11 = vpop.f32.mrb[3].mxu0  ;;  %3061 = vmatprep.subr.bf16.mxu0 %v4458_v58  ;;  %v4480_v56 = vld [vmem:[%s5168_s5 + $0x730] ss:$88 sps:$4 sm:$0xff]  }
 0x1b9   : > { %v2619_v10 = vadd.f32 %v2618_v6, %v5537_v57  ;;  %v2620_v13 = vpop.f32.mrb[3].mxu1  ;;  %4000 = vmatprep.subr.bf16.mxu1 %v4458_v58  ;;  %v3953_v15 = vpack.c.bf16 %v2564_v3, %v2562_v62  ;;  %v2568_v17 = vadd.f32 %v2567_v11, %v5537_v57  ;;  %v4485_v58 = vld [vmem:[%s5168_s5 + $0x7e4] ss:$88 sps:$4 sm:$0xff]   ;;  %v4486_v62 = vld [vmem:[%s5168_s5 + $0x890] ss:$88 sps:$4 sm:$0xff]  }
 0x1ba   : > { %v3954_v16 = vpack.c.bf16 %v2617_v4, %v2615_v63  ;;  %v2621_v22 = vadd.f32 %v2620_v13, %v5537_v57  ;;  %2994 = vmatmul.mubr.bf16.gmra.mrb[36].mxu0 %v5479_v12 }
 0x1bb   : > { %3047 = vmatmul.mubr.bf16.gmra.mrb[36].mxu1 %v5479_v12  ;;  %3374 = vst [vmem:[%s5559_s12] sm:$0xff] %v3953_v15  ;;  %v3964_v18 = vpack.c.bf16 %v2568_v17, %v2566_v9  ;;  %3062 = vmatpush1.bf16.msra.mxu0 %v4456_v8 }
 0x1bc   : > { %3375 = vst [vmem:[%s5559_s12 + $0x8] sm:$0xff] %v3954_v16  ;;  %v3965_v19 = vpack.c.bf16 %v2621_v22, %v2619_v10  ;;  %4013 = vmatpush1.bf16.msra.mxu1 %v4456_v8  ;;  %3063 = vmatprep.subr.bf16.mxu0 %v4461_v14 }
 0x1bd   : > { %4001 = vmatprep.subr.bf16.mxu1 %v4461_v14  ;;  %3385 = vst [vmem:[%s5559_s12 + $0x58] sm:$0xff] %v3964_v18  ;;  %v2571_v23 = vpop.f32.mrb[4].mxu0  ;;  %3903 = vmatprep.mubr.msk.bf16.mxu0 %vm2520_vm0, %v5406_v24 }
 0x1be   : > { %3386 = vst [vmem:[%s5559_s12 + $0x60] sm:$0xff] %v3965_v19  ;;  %v2624_v33 = vpop.f32.mrb[4].mxu1  ;;  %3904 = vmatprep.mubr.msk.bf16.mxu1 %vm2520_vm0, %v5466_v7  ;;  %v2572_v25 = vadd.f32 %v2571_v23, %v5540_v59  ;;  %v2573_v28 = vpop.f32.mrb[5].mxu0  ;;  %v4467_v7 = vld [vmem:[%s5168_s5 + $0x3c4] ss:$88 sps:$4 sm:$0xff]   ;;  %s5725_s5 = scalar_lea.vmem (%p4568_p5), %s5822_s3, %s3997_s28 }
 0x1bf   : > { %v2625_v26 = vadd.f32 %v2624_v33, %v5540_v59  ;;  %v2626_v29 = vpop.f32.mrb[5].mxu1  ;;  %3064 = vmatpush1.bf16.msra.mxu0 %v4459_v20  ;;  %v2574_v32 = vadd.f32 %v2573_v28, %v5540_v59  ;;  %v2575_v35 = vpop.f32.mrb[6].mxu0 }
 0x1c0   : > { %4014 = vmatpush1.bf16.msra.mxu1 %v4459_v20  ;;  %v2627_v34 = vadd.f32 %v2626_v29, %v5540_v59  ;;  %v2628_v24 = vpop.f32.mrb[6].mxu1  ;;  %3065 = vmatprep.subr.bf16.mxu0 %v4464_v21  ;;  %v2576_v36 = vadd.f32 %v2575_v35, %v5565_v27  ;;  %v2577_v37 = vpop.f32.mrb[7].mxu0 }
 0x1c1   : > { %4002 = vmatprep.subr.bf16.mxu1 %v4464_v21  ;;  %v2629_v38 = vadd.f32 %v2628_v24, %v5565_v27  ;;  %v2630_v39 = vpop.f32.mrb[7].mxu1  ;;  %v3975_v40 = vpack.c.bf16 %v2574_v32, %v2572_v25  ;;  %v2578_v30 = vadd.f32 %v2577_v37, %v5565_v27 }
 0x1c2   : > { %v3976_v41 = vpack.c.bf16 %v2627_v34, %v2625_v26  ;;  %v2631_v42 = vadd.f32 %v2630_v39, %v5565_v27 }
 0x1c3   : > { %3066 = vmatpush1.bf16.msra.mxu0 %v4462_v31  ;;  %3396 = vst [vmem:[%s5559_s12 + $0xb0] sm:$0xff] %v3975_v40  ;;  %v3986_v44 = vpack.c.bf16 %v2578_v30, %v2576_v36 }
 0x1c4   : > { %4015 = vmatpush1.bf16.msra.mxu1 %v4462_v31  ;;  %3397 = vst [vmem:[%s5559_s12 + $0xb8] sm:$0xff] %v3976_v41  ;;  %v3987_v45 = vpack.c.bf16 %v2631_v42, %v2629_v38  ;;  %3067 = vmatprep.subr.bf16.mxu0 %v4467_v7 }
 0x1c5   : > { %4003 = vmatprep.subr.bf16.mxu1 %v4467_v7  ;;  %3407 = vst [vmem:[%s5559_s12 + $0x108] sm:$0xff] %v3986_v44 }
 0x1c6   : > { %3408 = vst [vmem:[%s5559_s12 + $0x110] sm:$0xff] %v3987_v45 }
 0x1c7   : > { %3068 = vmatpush1.bf16.msra.mxu0 %v4465_v43 }
 0x1c8   : > { %4016 = vmatpush1.bf16.msra.mxu1 %v4465_v43  ;;  %3069 = vmatprep.subr.bf16.mxu0 %v4470_v46 }
 0x1c9   : > { %4004 = vmatprep.subr.bf16.mxu1 %v4470_v46 }
 0x1cb   : > { %3070 = vmatpush1.bf16.msra.mxu0 %v4468_v47 }
 0x1cc   : > { %4017 = vmatpush1.bf16.msra.mxu1 %v4468_v47  ;;  %3071 = vmatprep.subr.bf16.mxu0 %v4473_v48 }
 0x1cd   : > { %4005 = vmatprep.subr.bf16.mxu1 %v4473_v48 }
 0x1cf   : > { %3072 = vmatpush1.bf16.msra.mxu0 %v4471_v49 }
 0x1d0   : > { %4018 = vmatpush1.bf16.msra.mxu1 %v4471_v49  ;;  %3073 = vmatprep.subr.bf16.mxu0 %v4476_v50 }
 0x1d1   : > { %4006 = vmatprep.subr.bf16.mxu1 %v4476_v50 }
 0x1d3   : > { %3074 = vmatpush1.bf16.msra.mxu0 %v4474_v51 }
 0x1d4   : > { %4019 = vmatpush1.bf16.msra.mxu1 %v4474_v51  ;;  %3075 = vmatprep.subr.bf16.mxu0 %v4479_v52 }
 0x1d5   : > { %4007 = vmatprep.subr.bf16.mxu1 %v4479_v52 }
 0x1d7   : > { %3076 = vmatpush1.bf16.msra.mxu0 %v4477_v54 }
 0x1d8   : > { %4020 = vmatpush1.bf16.msra.mxu1 %v4477_v54  ;;  %3077 = vmatprep.subr.bf16.mxu0 %v4482_v55 }
 0x1d9   : > { %4008 = vmatprep.subr.bf16.mxu1 %v4482_v55 }
 0x1db   : > { %3078 = vmatpush1.bf16.msra.mxu0 %v4480_v56 }
 0x1dc   : > { %4021 = vmatpush1.bf16.msra.mxu1 %v4480_v56  ;;  %3079 = vmatprep.subr.bf16.mxu0 %v4485_v58 }
 0x1dd   : > { %4009 = vmatprep.subr.bf16.mxu1 %v4485_v58 }
 0x1df   : > { %3080 = vmatpush1.bf16.msra.mxu0 %v4483_v60 }
 0x1e0   : > { %4022 = vmatpush1.bf16.msra.mxu1 %v4483_v60  ;;  %3081 = vmatprep.subr.bf16.mxu0 %v4488_v61 }
 0x1e1   : > { %4010 = vmatprep.subr.bf16.mxu1 %v4488_v61 }
 0x1e3   : > { %3082 = vmatpush1.bf16.msra.mxu0 %v4486_v62 }
 0x1e4   : > { %4023 = vmatpush1.bf16.msra.mxu1 %v4486_v62 }
 0x1e6   : > { %3090 = vmatmul.mubr.bf16.vlgmr.msra.gmra.mrb[40].mxu0 %v5455_v2 }
 0x1e7   : > { %3100 = vmatmul.mubr.bf16.vlgmr.msra.gmra.mrb[40].mxu1 %v5479_v12 }
 0x1e9   : > { %v2667_v63 = vpop.f32.mrb[8].mxu0 }
 0x1ea   : > { %v2720_v0 = vpop.f32.mrb[8].mxu1  ;;  %v2668_v1 = vadd.f32 %v2667_v63, %v5526_v53  ;;  %v2669_v4 = vpop.f32.mrb[9].mxu0 }
 0x1eb   : > { %v2721_v3 = vadd.f32 %v2720_v0, %v5526_v53  ;;  %v2722_v5 = vpop.f32.mrb[9].mxu1  ;;  %v2670_v6 = vadd.f32 %v2669_v4, %v5526_v53  ;;  %v2671_v9 = vpop.f32.mrb[10].mxu0 }
 0x1ec   : > { %v2723_v8 = vadd.f32 %v2722_v5, %v5526_v53  ;;  %v2724_v2 = vpop.f32.mrb[10].mxu1  ;;  %v2672_v12 = vadd.f32 %v2671_v9, %v5537_v57  ;;  %v2673_v11 = vpop.f32.mrb[11].mxu0 }
 0x1ed   : > { %v2725_v10 = vadd.f32 %v2724_v2, %v5537_v57  ;;  %v2726_v13 = vpop.f32.mrb[11].mxu1  ;;  %v3955_v14 = vpack.c.bf16 %v2670_v6, %v2668_v1  ;;  %v2674_v16 = vadd.f32 %v2673_v11, %v5537_v57 }
 0x1ee   : > { %v3956_v15 = vpack.c.bf16 %v2723_v8, %v2721_v3  ;;  %v2727_v17 = vadd.f32 %v2726_v13, %v5537_v57 }
 0x1ef   : > { %3376 = vst [vmem:[%s5559_s12 + $0x10] sm:$0xff] %v3955_v14  ;;  %v3966_v22 = vpack.c.bf16 %v2674_v16, %v2672_v12 }
 0x1f0   : > { %3377 = vst [vmem:[%s5559_s12 + $0x18] sm:$0xff] %v3956_v15  ;;  %v3967_v18 = vpack.c.bf16 %v2727_v17, %v2725_v10 }
 0x1f1   : > { %3387 = vst [vmem:[%s5559_s12 + $0x68] sm:$0xff] %v3966_v22  ;;  %v2677_v19 = vpop.f32.mrb[12].mxu0 }
 0x1f2   : > { %3388 = vst [vmem:[%s5559_s12 + $0x70] sm:$0xff] %v3967_v18  ;;  %v2730_v20 = vpop.f32.mrb[12].mxu1  ;;  %v2678_v21 = vadd.f32 %v2677_v19, %v5540_v59  ;;  %v2679_v33 = vpop.f32.mrb[13].mxu0 }
 0x1f3   : > { %v2731_v23 = vadd.f32 %v2730_v20, %v5540_v59  ;;  %v2732_v25 = vpop.f32.mrb[13].mxu1  ;;  %v2680_v26 = vadd.f32 %v2679_v33, %v5540_v59  ;;  %v2681_v29 = vpop.f32.mrb[14].mxu0 }
 0x1f4   : > { %v2733_v28 = vadd.f32 %v2732_v25, %v5540_v59  ;;  %v2734_v31 = vpop.f32.mrb[14].mxu1  ;;  %v2682_v32 = vadd.f32 %v2681_v29, %v5565_v27  ;;  %v2683_v35 = vpop.f32.mrb[15].mxu0 }
 0x1f5   : > { %v2735_v34 = vadd.f32 %v2734_v31, %v5565_v27  ;;  %v2736_v24 = vpop.f32.mrb[15].mxu1  ;;  %v3977_v7 = vpack.c.bf16 %v2680_v26, %v2678_v21  ;;  %v2684_v37 = vadd.f32 %v2683_v35, %v5565_v27 }
 0x1f6   : > { %v3978_v36 = vpack.c.bf16 %v2733_v28, %v2731_v23  ;;  %v2737_v38 = vadd.f32 %v2736_v24, %v5565_v27 }
 0x1f7   : > { %3398 = vst [vmem:[%s5559_s12 + $0xc0] sm:$0xff] %v3977_v7  ;;  %v3988_v39 = vpack.c.bf16 %v2684_v37, %v2682_v32 }
 0x1f8   : > { %3399 = vst [vmem:[%s5559_s12 + $0xc8] sm:$0xff] %v3978_v36  ;;  %v3989_v40 = vpack.c.bf16 %v2737_v38, %v2735_v34 }
 0x1f9   : > { %3409 = vst [vmem:[%s5559_s12 + $0x118] sm:$0xff] %v3988_v39 }
 0x1fa   : > { %3410 = vst [vmem:[%s5559_s12 + $0x120] sm:$0xff] %v3989_v40 }
 0x21d   : > { %v2773_v41 = vpop.f32.mrb[16].mxu0 }
 0x21e   : > { %v2826_v30 = vpop.f32.mrb[16].mxu1  ;;  %v2774_v42 = vadd.f32 %v2773_v41, %v5526_v53  ;;  %v2775_v44 = vpop.f32.mrb[17].mxu0 }
 0x21f   : > { %v2827_v43 = vadd.f32 %v2826_v30, %v5526_v53  ;;  %v2828_v45 = vpop.f32.mrb[17].mxu1  ;;  %v2776_v46 = vadd.f32 %v2775_v44, %v5526_v53  ;;  %v2777_v48 = vpop.f32.mrb[18].mxu0 }
 0x220   : > { %v2829_v47 = vadd.f32 %v2828_v45, %v5526_v53  ;;  %v2830_v49 = vpop.f32.mrb[18].mxu1  ;;  %v2778_v50 = vadd.f32 %v2777_v48, %v5537_v57  ;;  %v2779_v52 = vpop.f32.mrb[19].mxu0 }
 0x221   : > { %v2831_v51 = vadd.f32 %v2830_v49, %v5537_v57  ;;  %v2832_v54 = vpop.f32.mrb[19].mxu1  ;;  %v3957_v55 = vpack.c.bf16 %v2776_v46, %v2774_v42  ;;  %v2780_v58 = vadd.f32 %v2779_v52, %v5537_v57 }
 0x222   : > { %v3958_v56 = vpack.c.bf16 %v2829_v47, %v2827_v43  ;;  %v2833_v60 = vadd.f32 %v2832_v54, %v5537_v57 }
 0x223   : > { %3378 = vst [vmem:[%s5559_s12 + $0x20] sm:$0xff] %v3957_v55  ;;  %v3968_v61 = vpack.c.bf16 %v2780_v58, %v2778_v50 }
 0x224   : > { %3379 = vst [vmem:[%s5559_s12 + $0x28] sm:$0xff] %v3958_v56  ;;  %v3969_v62 = vpack.c.bf16 %v2833_v60, %v2831_v51 }
 0x225   : > { %3389 = vst [vmem:[%s5559_s12 + $0x78] sm:$0xff] %v3968_v61  ;;  %v2783_v63 = vpop.f32.mrb[20].mxu0 }
 0x226   : > { %3390 = vst [vmem:[%s5559_s12 + $0x80] sm:$0xff] %v3969_v62  ;;  %v2836_v0 = vpop.f32.mrb[20].mxu1  ;;  %v2784_v1 = vadd.f32 %v2783_v63, %v5540_v59  ;;  %v2785_v4 = vpop.f32.mrb[21].mxu0 }
 0x227   : > { %v2837_v3 = vadd.f32 %v2836_v0, %v5540_v59  ;;  %v2838_v5 = vpop.f32.mrb[21].mxu1  ;;  %v2786_v6 = vadd.f32 %v2785_v4, %v5540_v59  ;;  %v2787_v9 = vpop.f32.mrb[22].mxu0 }
 0x228   : > { %v2839_v8 = vadd.f32 %v2838_v5, %v5540_v59  ;;  %v2840_v2 = vpop.f32.mrb[22].mxu1  ;;  %v2788_v12 = vadd.f32 %v2787_v9, %v5565_v27  ;;  %v2789_v11 = vpop.f32.mrb[23].mxu0 }
 0x229   : > { %v2841_v10 = vadd.f32 %v2840_v2, %v5565_v27  ;;  %v2842_v13 = vpop.f32.mrb[23].mxu1  ;;  %v3979_v14 = vpack.c.bf16 %v2786_v6, %v2784_v1  ;;  %v2790_v16 = vadd.f32 %v2789_v11, %v5565_v27 }
 0x22a   : > { %v3980_v15 = vpack.c.bf16 %v2839_v8, %v2837_v3  ;;  %v2843_v17 = vadd.f32 %v2842_v13, %v5565_v27 }
 0x22b   : > { %3400 = vst [vmem:[%s5559_s12 + $0xd0] sm:$0xff] %v3979_v14  ;;  %v3990_v22 = vpack.c.bf16 %v2790_v16, %v2788_v12 }
 0x22c   : > { %3401 = vst [vmem:[%s5559_s12 + $0xd8] sm:$0xff] %v3980_v15  ;;  %v3991_v18 = vpack.c.bf16 %v2843_v17, %v2841_v10 }
 0x22d   : > { %3411 = vst [vmem:[%s5559_s12 + $0x128] sm:$0xff] %v3990_v22 }
 0x22e   : > { %3412 = vst [vmem:[%s5559_s12 + $0x130] sm:$0xff] %v3991_v18 }
 0x251   : > { %v2879_v19 = vpop.f32.mrb[24].mxu0 }
 0x252   : > { %v2932_v20 = vpop.f32.mrb[24].mxu1  ;;  %v2880_v21 = vadd.f32 %v2879_v19, %v5526_v53  ;;  %v2881_v33 = vpop.f32.mrb[25].mxu0 }
 0x253   : > { %v2933_v23 = vadd.f32 %v2932_v20, %v5526_v53  ;;  %v2934_v25 = vpop.f32.mrb[25].mxu1  ;;  %v2882_v26 = vadd.f32 %v2881_v33, %v5526_v53  ;;  %v2883_v29 = vpop.f32.mrb[26].mxu0 }
 0x254   : > { %v2935_v28 = vadd.f32 %v2934_v25, %v5526_v53  ;;  %v2936_v31 = vpop.f32.mrb[26].mxu1  ;;  %v2884_v32 = vadd.f32 %v2883_v29, %v5537_v57  ;;  %v2885_v35 = vpop.f32.mrb[27].mxu0 }
 0x255   : > { %v2937_v34 = vadd.f32 %v2936_v31, %v5537_v57  ;;  %v2938_v24 = vpop.f32.mrb[27].mxu1  ;;  %v3959_v7 = vpack.c.bf16 %v2882_v26, %v2880_v21  ;;  %v2886_v37 = vadd.f32 %v2885_v35, %v5537_v57 }
 0x256   : > { %v3960_v36 = vpack.c.bf16 %v2935_v28, %v2933_v23  ;;  %v2939_v38 = vadd.f32 %v2938_v24, %v5537_v57 }
 0x257   : > { %3380 = vst [vmem:[%s5559_s12 + $0x30] sm:$0xff] %v3959_v7  ;;  %v3970_v39 = vpack.c.bf16 %v2886_v37, %v2884_v32 }
 0x258   : > { %3381 = vst [vmem:[%s5559_s12 + $0x38] sm:$0xff] %v3960_v36  ;;  %v3971_v40 = vpack.c.bf16 %v2939_v38, %v2937_v34 }
 0x259   : > { %3391 = vst [vmem:[%s5559_s12 + $0x88] sm:$0xff] %v3970_v39  ;;  %v2889_v41 = vpop.f32.mrb[28].mxu0 }
 0x25a   : > { %3392 = vst [vmem:[%s5559_s12 + $0x90] sm:$0xff] %v3971_v40  ;;  %v2942_v30 = vpop.f32.mrb[28].mxu1  ;;  %v2890_v42 = vadd.f32 %v2889_v41, %v5540_v59  ;;  %v2891_v44 = vpop.f32.mrb[29].mxu0 }
 0x25b   : > { %v2943_v43 = vadd.f32 %v2942_v30, %v5540_v59  ;;  %v2944_v45 = vpop.f32.mrb[29].mxu1  ;;  %v2892_v46 = vadd.f32 %v2891_v44, %v5540_v59  ;;  %v2893_v48 = vpop.f32.mrb[30].mxu0 }
 0x25c   : > { %v2945_v47 = vadd.f32 %v2944_v45, %v5540_v59  ;;  %v2946_v49 = vpop.f32.mrb[30].mxu1  ;;  %v2894_v50 = vadd.f32 %v2893_v48, %v5565_v27  ;;  %v2895_v52 = vpop.f32.mrb[31].mxu0 }
 0x25d   : > { %v2947_v51 = vadd.f32 %v2946_v49, %v5565_v27  ;;  %v2948_v54 = vpop.f32.mrb[31].mxu1  ;;  %v3981_v55 = vpack.c.bf16 %v2892_v46, %v2890_v42  ;;  %v2896_v58 = vadd.f32 %v2895_v52, %v5565_v27 }
 0x25e   : > { %v3982_v56 = vpack.c.bf16 %v2945_v47, %v2943_v43  ;;  %v2949_v60 = vadd.f32 %v2948_v54, %v5565_v27 }
 0x25f   : > { %3402 = vst [vmem:[%s5559_s12 + $0xe0] sm:$0xff] %v3981_v55  ;;  %v3992_v61 = vpack.c.bf16 %v2896_v58, %v2894_v50 }
 0x260   : > { %3403 = vst [vmem:[%s5559_s12 + $0xe8] sm:$0xff] %v3982_v56  ;;  %v3993_v62 = vpack.c.bf16 %v2949_v60, %v2947_v51 }
 0x261   : > { %3413 = vst [vmem:[%s5559_s12 + $0x138] sm:$0xff] %v3992_v61 }
 0x262   : > { %3414 = vst [vmem:[%s5559_s12 + $0x140] sm:$0xff] %v3993_v62  ;;  %v3446_v62 = vld [vmem:[%s5559_s12 + $0x18] sm:$0xff] (%p4568_p5) }
 0x263   : > { %3447 = vst [vmem:[%s5725_s5 + $0x18] sm:$0xff] (%p4568_p5), %v3446_v62 }
 0x285   : > { %v2985_v63 = vpop.f32.mrb[32].mxu0 }
 0x286   : > { %v3038_v0 = vpop.f32.mrb[32].mxu1  ;;  %v2986_v1 = vadd.f32 %v2985_v63, %v5526_v53  ;;  %v2987_v4 = vpop.f32.mrb[33].mxu0  ;;  %v3448_v63 = vld [vmem:[%s5559_s12 + $0x20] sm:$0xff] (%p4568_p5) }
 0x287   : > { %v3039_v3 = vadd.f32 %v3038_v0, %v5526_v53  ;;  %v3040_v5 = vpop.f32.mrb[33].mxu1  ;;  %v2988_v6 = vadd.f32 %v2987_v4, %v5526_v53  ;;  %v2989_v9 = vpop.f32.mrb[34].mxu0  ;;  %v3450_v0 = vld [vmem:[%s5559_s12 + $0x28] sm:$0xff] (%p4568_p5)  ;;  %3449 = vst [vmem:[%s5725_s5 + $0x20] sm:$0xff] (%p4568_p5), %v3448_v63 }
 0x288   : > { %v3041_v8 = vadd.f32 %v3040_v5, %v5526_v53  ;;  %v3042_v2 = vpop.f32.mrb[34].mxu1  ;;  %v2990_v12 = vadd.f32 %v2989_v9, %v5537_v57  ;;  %v2991_v11 = vpop.f32.mrb[35].mxu0  ;;  %3451 = vst [vmem:[%s5725_s5 + $0x28] sm:$0xff] (%p4568_p5), %v3450_v0  ;;  %v3464_v9 = vld [vmem:[%s5559_s12 + $0x60] sm:$0xff] (%p4568_p5) }
 0x289   : > { %v3043_v10 = vadd.f32 %v3042_v2, %v5537_v57  ;;  %v3044_v13 = vpop.f32.mrb[35].mxu1  ;;  %v3961_v14 = vpack.c.bf16 %v2988_v6, %v2986_v1  ;;  %v2992_v16 = vadd.f32 %v2991_v11, %v5537_v57  ;;  %v3452_v1 = vld [vmem:[%s5559_s12 + $0x30] sm:$0xff] (%p4568_p5)  ;;  %v3466_v2 = vld [vmem:[%s5559_s12 + $0x68] sm:$0xff] (%p4568_p5)  ;;  %3465 = vst [vmem:[%s5725_s5 + $0x168] sm:$0xff] (%p4568_p5), %v3464_v9  ;;  %v3472_v11 = vld [vmem:[%s5559_s12 + $0x80] sm:$0xff] (%p4568_p5) }
 0x28a   : > { %v3962_v15 = vpack.c.bf16 %v3041_v8, %v3039_v3  ;;  %v3045_v17 = vadd.f32 %v3044_v13, %v5537_v57  ;;  %v3454_v3 = vld [vmem:[%s5559_s12 + $0x38] sm:$0xff] (%p4568_p5)  ;;  %3453 = vst [vmem:[%s5725_s5 + $0x30] sm:$0xff] (%p4568_p5), %v3452_v1  ;;  %3467 = vst [vmem:[%s5725_s5 + $0x170] sm:$0xff] (%p4568_p5), %v3466_v2  ;;  %v3474_v13 = vld [vmem:[%s5559_s12 + $0x88] sm:$0xff] (%p4568_p5) }
 0x28b   : > { %3382 = vst [vmem:[%s5559_s12 + $0x40] sm:$0xff] %v3961_v14  ;;  %v3972_v22 = vpack.c.bf16 %v2992_v16, %v2990_v12  ;;  %3455 = vst [vmem:[%s5725_s5 + $0x38] sm:$0xff] (%p4568_p5), %v3454_v3  ;;  %v3462_v8 = vld [vmem:[%s5559_s12 + $0x58] sm:$0xff] (%p4568_p5)  ;;  %v3468_v12 = vld [vmem:[%s5559_s12 + $0x70] sm:$0xff] (%p4568_p5) }
 0x28c   : > { %3383 = vst [vmem:[%s5559_s12 + $0x48] sm:$0xff] %v3962_v15  ;;  %v3973_v18 = vpack.c.bf16 %v3045_v17, %v3043_v10  ;;  %3463 = vst [vmem:[%s5725_s5 + $0x160] sm:$0xff] (%p4568_p5), %v3462_v8  ;;  %v3470_v10 = vld [vmem:[%s5559_s12 + $0x78] sm:$0xff] (%p4568_p5)  ;;  %v3476_v14 = vld [vmem:[%s5559_s12 + $0x90] sm:$0xff] (%p4568_p5) }
 0x28d   : > { %3393 = vst [vmem:[%s5559_s12 + $0x98] sm:$0xff] %v3972_v22  ;;  %v2995_v19 = vpop.f32.mrb[36].mxu0  ;;  %3469 = vst [vmem:[%s5725_s5 + $0x178] sm:$0xff] (%p4568_p5), %v3468_v12  ;;  %v3484_v22 = vld [vmem:[%s5559_s12 + $0xb0] sm:$0xff] (%p4568_p5) }
 0x28e   : > { %3394 = vst [vmem:[%s5559_s12 + $0xa0] sm:$0xff] %v3973_v18  ;;  %v3048_v20 = vpop.f32.mrb[36].mxu1  ;;  %v2996_v21 = vadd.f32 %v2995_v19, %v5540_v59  ;;  %v2997_v33 = vpop.f32.mrb[37].mxu0  ;;  %3471 = vst [vmem:[%s5725_s5 + $0x180] sm:$0xff] (%p4568_p5), %v3470_v10  ;;  %v3486_v18 = vld [vmem:[%s5559_s12 + $0xb8] sm:$0xff] (%p4568_p5)  ;;  %v3488_v19 = vld [vmem:[%s5559_s12 + $0xc0] sm:$0xff] (%p4568_p5) }
 0x28f   : > { %v3049_v23 = vadd.f32 %v3048_v20, %v5540_v59  ;;  %v3050_v25 = vpop.f32.mrb[37].mxu1  ;;  %v2998_v26 = vadd.f32 %v2997_v33, %v5540_v59  ;;  %v2999_v29 = vpop.f32.mrb[38].mxu0  ;;  %3473 = vst [vmem:[%s5725_s5 + $0x188] sm:$0xff] (%p4568_p5), %v3472_v11  ;;  %3475 = vst [vmem:[%s5725_s5 + $0x190] sm:$0xff] (%p4568_p5), %v3474_v13  ;;  %v3490_v20 = vld [vmem:[%s5559_s12 + $0xc8] sm:$0xff] (%p4568_p5)  ;;  %v3496_v33 = vld [vmem:[%s5559_s12 + $0xe0] sm:$0xff] (%p4568_p5) }
 0x290   : > { %v3051_v28 = vadd.f32 %v3050_v25, %v5540_v59  ;;  %v3052_v31 = vpop.f32.mrb[38].mxu1  ;;  %v3000_v32 = vadd.f32 %v2999_v29, %v5565_v27  ;;  %v3001_v35 = vpop.f32.mrb[39].mxu0  ;;  %3477 = vst [vmem:[%s5725_s5 + $0x198] sm:$0xff] (%p4568_p5), %v3476_v14  ;;  %3485 = vst [vmem:[%s5725_s5 + $0x2c0] sm:$0xff] (%p4568_p5), %v3484_v22  ;;  %v3498_v25 = vld [vmem:[%s5559_s12 + $0xe8] sm:$0xff] (%p4568_p5) }
 0x291   : > { %v3053_v34 = vadd.f32 %v3052_v31, %v5565_v27  ;;  %v3054_v24 = vpop.f32.mrb[39].mxu1  ;;  %v3983_v7 = vpack.c.bf16 %v2998_v26, %v2996_v21  ;;  %v3002_v37 = vadd.f32 %v3001_v35, %v5565_v27  ;;  %3487 = vst [vmem:[%s5725_s5 + $0x2c8] sm:$0xff] (%p4568_p5), %v3486_v18  ;;  %v3492_v21 = vld [vmem:[%s5559_s12 + $0xd0] sm:$0xff] (%p4568_p5)  ;;  %3489 = vst [vmem:[%s5725_s5 + $0x2d0] sm:$0xff] (%p4568_p5), %v3488_v19  ;;  %v3506_v31 = vld [vmem:[%s5559_s12 + $0x108] sm:$0xff] (%p4568_p5) }
 0x292   : > { %v3984_v36 = vpack.c.bf16 %v3051_v28, %v3049_v23  ;;  %v3055_v38 = vadd.f32 %v3054_v24, %v5565_v27  ;;  %v3456_v4 = vld [vmem:[%s5559_s12 + $0x40] sm:$0xff] (%p4568_p5)  ;;  %3491 = vst [vmem:[%s5725_s5 + $0x2d8] sm:$0xff] (%p4568_p5), %v3490_v20  ;;  %3493 = vst [vmem:[%s5725_s5 + $0x2e0] sm:$0xff] (%p4568_p5), %v3492_v21  ;;  %v3494_v23 = vld [vmem:[%s5559_s12 + $0xd8] sm:$0xff] (%p4568_p5) }
 0x293   : > { %3404 = vst [vmem:[%s5559_s12 + $0xf0] sm:$0xff] %v3983_v7  ;;  %v3994_v39 = vpack.c.bf16 %v3002_v37, %v3000_v32  ;;  %3457 = vst [vmem:[%s5725_s5 + $0x40] sm:$0xff] (%p4568_p5), %v3456_v4  ;;  %v3458_v5 = vld [vmem:[%s5559_s12 + $0x48] sm:$0xff] (%p4568_p5)  ;;  %v3508_v32 = vld [vmem:[%s5559_s12 + $0x110] sm:$0xff] (%p4568_p5) }
 0x294   : > { %3405 = vst [vmem:[%s5559_s12 + $0xf8] sm:$0xff] %v3984_v36  ;;  %v3995_v40 = vpack.c.bf16 %v3055_v38, %v3053_v34  ;;  %3459 = vst [vmem:[%s5725_s5 + $0x48] sm:$0xff] (%p4568_p5), %v3458_v5  ;;  %v3478_v15 = vld [vmem:[%s5559_s12 + $0x98] sm:$0xff] (%p4568_p5)  ;;  %v3512_v35 = vld [vmem:[%s5559_s12 + $0x120] sm:$0xff] (%p4568_p5) }
 0x295   : > { %3415 = vst [vmem:[%s5559_s12 + $0x148] sm:$0xff] %v3994_v39  ;;  %v3480_v16 = vld [vmem:[%s5559_s12 + $0xa0] sm:$0xff] (%p4568_p5)  ;;  %3479 = vst [vmem:[%s5725_s5 + $0x1a0] sm:$0xff] (%p4568_p5), %v3478_v15  ;;  %v3510_v34 = vld [vmem:[%s5559_s12 + $0x118] sm:$0xff] (%p4568_p5) }
 0x296   : > { %3416 = vst [vmem:[%s5559_s12 + $0x150] sm:$0xff] %v3995_v40  ;;  %3481 = vst [vmem:[%s5725_s5 + $0x1a8] sm:$0xff] (%p4568_p5), %v3480_v16  ;;  %v3514_v24 = vld [vmem:[%s5559_s12 + $0x128] sm:$0xff] (%p4568_p5)  ;;  %v3516_v7 = vld [vmem:[%s5559_s12 + $0x130] sm:$0xff] (%p4568_p5) }
 0x297   : > { %3495 = vst [vmem:[%s5725_s5 + $0x2e8] sm:$0xff] (%p4568_p5), %v3494_v23  ;;  %3497 = vst [vmem:[%s5725_s5 + $0x2f0] sm:$0xff] (%p4568_p5), %v3496_v33  ;;  %v3518_v36 = vld [vmem:[%s5559_s12 + $0x138] sm:$0xff] (%p4568_p5)  ;;  %v3520_v37 = vld [vmem:[%s5559_s12 + $0x140] sm:$0xff] (%p4568_p5) }
 0x298   : > { %3499 = vst [vmem:[%s5725_s5 + $0x2f8] sm:$0xff] (%p4568_p5), %v3498_v25  ;;  %3507 = vst [vmem:[%s5725_s5 + $0x420] sm:$0xff] (%p4568_p5), %v3506_v31 }
 0x299   : > { %3509 = vst [vmem:[%s5725_s5 + $0x428] sm:$0xff] (%p4568_p5), %v3508_v32  ;;  %3511 = vst [vmem:[%s5725_s5 + $0x430] sm:$0xff] (%p4568_p5), %v3510_v34 }
 0x29a   : > { %v3500_v26 = vld [vmem:[%s5559_s12 + $0xf0] sm:$0xff] (%p4568_p5)  ;;  %3513 = vst [vmem:[%s5725_s5 + $0x438] sm:$0xff] (%p4568_p5), %v3512_v35  ;;  %3515 = vst [vmem:[%s5725_s5 + $0x440] sm:$0xff] (%p4568_p5), %v3514_v24 }
 0x29b   : > { %v3502_v28 = vld [vmem:[%s5559_s12 + $0xf8] sm:$0xff] (%p4568_p5)  ;;  %3501 = vst [vmem:[%s5725_s5 + $0x300] sm:$0xff] (%p4568_p5), %v3500_v26  ;;  %3517 = vst [vmem:[%s5725_s5 + $0x448] sm:$0xff] (%p4568_p5), %v3516_v7 }
 0x29c   : > { %3503 = vst [vmem:[%s5725_s5 + $0x308] sm:$0xff] (%p4568_p5), %v3502_v28  ;;  %v3522_v38 = vld [vmem:[%s5559_s12 + $0x148] sm:$0xff] (%p4568_p5)  ;;  %3519 = vst [vmem:[%s5725_s5 + $0x450] sm:$0xff] (%p4568_p5), %v3518_v36 }
 0x29d   : > { %3521 = vst [vmem:[%s5725_s5 + $0x458] sm:$0xff] (%p4568_p5), %v3520_v37  ;;  %3523 = vst [vmem:[%s5725_s5 + $0x460] sm:$0xff] (%p4568_p5), %v3522_v38  ;;  %v3524_v39 = vld [vmem:[%s5559_s12 + $0x150] sm:$0xff] (%p4568_p5) }
 0x29e   : > { %3525 = vst [vmem:[%s5725_s5 + $0x468] sm:$0xff] (%p4568_p5), %v3524_v39 }
 0x2b9   : > { %v3091_v41 = vpop.f32.mrb[40].mxu0 }
 0x2ba   : > { %v3101_v30 = vpop.f32.mrb[40].mxu1  ;;  %v3092_v42 = vadd.f32 %v3091_v41, %v5526_v53  ;;  %v3093_v44 = vpop.f32.mrb[41].mxu0 }
 0x2bb   : > { %v3102_v43 = vadd.f32 %v3101_v30, %v5540_v59  ;;  %v3103_v45 = vpop.f32.mrb[41].mxu1  ;;  %v3094_v46 = vadd.f32 %v3093_v44, %v5526_v53  ;;  %v3095_v48 = vpop.f32.mrb[42].mxu0 }
 0x2bc   : > { %v3104_v47 = vadd.f32 %v3103_v45, %v5540_v59  ;;  %v3105_v49 = vpop.f32.mrb[42].mxu1  ;;  %v3096_v50 = vadd.f32 %v3095_v48, %v5537_v57  ;;  %v3097_v52 = vpop.f32.mrb[43].mxu0  ;;  %3424 = sbr.rel (!%p4568_p5) target bundleno = 715 (0x2cb), region = 59  ;;  %v3442_v59 = vld [vmem:[%s5559_s12 + $0x8] sm:$0xff] (%p4568_p5) }
 0x2bd   : > { %v3106_v51 = vadd.f32 %v3105_v49, %v5565_v27  ;;  %v3107_v54 = vpop.f32.mrb[43].mxu1  ;;  %v3963_v55 = vpack.c.bf16 %v3094_v46, %v3092_v42  ;;  %v3098_v58 = vadd.f32 %v3097_v52, %v5537_v57  ;;  %v3440_v57 = vld [vmem:[%s5559_s12] sm:$0xff] (%p4568_p5)  ;;  %3443 = vst [vmem:[%s5725_s5 + $0x8] sm:$0xff] (%p4568_p5), %v3442_v59 }
 0x2be   : > { %v3985_v56 = vpack.c.bf16 %v3104_v47, %v3102_v43  ;;  %v3108_v60 = vadd.f32 %v3107_v54, %v5565_v27  ;;  %v3444_v27 = vld [vmem:[%s5559_s12 + $0x10] sm:$0xff] (%p4568_p5)  ;;  %3441 = vst [vmem:[%s5725_s5] sm:$0xff] (%p4568_p5), %v3440_v57 }
 0x2bf   : > { %3384 = vst [vmem:[%s5559_s12 + $0x50] sm:$0xff] %v3963_v55  ;;  %v3974_v53 = vpack.c.bf16 %v3098_v58, %v3096_v50  ;;  %3445 = vst [vmem:[%s5725_s5 + $0x10] sm:$0xff] (%p4568_p5), %v3444_v27 }
 0x2c0   : > { %3406 = vst [vmem:[%s5559_s12 + $0x100] sm:$0xff] %v3985_v56  ;;  %v3996_v61 = vpack.c.bf16 %v3108_v60, %v3106_v51 }
 0x2c1   : > { %3395 = vst [vmem:[%s5559_s12 + $0xa8] sm:$0xff] %v3974_v53 }
 0x2c2   : > { %3417 = vst [vmem:[%s5559_s12 + $0x158] sm:$0xff] %v3996_v61 }
 0x2c6   : > { %v3460_v6 = vld [vmem:[%s5559_s12 + $0x50] sm:$0xff] }
 0x2c7   : > { %3461 = vst [vmem:[%s5725_s5 + $0x50] sm:$0xff] %v3460_v6  ;;  %v3504_v29 = vld [vmem:[%s5559_s12 + $0x100] sm:$0xff] }
 0x2c8   : > { %v3482_v17 = vld [vmem:[%s5559_s12 + $0xa8] sm:$0xff]  ;;  %3505 = vst [vmem:[%s5725_s5 + $0x310] sm:$0xff] %v3504_v29 }
 0x2c9   : > { %3483 = vst [vmem:[%s5725_s5 + $0x1b0] sm:$0xff] %v3482_v17  ;;  %v3526_v40 = vld [vmem:[%s5559_s12 + $0x158] sm:$0xff] }
 0x2ca   : > { %3527 = vst [vmem:[%s5725_s5 + $0x470] sm:$0xff] %v3526_v40 }
 0x2cb PF: > { %p10_p10 = scmp.ge.s32.totalorder %s4555_s16, 6   ;;  %s5824_s12 = smov %s4511_s13 }
 0x2cc   : > { %s5825_s13 = smov %s4566_s19  ;;  %s5826_s14 = smov %s4555_s16 }
 0x2cd   :  { %12 = sbr.rel (!%p10_p10) target bundleno = 2 (0x2), region = 113 }

// kernel: forward.4
= control target key start
LH: loop header
LB: loop body
LE: loop exit
PB: predicated region body
PF: predicated region fallthrough
CT: control target
= control target key end

     0   :  { %s1196_s12 = smov 0   ;;  %s1198_s13 = smov 0   ;;  %s1434_s0 = inlined_call_operand.vmem [shape: bf16[288,512], index: 0, kind: input, shape index: {}]   ;;  %s1435_s1 = inlined_call_operand.vmem [shape: bf16[64,288], index: 1, kind: input, shape index: {}]   ;;  %s1436_s2 = inlined_call_operand.vmem [shape: f32[64,1], index: 2, kind: input, shape index: {}]   ;;  %s1437_s3 = inlined_call_operand.vmem [shape: bf16[64,512], index: 3, kind: output, shape index: {}]  }
   0x1   :  { %s1200_s14 = smov 0  }
   0x2 LB: > { %s930_s15 = sadd.s32 4294967295, %s1173_s14   ;;  %s1213_s16 = sadd.s32 1, %s1173_s14   ;;  %s1173_s14 = sphi %s1200_s14, %s1441_s14   ;;  %s1169_s13 = sphi %s1198_s13, %s1440_s13   ;;  %s1165_s12 = sphi %s1196_s12, %s1439_s12  }
   0x3   : > { %s17_s17 = ssub.s32 %s1173_s14, %s1213_s16  ;;  %s20_s18 = sadd.s32 1, %s1169_s13 }
   0x4   : > { %p18_p0 = scmp.eq.s32.totalorder %s17_s17, 0  ;;  %p27_p1 = scmp.ne.s32.totalorder %s1169_s13, %s1165_s12 }
   0x5   : > { %p28_p2 = scmp.eq.s32.totalorder %s1173_s14, 0  ;;  %p99_p3 = scmp.eq.s32.totalorder %s930_s15, 3 }
   0x6   : > { %s1224_s19 = scalar_select %p18_p0, %s1169_s13, %s20_s18  }
   0x7   : > { %p29_p4 = por %p28_p2, %p27_p1  ;;  %p1226_p5 = por %p99_p3, %p27_p1 }
   0x8   : > { %p933_p6 = scmp.ge.s32.totalorder %s1173_s14, 4 }
   0xa   : > { %127 = sbr.rel (%p933_p6) target bundleno = 45 (0x2d), region = 24 }
  0x11   : > { %130 = sbr.rel (!%p29_p4) target bundleno = 45 (0x2d), region = 28  ;;  %s132_s21 = sand.u32 (%p29_p4), 1, %s1169_s13  }
  0x12   : > { %s934_s22 = sshll.u32 (%p29_p4), %s1173_s14, 2  ;;  %s1088_s23 = smul.u32 (%p29_p4), 144, %s132_s21 }
  0x13   : > { %s1236_s26 = scalar_lea.vmem (%p29_p4), %s1434_s0, %s934_s22 }
  0x14   : > { %v152_v0 = vld [vmem:[%s1236_s26] sm:$0xf] (%p29_p4)  ;;  %v154_v1 = vld [vmem:[%s1236_s26 + $0x10] sm:$0xf] (%p29_p4)  ;;  %s1243_s27 = scalar_lea.vmem (%p29_p4), [#allocation2], %s1088_s23 }
  0x15   : > { %v156_v2 = vld [vmem:[%s1236_s26 + $0x20] sm:$0xf] (%p29_p4)  ;;  %v158_v3 = vld [vmem:[%s1236_s26 + $0x30] sm:$0xf] (%p29_p4)  ;;  %153 = vst [vmem:[%s1243_s27] sm:$0xf] (%p29_p4), %v152_v0 }
  0x16   : > { %v160_v4 = vld [vmem:[%s1236_s26 + $0x40] sm:$0xf] (%p29_p4)  ;;  %155 = vst [vmem:[%s1243_s27 + $0x4] sm:$0xf] (%p29_p4), %v154_v1  ;;  %157 = vst [vmem:[%s1243_s27 + $0x8] sm:$0xf] (%p29_p4), %v156_v2 }
  0x17   : > { %159 = vst [vmem:[%s1243_s27 + $0xc] sm:$0xf] (%p29_p4), %v158_v3  ;;  %161 = vst [vmem:[%s1243_s27 + $0x10] sm:$0xf] (%p29_p4), %v160_v4  ;;  %v162_v5 = vld [vmem:[%s1236_s26 + $0x50] sm:$0xf] (%p29_p4) }
  0x18   : > { %v164_v6 = vld [vmem:[%s1236_s26 + $0x60] sm:$0xf]  ;;  %v166_v7 = vld [vmem:[%s1236_s26 + $0x70] sm:$0xf]  ;;  %163 = vst [vmem:[%s1243_s27 + $0x14] sm:$0xf] %v162_v5 }
  0x19   : > { %165 = vst [vmem:[%s1243_s27 + $0x18] sm:$0xf] %v164_v6  ;;  %167 = vst [vmem:[%s1243_s27 + $0x1c] sm:$0xf] %v166_v7  ;;  %v168_v8 = vld [vmem:[%s1236_s26 + $0x80] sm:$0xf] }
  0x1a   : > { %v170_v9 = vld [vmem:[%s1236_s26 + $0x90] sm:$0xf]  ;;  %v172_v10 = vld [vmem:[%s1236_s26 + $0xa0] sm:$0xf]  ;;  %169 = vst [vmem:[%s1243_s27 + $0x20] sm:$0xf] %v168_v8 }
  0x1b   : > { %171 = vst [vmem:[%s1243_s27 + $0x24] sm:$0xf] %v170_v9  ;;  %173 = vst [vmem:[%s1243_s27 + $0x28] sm:$0xf] %v172_v10  ;;  %v174_v11 = vld [vmem:[%s1236_s26 + $0xb0] sm:$0xf] }
  0x1c   : > { %v176_v12 = vld [vmem:[%s1236_s26 + $0xc0] sm:$0xf]  ;;  %v178_v13 = vld [vmem:[%s1236_s26 + $0xd0] sm:$0xf]  ;;  %175 = vst [vmem:[%s1243_s27 + $0x2c] sm:$0xf] %v174_v11 }
  0x1d   : > { %177 = vst [vmem:[%s1243_s27 + $0x30] sm:$0xf] %v176_v12  ;;  %179 = vst [vmem:[%s1243_s27 + $0x34] sm:$0xf] %v178_v13  ;;  %v180_v14 = vld [vmem:[%s1236_s26 + $0xe0] sm:$0xf] }
  0x1e   : > { %v182_v15 = vld [vmem:[%s1236_s26 + $0xf0] sm:$0xf]  ;;  %v184_v16 = vld [vmem:[%s1236_s26 + $0x100] sm:$0xf]  ;;  %181 = vst [vmem:[%s1243_s27 + $0x38] sm:$0xf] %v180_v14 }
  0x1f   : > { %183 = vst [vmem:[%s1243_s27 + $0x3c] sm:$0xf] %v182_v15  ;;  %185 = vst [vmem:[%s1243_s27 + $0x40] sm:$0xf] %v184_v16  ;;  %v186_v17 = vld [vmem:[%s1236_s26 + $0x110] sm:$0xf] }
  0x20   : > { %v188_v18 = vld [vmem:[%s1236_s26 + $0x120] sm:$0xf]  ;;  %v190_v19 = vld [vmem:[%s1236_s26 + $0x130] sm:$0xf]  ;;  %187 = vst [vmem:[%s1243_s27 + $0x44] sm:$0xf] %v186_v17 }
  0x21   : > { %189 = vst [vmem:[%s1243_s27 + $0x48] sm:$0xf] %v188_v18  ;;  %191 = vst [vmem:[%s1243_s27 + $0x4c] sm:$0xf] %v190_v19  ;;  %v192_v20 = vld [vmem:[%s1236_s26 + $0x140] sm:$0xf] }
  0x22   : > { %v194_v21 = vld [vmem:[%s1236_s26 + $0x150] sm:$0xf]  ;;  %v196_v22 = vld [vmem:[%s1236_s26 + $0x160] sm:$0xf]  ;;  %193 = vst [vmem:[%s1243_s27 + $0x50] sm:$0xf] %v192_v20 }
  0x23   : > { %195 = vst [vmem:[%s1243_s27 + $0x54] sm:$0xf] %v194_v21  ;;  %197 = vst [vmem:[%s1243_s27 + $0x58] sm:$0xf] %v196_v22  ;;  %v198_v23 = vld [vmem:[%s1236_s26 + $0x170] sm:$0xf] }
  0x24   : > { %v200_v24 = vld [vmem:[%s1236_s26 + $0x180] sm:$0xf]  ;;  %v202_v25 = vld [vmem:[%s1236_s26 + $0x190] sm:$0xf]  ;;  %199 = vst [vmem:[%s1243_s27 + $0x5c] sm:$0xf] %v198_v23 }
  0x25   : > { %201 = vst [vmem:[%s1243_s27 + $0x60] sm:$0xf] %v200_v24  ;;  %203 = vst [vmem:[%s1243_s27 + $0x64] sm:$0xf] %v202_v25  ;;  %v204_v26 = vld [vmem:[%s1236_s26 + $0x1a0] sm:$0xf] }
  0x26   : > { %v206_v27 = vld [vmem:[%s1236_s26 + $0x1b0] sm:$0xf]  ;;  %v208_v28 = vld [vmem:[%s1236_s26 + $0x1c0] sm:$0xf]  ;;  %205 = vst [vmem:[%s1243_s27 + $0x68] sm:$0xf] %v204_v26 }
  0x27   : > { %207 = vst [vmem:[%s1243_s27 + $0x6c] sm:$0xf] %v206_v27  ;;  %209 = vst [vmem:[%s1243_s27 + $0x70] sm:$0xf] %v208_v28  ;;  %v210_v29 = vld [vmem:[%s1236_s26 + $0x1d0] sm:$0xf] }
  0x28   : > { %v212_v30 = vld [vmem:[%s1236_s26 + $0x1e0] sm:$0xf]  ;;  %v214_v31 = vld [vmem:[%s1236_s26 + $0x1f0] sm:$0xf]  ;;  %211 = vst [vmem:[%s1243_s27 + $0x74] sm:$0xf] %v210_v29 }
  0x29   : > { %213 = vst [vmem:[%s1243_s27 + $0x78] sm:$0xf] %v212_v30  ;;  %215 = vst [vmem:[%s1243_s27 + $0x7c] sm:$0xf] %v214_v31  ;;  %v216_v32 = vld [vmem:[%s1236_s26 + $0x200] sm:$0xf] }
  0x2a   : > { %v218_v33 = vld [vmem:[%s1236_s26 + $0x210] sm:$0xf]  ;;  %v220_v34 = vld [vmem:[%s1236_s26 + $0x220] sm:$0xf]  ;;  %217 = vst [vmem:[%s1243_s27 + $0x80] sm:$0xf] %v216_v32 }
  0x2b   : > { %219 = vst [vmem:[%s1243_s27 + $0x84] sm:$0xf] %v218_v33  ;;  %221 = vst [vmem:[%s1243_s27 + $0x88] sm:$0xf] %v220_v34  ;;  %v222_v35 = vld [vmem:[%s1236_s26 + $0x230] sm:$0xf] }
  0x2c   : > { %223 = vst [vmem:[%s1243_s27 + $0x8c] sm:$0xf] %v222_v35 }
  0x2d PF: > { %p935_p7 = scmp.ge.s32.totalorder %s1173_s14, 1  ;;  %p317_p8 = scmp.lt.s32.totalorder %s1173_s14, 5 }
  0x2f   : > { %p318_p9 = pnand %p935_p7, %p317_p8 }
  0x30   : > { %s324_s28 = sand.u32 (!%p318_p9), 1, %s1165_s12   ;;  %v1135_v36 = vld [vmem:[%s1435_s1 + $0x4] ss:$12 sps:$4 sm:$0xff] (!%p318_p9)   ;;  %v1138_v37 = vld [vmem:[%s1435_s1 + $0x4c] ss:$12 sps:$4 sm:$0xff] (!%p318_p9)   ;;  %v1175_v38 = vmov (!%p318_p9), 0  }
  0x31   : > { %321 = sbr.rel (%p318_p9) target bundleno = 334 (0x14e), region = 69  ;;  %1116 = vset.pattern.permute.xlu1 (!%p318_p9), %v1175_v38  ;;  %1115 = vset.pattern.permute.xlu0 (!%p318_p9), %v1175_v38  ;;  %v401_v53 = vld [vmem:[%s1436_s2 + $0x10] sm:$0xff] (!%p318_p9)  ;;  %v399_v54 = vld [vmem:[%s1436_s2] sm:$0xff] (!%p318_p9)  ;;  %v402_v56 = vld [vmem:[%s1436_s2 + $0x18] sm:$0xff] (!%p318_p9)  ;;  %vm615_vm0 = vcmask (!%p318_p9), 261120   ;;  %s936_s6 = sshll.u32 (!%p318_p9), %s324_s28, 5 }
  0x32   : > { %s1089_s29 = smul.u32 (!%p318_p9), 144, %s324_s28  ;;  %660 = vmatprep.mubr.bf16.mxu0 (!%p318_p9), %v1135_v36  ;;  %684 = vmatprep.mubr.bf16.mxu1 (!%p318_p9), %v1138_v37  ;;  %v400_v57 = vld [vmem:[%s1436_s2 + $0x8] sm:$0xff] (!%p318_p9)  ;;  %v403_v63 = vld [vmem:[%s1436_s2 + $0x20] sm:$0xff] (!%p318_p9)  ;;  %v406_v3 = vld [vmem:[%s1436_s2 + $0x38] sm:$0xff] (!%p318_p9)  ;;  %s1403_s8 = scalar_lea.vmem (!%p318_p9), [#allocation3], %s936_s6 }
  0x33   : > { %419 = vperm.xlu1 (!%p318_p9), %1116, %v401_v53   ;;  %409 = vperm.xlu0 (!%p318_p9), %1115, %v399_v54   ;;  %v1133_v60 = vld [vmem:[%s1435_s1] ss:$12 sps:$4 sm:$0xff] (!%p318_p9)   ;;  %v1136_v61 = vld [vmem:[%s1435_s1 + $0x48] ss:$12 sps:$4 sm:$0xff] (!%p318_p9)   ;;  %v1144_v5 = vld [vmem:[%s1435_s1 + $0x18] ss:$12 sps:$4 sm:$0xff] (!%p318_p9)  }
  0x34   : > { %s1323_s7 = scalar_lea.vmem (!%p318_p9), [#allocation2], %s1089_s29  ;;  %v404_v62 = vld [vmem:[%s1436_s2 + $0x28] sm:$0xff] (!%p318_p9)  ;;  %v405_v4 = vld [vmem:[%s1436_s2 + $0x30] sm:$0xff] (!%p318_p9)  ;;  %v1148_v8 = vld [vmem:[%s1435_s1 + $0x38] ss:$12 sps:$4 sm:$0xff] (!%p318_p9)  }
  0x35   : > { %v1117_v39 = vld [vmem:[%s1323_s7 + $0x40] sm:$0xff] (!%p318_p9)   ;;  %v1119_v41 = vld [vmem:[%s1323_s7 + $0x48] sm:$0xff] (!%p318_p9)   ;;  %v1121_v43 = vld [vmem:[%s1323_s7 + $0x50] sm:$0xff] (!%p318_p9)  }
  0x36   : > { %v1118_v40 = vld [vmem:[%s1323_s7] sm:$0xff] (!%p318_p9)   ;;  %1014 = vmatprep.subr.bf16.mxu0 (!%p318_p9), %v1117_v39  ;;  %1072 = vmatprep.subr.bf16.mxu1 (!%p318_p9), %v1117_v39  ;;  %v1120_v42 = vld [vmem:[%s1323_s7 + $0x8] sm:$0xff] (!%p318_p9)   ;;  %v1122_v44 = vld [vmem:[%s1323_s7 + $0x10] sm:$0xff] (!%p318_p9)  }
  0x37   : > { %1015 = vmatpush3.bf16.msra.mxu0 (!%p318_p9), %v1118_v40  ;;  %1080 = vmatpush3.bf16.msra.mxu1 (!%p318_p9), %v1118_v40  ;;  %v1123_v45 = vld [vmem:[%s1323_s7 + $0x58] sm:$0xff] (!%p318_p9)   ;;  %v1125_v47 = vld [vmem:[%s1323_s7 + $0x60] sm:$0xff] (!%p318_p9)   ;;  %v1127_v49 = vld [vmem:[%s1323_s7 + $0x68] sm:$0xff] (!%p318_p9)  }
  0x38   : > { %1016 = vmatprep.subr.bf16.mxu0 %v1119_v41  ;;  %1073 = vmatprep.subr.bf16.mxu1 %v1119_v41  ;;  %v1124_v46 = vld [vmem:[%s1323_s7 + $0x18] sm:$0xff]   ;;  %v1126_v48 = vld [vmem:[%s1323_s7 + $0x20] sm:$0xff]   ;;  %v1128_v50 = vld [vmem:[%s1323_s7 + $0x28] sm:$0xff]   ;;  %s980_s12 = sshll.u32 (%p1226_p5), %s930_s15, 2 }
  0x39   : > { %v1129_v51 = vld [vmem:[%s1323_s7 + $0x70] sm:$0xff]   ;;  %v1131_v55 = vld [vmem:[%s1323_s7 + $0x78] sm:$0xff]   ;;  %v1139_v59 = vld [vmem:[%s1323_s7 + $0x80] sm:$0xff]   ;;  %424 = vperm.xlu1 %1116, %v402_v56   ;;  %414 = vperm.xlu0 %1115, %v400_v57   ;;  %s806_s10 = scalar_lea.vmem (%p1226_p5), %s1437_s3, %s980_s12 }
  0x3a   : > { %v1130_v52 = vld [vmem:[%s1323_s7 + $0x30] sm:$0xff]   ;;  %v1132_v58 = vld [vmem:[%s1323_s7 + $0x38] sm:$0xff]   ;;  %v1140_v1 = vld [vmem:[%s1323_s7 + $0x88] sm:$0xff]  }
  0x3b   : > { %1017 = vmatpush3.bf16.msra.mxu0 %v1120_v42  ;;  %1081 = vmatpush3.bf16.msra.mxu1 %v1120_v42  ;;  %v1141_v0 = vld [vmem:[%s1435_s1 + $0x1c] ss:$12 sps:$4 sm:$0xff]   ;;  %v1145_v6 = vld [vmem:[%s1435_s1 + $0x20] ss:$12 sps:$4 sm:$0xff]  }
  0x3c   : > { %1018 = vmatprep.subr.bf16.mxu0 %v1121_v43  ;;  %1074 = vmatprep.subr.bf16.mxu1 %v1121_v43  ;;  %v1143_v2 = vld [vmem:[%s1435_s1 + $0x8] ss:$12 sps:$4 sm:$0xff]   ;;  %v1149_v9 = vld [vmem:[%s1435_s1 + $0x30] ss:$12 sps:$4 sm:$0xff]  }
  0x3d   : > { %434 = vperm.xlu1 %1116, %v404_v62   ;;  %429 = vperm.xlu0 %1115, %v403_v63   ;;  %v1146_v7 = vld [vmem:[%s1435_s1 + $0x34] ss:$12 sps:$4 sm:$0xff]   ;;  %v1150_v10 = vld [vmem:[%s1435_s1 + $0x50] ss:$12 sps:$4 sm:$0xff]  }
  0x3f   : > { %1019 = vmatpush3.bf16.msra.mxu0 %v1122_v44  ;;  %1082 = vmatpush3.bf16.msra.mxu1 %v1122_v44 }
  0x40   : > { %1020 = vmatprep.subr.bf16.mxu0 %v1123_v45  ;;  %1075 = vmatprep.subr.bf16.mxu1 %v1123_v45 }
  0x41   : > { %444 = vperm.xlu1 %1116, %v406_v3   ;;  %439 = vperm.xlu0 %1115, %v405_v4  }
  0x43   : > { %1021 = vmatpush3.bf16.msra.mxu0 %v1124_v46  ;;  %1083 = vmatpush3.bf16.msra.mxu1 %v1124_v46 }
  0x44   : > { %1022 = vmatprep.subr.bf16.mxu0 %v1125_v47  ;;  %1076 = vmatprep.subr.bf16.mxu1 %v1125_v47 }
  0x47   : > { %1023 = vmatpush3.bf16.msra.mxu0 %v1126_v48  ;;  %1084 = vmatpush3.bf16.msra.mxu1 %v1126_v48 }
  0x48   : > { %1024 = vmatprep.subr.bf16.mxu0 %v1127_v49  ;;  %1077 = vmatprep.subr.bf16.mxu1 %v1127_v49 }
  0x4b   : > { %1025 = vmatpush3.bf16.msra.mxu0 %v1128_v50  ;;  %1085 = vmatpush3.bf16.msra.mxu1 %v1128_v50 }
  0x4c   : > { %1026 = vmatprep.subr.bf16.mxu0 %v1129_v51  ;;  %1078 = vmatprep.subr.bf16.mxu1 %v1129_v51 }
  0x4f   : > { %1027 = vmatpush3.bf16.msra.mxu0 %v1130_v52  ;;  %1086 = vmatpush3.bf16.msra.mxu1 %v1130_v52 }
  0x50   : > { %1028 = vmatprep.subr.bf16.mxu0 %v1131_v55  ;;  %1079 = vmatprep.subr.bf16.mxu1 %v1131_v55 }
  0x53   : > { %1029 = vmatpush3.bf16.msra.mxu0 %v1132_v58  ;;  %1087 = vmatpush3.bf16.msra.mxu1 %v1132_v58 }
  0x54   : > { %1060 = vmatprep.subr.bf16.mxu1 %v1139_v59 }
  0x56   : > { %661 = vmatmul.mubr.bf16.vlgmr.msra.gmra.mrb[0].mxu0 %v1133_v60  ;;  %685 = vmatmul.mubr.bf16.vlgmr.msra.gmra.mrb[0].mxu1 %v1136_v61 }
  0x57   : > { %1061 = vmatpush3.bf16.msra.mxu1 %v1139_v59  ;;  %668 = vmatprep.mubr.bf16.mxu0 %v1141_v0 }
  0x58   : > { %1062 = vmatprep.subr.bf16.mxu1 %v1140_v1  ;;  %1064 = vmatprep.mubr.msk.bf16.mxu1 %vm615_vm0, %v1143_v2 }
  0x5b   : > { %1063 = vmatpush3.bf16.msra.mxu1 %v1140_v1 }
  0x5e   : > { %669 = vmatmul.mubr.bf16.gmra.mrb[4].mxu0 %v1144_v5  ;;  %1065 = vmatmul.mubr.msk.bf16.vlgmr.msra.gmra.mrb[4].mxu1 %vm615_vm0, %v1145_v6 }
  0x5f   : > { %676 = vmatprep.mubr.bf16.mxu0 %v1146_v7  ;;  %1068 = vmatprep.mubr.msk.bf16.mxu1 %vm615_vm0, %v1148_v8 }
  0x66   : > { %677 = vmatmul.mubr.bf16.gmra.mrb[8].mxu0 %v1149_v9  ;;  %1069 = vmatmul.mubr.msk.bf16.gmra.mrb[8].mxu1 %vm615_vm0, %v1150_v10 }
  0xb2   : > { %v420_v11 = vpop.permute.xlu1 %419  ;;  %v410_v12 = vpop.permute.xlu0 %409 }
  0xb8   : > { %v425_v13 = vpop.permute.xlu1 %424  ;;  %v415_v14 = vpop.permute.xlu0 %414 }
  0xbc   : > { %v430_v27 = vpop.permute.xlu0 %429  ;;  %v435_v28 = vpop.permute.xlu1 %434 }
  0xc0   : > { %v440_v41 = vpop.permute.xlu0 %439  ;;  %v445_v45 = vpop.permute.xlu1 %444 }
 0x129   : > { %v1030_v15 = vpop.f32.mrb[0].mxu0  ;;  %v1048_v16 = vpop.f32.mrb[0].mxu1 }
 0x12a   : > { %v1031_v17 = vpop.f32.mrb[1].mxu0  ;;  %v1049_v18 = vpop.f32.mrb[1].mxu1 }
 0x12b   : > { %v1032_v19 = vadd.f32 %v1031_v17, %v1030_v15  ;;  %v1033_v20 = vpop.f32.mrb[2].mxu0  ;;  %v1050_v21 = vadd.f32 %v1049_v18, %v1048_v16  ;;  %v1051_v22 = vpop.f32.mrb[2].mxu1 }
 0x12c   : > { %v1034_v23 = vpop.f32.mrb[3].mxu0  ;;  %v1052_v24 = vpop.f32.mrb[3].mxu1 }
 0x12d   : > { %v1035_v25 = vadd.f32 %v1034_v23, %v1033_v20  ;;  %v1053_v26 = vadd.f32 %v1052_v24, %v1051_v22  ;;  %v663_v31 = vadd.f32 %v1032_v19, %v410_v12  ;;  %v687_v49 = vadd.f32 %v1050_v21, %v440_v41 }
 0x12f   : > { %v666_v38 = vadd.f32 %v1035_v25, %v415_v14  ;;  %v690_v53 = vadd.f32 %v1053_v26, %v445_v45 }
 0x131   : > { %v1036_v29 = vpop.f32.mrb[4].mxu0  ;;  %v1066_v30 = vpop.f32.mrb[4].mxu1 }
 0x132   : > { %v1037_v32 = vpop.f32.mrb[5].mxu0  ;;  %v727_v33 = vpop.f32.mrb[5].mxu1 }
 0x133   : > { %v1038_v34 = vadd.f32 %v1037_v32, %v1036_v29  ;;  %v728_v35 = vadd.f32 %v727_v33, %v663_v31  ;;  %v1039_v36 = vpop.f32.mrb[6].mxu0  ;;  %v1067_v37 = vpop.f32.mrb[6].mxu1 }
 0x134   : > { %v1040_v39 = vpop.f32.mrb[7].mxu0  ;;  %v730_v40 = vpop.f32.mrb[7].mxu1 }
 0x135   : > { %v671_v42 = vadd.f32 %v1038_v34, %v420_v11  ;;  %v1041_v43 = vadd.f32 %v1040_v39, %v1039_v36  ;;  %v731_v44 = vadd.f32 %v730_v40, %v666_v38 }
 0x137   : > { %v736_v46 = vadd.f32 %v1066_v30, %v671_v42  ;;  %v674_v47 = vadd.f32 %v1041_v43, %v425_v13  ;;  %v994_v48 = vpack.c.bf16 %v731_v44, %v728_v35 }
 0x139   : > { %v739_v50 = vadd.f32 %v1067_v37, %v674_v47  ;;  %995 = vst [vmem:[%s1403_s8] sm:$0xff] %v994_v48   ;;  %v1042_v51 = vpop.f32.mrb[8].mxu0  ;;  %v1070_v52 = vpop.f32.mrb[8].mxu1 }
 0x13a   : > { %v752_v54 = vadd.f32 %v1070_v52, %v687_v49  ;;  %v1043_v55 = vpop.f32.mrb[9].mxu0  ;;  %v743_v56 = vpop.f32.mrb[9].mxu1 }
 0x13b   : > { %v999_v57 = vpack.c.bf16 %v739_v50, %v736_v46  ;;  %v1044_v58 = vadd.f32 %v1043_v55, %v1042_v51  ;;  %v1045_v59 = vpop.f32.mrb[10].mxu0  ;;  %v1071_v60 = vpop.f32.mrb[10].mxu1 }
 0x13c   : > { %v755_v61 = vadd.f32 %v1071_v60, %v690_v53  ;;  %v1046_v62 = vpop.f32.mrb[11].mxu0  ;;  %v746_v63 = vpop.f32.mrb[11].mxu1 }
 0x13d   : > { %1011 = vst [vmem:[%s1403_s8 + $0x8] sm:$0xff] %v999_v57   ;;  %v679_v0 = vadd.f32 %v1044_v58, %v430_v27  ;;  %v1047_v1 = vadd.f32 %v1046_v62, %v1045_v59 }
 0x13e   : > { %v1009_v2 = vpack.c.bf16 %v755_v61, %v752_v54 }
 0x13f   : > { %v744_v3 = vadd.f32 %v743_v56, %v679_v0  ;;  %v682_v4 = vadd.f32 %v1047_v1, %v435_v28  ;;  %804 = sbr.rel (!%p1226_p5) target bundleno = 334 (0x14e), region = 77 }
 0x140   : > { %1013 = vst [vmem:[%s1403_s8 + $0x18] sm:$0xff] %v1009_v2   ;;  %v822_v7 = vld [vmem:[%s1403_s8] sm:$0xf] (%p1226_p5)  ;;  %v824_v8 = vld [vmem:[%s1403_s8 + $0x4] sm:$0xf] (%p1226_p5) }
 0x141   : > { %v747_v5 = vadd.f32 %v746_v63, %v682_v4  ;;  %823 = vst [vmem:[%s806_s10] sm:$0xf] (%p1226_p5), %v822_v7  ;;  %825 = vst [vmem:[%s806_s10 + $0x10] sm:$0xf] (%p1226_p5), %v824_v8 }
 0x143   : > { %v1004_v6 = vpack.c.bf16 %v747_v5, %v744_v3 }
 0x144   : > { %v826_v9 = vld [vmem:[%s1403_s8 + $0x8] sm:$0xf] (%p1226_p5)  ;;  %v828_v10 = vld [vmem:[%s1403_s8 + $0xc] sm:$0xf] (%p1226_p5) }
 0x145   : > { %1012 = vst [vmem:[%s1403_s8 + $0x10] sm:$0xff] %v1004_v6   ;;  %827 = vst [vmem:[%s806_s10 + $0x20] sm:$0xf] (%p1226_p5), %v826_v9 }
 0x146   : > { %829 = vst [vmem:[%s806_s10 + $0x30] sm:$0xf] %v828_v10 }
 0x147   : > { %v834_v13 = vld [vmem:[%s1403_s8 + $0x18] sm:$0xf]  ;;  %v836_v14 = vld [vmem:[%s1403_s8 + $0x1c] sm:$0xf] }
 0x148   : > { %835 = vst [vmem:[%s806_s10 + $0x60] sm:$0xf] %v834_v13  ;;  %837 = vst [vmem:[%s806_s10 + $0x70] sm:$0xf] %v836_v14 }
 0x14c   : > { %v830_v11 = vld [vmem:[%s1403_s8 + $0x10] sm:$0xf]  ;;  %v832_v12 = vld [vmem:[%s1403_s8 + $0x14] sm:$0xf] }
 0x14d   : > { %831 = vst [vmem:[%s806_s10 + $0x40] sm:$0xf] %v830_v11  ;;  %833 = vst [vmem:[%s806_s10 + $0x50] sm:$0xf] %v832_v12 }
 0x14e PF: > { %p10_p10 = scmp.ge.s32.totalorder %s1213_s16, 6   ;;  %s1439_s12 = smov %s1169_s13 }
 0x14f   : > { %s1440_s13 = smov %s1224_s19  ;;  %s1441_s14 = smov %s1213_s16 }
 0x150   :  { %12 = sbr.rel (!%p10_p10) target bundleno = 2 (0x2), region = 149 }

// kernel: forward.5
= control target key start
LH: loop header
LB: loop body
LE: loop exit
PB: predicated region body
PF: predicated region fallthrough
CT: control target
= control target key end

     0   :  { %s2122_s1 = inlined_call_operand.vmem [shape: bf16[1024,256], index: 1, kind: input, shape index: {}]   ;;  %s2123_s0 = inlined_call_operand.vmem [shape: bf16[16,1024], index: 0, kind: input, shape index: {}]   ;;  %s2124_s3 = inlined_call_operand.vmem [shape: bf16[256,128], index: 3, kind: input, shape index: {}]   ;;  %s2125_s2 = inlined_call_operand.vmem [shape: f32[1,256], index: 2, kind: input, shape index: {}]   ;;  %s2126_s4 = inlined_call_operand.vmem [shape: f32[1,128], index: 4, kind: input, shape index: {}]   ;;  %s2127_s5 = inlined_call_operand.vmem [shape: f32[16,128], index: 5, kind: output, shape index: {}]  }
   0x1   :  { %v1400_v0 = vld [vmem:[%s2122_s1 + $0x4] ss:$8 sps:$4 sm:$0xff]   ;;  %v1404_v2 = vld [vmem:[%s2122_s1] ss:$8 sps:$4 sm:$0xff]   ;;  %v1406_v4 = vld [vmem:[%s2122_s1 + $0x14] ss:$8 sps:$4 sm:$0xff]  }
   0x2   :  { %v1402_v1 = vld [vmem:[%s2122_s1 + $0x204] ss:$8 sps:$4 sm:$0xff]   ;;  %849 = vmatprep.subr.bf16.mxu1 %v1400_v0  ;;  %v1405_v3 = vld [vmem:[%s2122_s1 + $0x200] ss:$8 sps:$4 sm:$0xff]   ;;  %v1408_v5 = vld [vmem:[%s2122_s1 + $0x214] ss:$8 sps:$4 sm:$0xff]  }
   0x3   :  { %935 = vmatprep.subr.bf16.mxu0 %v1402_v1  ;;  %850 = vmatpush1.bf16.msra.mxu1 %v1404_v2  ;;  %v1410_v6 = vld [vmem:[%s2122_s1 + $0x10] ss:$8 sps:$4 sm:$0xff]   ;;  %v1412_v8 = vld [vmem:[%s2122_s1 + $0x24] ss:$8 sps:$4 sm:$0xff]   ;;  %v1416_v10 = vld [vmem:[%s2122_s1 + $0x20] ss:$8 sps:$4 sm:$0xff]  }
   0x4   :  { %936 = vmatpush1.bf16.msra.mxu0 %v1405_v3  ;;  %851 = vmatprep.subr.bf16.mxu1 %v1406_v4  ;;  %v1411_v7 = vld [vmem:[%s2122_s1 + $0x210] ss:$8 sps:$4 sm:$0xff]   ;;  %v1414_v9 = vld [vmem:[%s2122_s1 + $0x224] ss:$8 sps:$4 sm:$0xff]   ;;  %v1417_v11 = vld [vmem:[%s2122_s1 + $0x220] ss:$8 sps:$4 sm:$0xff]  }
   0x5   :  { %937 = vmatprep.subr.bf16.mxu0 %v1408_v5  ;;  %v1418_v12 = vld [vmem:[%s2122_s1 + $0x34] ss:$8 sps:$4 sm:$0xff]   ;;  %v1422_v14 = vld [vmem:[%s2122_s1 + $0x30] ss:$8 sps:$4 sm:$0xff]   ;;  %v1424_v16 = vld [vmem:[%s2122_s1 + $0x44] ss:$8 sps:$4 sm:$0xff]  }
   0x6   :  { %v1420_v13 = vld [vmem:[%s2122_s1 + $0x234] ss:$8 sps:$4 sm:$0xff]   ;;  %v1423_v15 = vld [vmem:[%s2122_s1 + $0x230] ss:$8 sps:$4 sm:$0xff]   ;;  %v1426_v17 = vld [vmem:[%s2122_s1 + $0x244] ss:$8 sps:$4 sm:$0xff]  }
   0x7   :  { %852 = vmatpush1.bf16.msra.mxu1 %v1410_v6  ;;  %v1428_v18 = vld [vmem:[%s2122_s1 + $0x40] ss:$8 sps:$4 sm:$0xff]   ;;  %v1430_v20 = vld [vmem:[%s2122_s1 + $0x54] ss:$8 sps:$4 sm:$0xff]   ;;  %v1434_v22 = vld [vmem:[%s2122_s1 + $0x50] ss:$8 sps:$4 sm:$0xff]  }
   0x8   :  { %938 = vmatpush1.bf16.msra.mxu0 %v1411_v7  ;;  %853 = vmatprep.subr.bf16.mxu1 %v1412_v8  ;;  %v1429_v19 = vld [vmem:[%s2122_s1 + $0x240] ss:$8 sps:$4 sm:$0xff]   ;;  %v1432_v21 = vld [vmem:[%s2122_s1 + $0x254] ss:$8 sps:$4 sm:$0xff]   ;;  %v1435_v23 = vld [vmem:[%s2122_s1 + $0x250] ss:$8 sps:$4 sm:$0xff]  }
   0x9   :  { %939 = vmatprep.subr.bf16.mxu0 %v1414_v9  ;;  %v1436_v24 = vld [vmem:[%s2122_s1 + $0x64] ss:$8 sps:$4 sm:$0xff]   ;;  %v1440_v26 = vld [vmem:[%s2122_s1 + $0x60] ss:$8 sps:$4 sm:$0xff]   ;;  %v1442_v28 = vld [vmem:[%s2122_s1 + $0x74] ss:$8 sps:$4 sm:$0xff]  }
   0xa   :  { %v1438_v25 = vld [vmem:[%s2122_s1 + $0x264] ss:$8 sps:$4 sm:$0xff]   ;;  %v1441_v27 = vld [vmem:[%s2122_s1 + $0x260] ss:$8 sps:$4 sm:$0xff]   ;;  %v1444_v29 = vld [vmem:[%s2122_s1 + $0x274] ss:$8 sps:$4 sm:$0xff]  }
   0xb   :  { %854 = vmatpush1.bf16.msra.mxu1 %v1416_v10  ;;  %v1446_v30 = vld [vmem:[%s2122_s1 + $0x70] ss:$8 sps:$4 sm:$0xff]   ;;  %v1448_v32 = vld [vmem:[%s2122_s1 + $0x84] ss:$8 sps:$4 sm:$0xff]   ;;  %v1452_v34 = vld [vmem:[%s2122_s1 + $0x80] ss:$8 sps:$4 sm:$0xff]  }
   0xc   :  { %940 = vmatpush1.bf16.msra.mxu0 %v1417_v11  ;;  %855 = vmatprep.subr.bf16.mxu1 %v1418_v12  ;;  %v1447_v31 = vld [vmem:[%s2122_s1 + $0x270] ss:$8 sps:$4 sm:$0xff]   ;;  %v1450_v33 = vld [vmem:[%s2122_s1 + $0x284] ss:$8 sps:$4 sm:$0xff]   ;;  %v1453_v35 = vld [vmem:[%s2122_s1 + $0x280] ss:$8 sps:$4 sm:$0xff]  }
   0xd   :  { %941 = vmatprep.subr.bf16.mxu0 %v1420_v13  ;;  %v1454_v36 = vld [vmem:[%s2122_s1 + $0x94] ss:$8 sps:$4 sm:$0xff]   ;;  %v1458_v38 = vld [vmem:[%s2122_s1 + $0x90] ss:$8 sps:$4 sm:$0xff]   ;;  %v1460_v40 = vld [vmem:[%s2122_s1 + $0xa4] ss:$8 sps:$4 sm:$0xff]  }
   0xe   :  { %v1456_v37 = vld [vmem:[%s2122_s1 + $0x294] ss:$8 sps:$4 sm:$0xff]   ;;  %v1459_v39 = vld [vmem:[%s2122_s1 + $0x290] ss:$8 sps:$4 sm:$0xff]   ;;  %v1462_v41 = vld [vmem:[%s2122_s1 + $0x2a4] ss:$8 sps:$4 sm:$0xff]  }
   0xf   :  { %856 = vmatpush1.bf16.msra.mxu1 %v1422_v14  ;;  %v1464_v42 = vld [vmem:[%s2122_s1 + $0xa0] ss:$8 sps:$4 sm:$0xff]   ;;  %v1466_v44 = vld [vmem:[%s2122_s1 + $0xb4] ss:$8 sps:$4 sm:$0xff]   ;;  %v1470_v46 = vld [vmem:[%s2122_s1 + $0xb0] ss:$8 sps:$4 sm:$0xff]  }
  0x10   :  { %942 = vmatpush1.bf16.msra.mxu0 %v1423_v15  ;;  %857 = vmatprep.subr.bf16.mxu1 %v1424_v16  ;;  %v1465_v43 = vld [vmem:[%s2122_s1 + $0x2a0] ss:$8 sps:$4 sm:$0xff]   ;;  %v1468_v45 = vld [vmem:[%s2122_s1 + $0x2b4] ss:$8 sps:$4 sm:$0xff]   ;;  %v1471_v47 = vld [vmem:[%s2122_s1 + $0x2b0] ss:$8 sps:$4 sm:$0xff]  }
  0x11   :  { %943 = vmatprep.subr.bf16.mxu0 %v1426_v17  ;;  %v21_v48 = vld [vmem:[%s2123_s0] sm:$0xff]  ;;  %v23_v53 = vld [vmem:[%s2123_s0 + $0x10] sm:$0xff] }
  0x12   :  { %v25_v49 = vld [vmem:[%s2123_s0 + $0x20] sm:$0xff]  ;;  %v27_v54 = vld [vmem:[%s2123_s0 + $0x30] sm:$0xff] }
  0x13   :  { %858 = vmatpush1.bf16.msra.mxu1 %v1428_v18  ;;  %v1472_v50 = vld [vmem:[%s2122_s1 + $0xc4] ss:$8 sps:$4 sm:$0xff]   ;;  %v1210_v52 = vcombine.high %v21_v48, %v25_v49  ;;  %v1214_v55 = vcombine.high %v23_v53, %v27_v54  ;;  %v1476_v56 = vld [vmem:[%s2122_s1 + $0xc0] ss:$8 sps:$4 sm:$0xff]   ;;  %v1478_v58 = vld [vmem:[%s2122_s1 + $0xd4] ss:$8 sps:$4 sm:$0xff]   ;;  %v1209_v8 = vcombine.low %v21_v48, %v25_v49  ;;  %v1213_v10 = vcombine.low %v23_v53, %v27_v54 }
  0x14   :  { %944 = vmatpush1.bf16.msra.mxu0 %v1429_v19  ;;  %859 = vmatprep.subr.bf16.mxu1 %v1430_v20  ;;  %v1474_v51 = vld [vmem:[%s2122_s1 + $0x2c4] ss:$8 sps:$4 sm:$0xff]   ;;  %v1477_v57 = vld [vmem:[%s2122_s1 + $0x2c0] ss:$8 sps:$4 sm:$0xff]   ;;  %v1480_v59 = vld [vmem:[%s2122_s1 + $0x2d4] ss:$8 sps:$4 sm:$0xff]  }
  0x15   :  { %945 = vmatprep.subr.bf16.mxu0 %v1432_v21  ;;  %881 = vmatprep.mubr.bf16.mxu1 %v1210_v52  ;;  %v1482_v60 = vld [vmem:[%s2122_s1 + $0xd0] ss:$8 sps:$4 sm:$0xff]   ;;  %v1484_v62 = vld [vmem:[%s2122_s1 + $0xe4] ss:$8 sps:$4 sm:$0xff]   ;;  %v1488_v0 = vld [vmem:[%s2122_s1 + $0xe0] ss:$8 sps:$4 sm:$0xff]  }
  0x16   :  { %967 = vmatprep.mubr.bf16.mxu0 %v1214_v55  ;;  %v1483_v61 = vld [vmem:[%s2122_s1 + $0x2d0] ss:$8 sps:$4 sm:$0xff]   ;;  %v1486_v63 = vld [vmem:[%s2122_s1 + $0x2e4] ss:$8 sps:$4 sm:$0xff]   ;;  %v1489_v1 = vld [vmem:[%s2122_s1 + $0x2e0] ss:$8 sps:$4 sm:$0xff]  }
  0x17   :  { %860 = vmatpush1.bf16.msra.mxu1 %v1434_v22  ;;  %v1490_v2 = vld [vmem:[%s2122_s1 + $0xf4] ss:$8 sps:$4 sm:$0xff]   ;;  %v1494_v4 = vld [vmem:[%s2122_s1 + $0xf0] ss:$8 sps:$4 sm:$0xff]   ;;  %v1498_v6 = vld [vmem:[%s2122_s1 + $0x104] ss:$8 sps:$4 sm:$0xff]  }
  0x18   :  { %946 = vmatpush1.bf16.msra.mxu0 %v1435_v23  ;;  %861 = vmatprep.subr.bf16.mxu1 %v1436_v24  ;;  %v1492_v3 = vld [vmem:[%s2122_s1 + $0x2f4] ss:$8 sps:$4 sm:$0xff]   ;;  %v1495_v5 = vld [vmem:[%s2122_s1 + $0x2f0] ss:$8 sps:$4 sm:$0xff]   ;;  %v1501_v7 = vld [vmem:[%s2122_s1 + $0x304] ss:$8 sps:$4 sm:$0xff]  }
  0x19   :  { %947 = vmatprep.subr.bf16.mxu0 %v1438_v25  ;;  %v1496_v9 = vld [vmem:[%s2122_s1 + $0x100] ss:$8 sps:$4 sm:$0xff]   ;;  %v1504_v12 = vld [vmem:[%s2122_s1 + $0x114] ss:$8 sps:$4 sm:$0xff]   ;;  %v1502_v14 = vld [vmem:[%s2122_s1 + $0x110] ss:$8 sps:$4 sm:$0xff]  }
  0x1a   :  { %v1499_v11 = vld [vmem:[%s2122_s1 + $0x300] ss:$8 sps:$4 sm:$0xff]   ;;  %v1507_v13 = vld [vmem:[%s2122_s1 + $0x314] ss:$8 sps:$4 sm:$0xff]   ;;  %v1505_v15 = vld [vmem:[%s2122_s1 + $0x310] ss:$8 sps:$4 sm:$0xff]  }
  0x1b   :  { %862 = vmatpush1.bf16.msra.mxu1 %v1440_v26  ;;  %v1510_v16 = vld [vmem:[%s2122_s1 + $0x124] ss:$8 sps:$4 sm:$0xff]   ;;  %v1508_v18 = vld [vmem:[%s2122_s1 + $0x120] ss:$8 sps:$4 sm:$0xff]   ;;  %v1516_v20 = vld [vmem:[%s2122_s1 + $0x134] ss:$8 sps:$4 sm:$0xff]  }
  0x1c   :  { %948 = vmatpush1.bf16.msra.mxu0 %v1441_v27  ;;  %863 = vmatprep.subr.bf16.mxu1 %v1442_v28  ;;  %v1513_v17 = vld [vmem:[%s2122_s1 + $0x324] ss:$8 sps:$4 sm:$0xff]   ;;  %v1511_v19 = vld [vmem:[%s2122_s1 + $0x320] ss:$8 sps:$4 sm:$0xff]   ;;  %v1519_v21 = vld [vmem:[%s2122_s1 + $0x334] ss:$8 sps:$4 sm:$0xff]  }
  0x1d   :  { %949 = vmatprep.subr.bf16.mxu0 %v1444_v29  ;;  %v1514_v22 = vld [vmem:[%s2122_s1 + $0x130] ss:$8 sps:$4 sm:$0xff]   ;;  %v1522_v24 = vld [vmem:[%s2122_s1 + $0x144] ss:$8 sps:$4 sm:$0xff]   ;;  %v1520_v26 = vld [vmem:[%s2122_s1 + $0x140] ss:$8 sps:$4 sm:$0xff]  }
  0x1e   :  { %v1517_v23 = vld [vmem:[%s2122_s1 + $0x330] ss:$8 sps:$4 sm:$0xff]   ;;  %v1525_v25 = vld [vmem:[%s2122_s1 + $0x344] ss:$8 sps:$4 sm:$0xff]   ;;  %v1523_v27 = vld [vmem:[%s2122_s1 + $0x340] ss:$8 sps:$4 sm:$0xff]  }
  0x1f   :  { %864 = vmatpush1.bf16.msra.mxu1 %v1446_v30  ;;  %v1528_v28 = vld [vmem:[%s2122_s1 + $0x154] ss:$8 sps:$4 sm:$0xff]   ;;  %v1526_v30 = vld [vmem:[%s2122_s1 + $0x150] ss:$8 sps:$4 sm:$0xff]   ;;  %v1544_v48 = vld [vmem:[%s2122_s1 + $0x180] ss:$8 sps:$4 sm:$0xff]  }
  0x20   :  { %950 = vmatpush1.bf16.msra.mxu0 %v1447_v31  ;;  %865 = vmatprep.subr.bf16.mxu1 %v1448_v32  ;;  %v1531_v29 = vld [vmem:[%s2122_s1 + $0x354] ss:$8 sps:$4 sm:$0xff]   ;;  %v1529_v31 = vld [vmem:[%s2122_s1 + $0x350] ss:$8 sps:$4 sm:$0xff]   ;;  %v1534_v32 = vld [vmem:[%s2122_s1 + $0x164] ss:$8 sps:$4 sm:$0xff]  }
  0x21   :  { %951 = vmatprep.subr.bf16.mxu0 %v1450_v33  ;;  %v1537_v33 = vld [vmem:[%s2122_s1 + $0x364] ss:$8 sps:$4 sm:$0xff]   ;;  %v1547_v49 = vld [vmem:[%s2122_s1 + $0x380] ss:$8 sps:$4 sm:$0xff]   ;;  %v1550_v52 = vld [vmem:[%s2122_s1 + $0x190] ss:$8 sps:$4 sm:$0xff]  }
  0x22   :  { %v1553_v53 = vld [vmem:[%s2122_s1 + $0x390] ss:$8 sps:$4 sm:$0xff]   ;;  %v1558_v54 = vld [vmem:[%s2122_s1 + $0x1a4] ss:$8 sps:$4 sm:$0xff]  }
  0x23   :  { %866 = vmatpush1.bf16.msra.mxu1 %v1452_v34  ;;  %v1532_v34 = vld [vmem:[%s2122_s1 + $0x160] ss:$8 sps:$4 sm:$0xff]   ;;  %v1561_v55 = vld [vmem:[%s2122_s1 + $0x3a4] ss:$8 sps:$4 sm:$0xff]  }
  0x24   :  { %952 = vmatpush1.bf16.msra.mxu0 %v1453_v35  ;;  %867 = vmatprep.subr.bf16.mxu1 %v1454_v36  ;;  %v1535_v35 = vld [vmem:[%s2122_s1 + $0x360] ss:$8 sps:$4 sm:$0xff]  }
  0x25   :  { %953 = vmatprep.subr.bf16.mxu0 %v1456_v37  ;;  %v1929_v36 = vld [vmem:[%s2123_s0 + $0x8] sm:$0xff] }
  0x26   :  { %v1934_v37 = vld [vmem:[%s2123_s0 + $0x28] sm:$0xff] }
  0x27   :  { %868 = vmatpush1.bf16.msra.mxu1 %v1458_v38  ;;  %v1939_v38 = vld [vmem:[%s2123_s0 + $0x18] sm:$0xff] }
  0x28   :  { %954 = vmatpush1.bf16.msra.mxu0 %v1459_v39  ;;  %869 = vmatprep.subr.bf16.mxu1 %v1460_v40  ;;  %v1944_v39 = vld [vmem:[%s2123_s0 + $0x38] sm:$0xff] }
  0x29   :  { %955 = vmatprep.subr.bf16.mxu0 %v1462_v41  ;;  %v1540_v40 = vld [vmem:[%s2122_s1 + $0x174] ss:$8 sps:$4 sm:$0xff]   ;;  %v1212_v41 = vcombine.high %v1929_v36, %v1934_v37 }
  0x2b   :  { %870 = vmatpush1.bf16.msra.mxu1 %v1464_v42  ;;  %v1543_v42 = vld [vmem:[%s2122_s1 + $0x374] ss:$8 sps:$4 sm:$0xff]  }
  0x2c   :  { %956 = vmatpush1.bf16.msra.mxu0 %v1465_v43  ;;  %871 = vmatprep.subr.bf16.mxu1 %v1466_v44  ;;  %v1216_v43 = vcombine.high %v1939_v38, %v1944_v39  ;;  %v1538_v44 = vld [vmem:[%s2122_s1 + $0x170] ss:$8 sps:$4 sm:$0xff]  }
  0x2d   :  { %957 = vmatprep.subr.bf16.mxu0 %v1468_v45  ;;  %v1541_v45 = vld [vmem:[%s2122_s1 + $0x370] ss:$8 sps:$4 sm:$0xff]  }
  0x2f   :  { %872 = vmatpush1.bf16.msra.mxu1 %v1470_v46  ;;  %v1546_v46 = vld [vmem:[%s2122_s1 + $0x184] ss:$8 sps:$4 sm:$0xff]  }
  0x30   :  { %958 = vmatpush1.bf16.msra.mxu0 %v1471_v47  ;;  %873 = vmatprep.subr.bf16.mxu1 %v1472_v50  ;;  %v1549_v47 = vld [vmem:[%s2122_s1 + $0x384] ss:$8 sps:$4 sm:$0xff]   ;;  %v1552_v50 = vld [vmem:[%s2122_s1 + $0x194] ss:$8 sps:$4 sm:$0xff]  }
  0x31   :  { %959 = vmatprep.subr.bf16.mxu0 %v1474_v51  ;;  %v1555_v51 = vld [vmem:[%s2122_s1 + $0x394] ss:$8 sps:$4 sm:$0xff]  }
  0x33   :  { %874 = vmatpush1.bf16.msra.mxu1 %v1476_v56  ;;  %v1556_v56 = vld [vmem:[%s2122_s1 + $0x1a0] ss:$8 sps:$4 sm:$0xff]  }
  0x34   :  { %960 = vmatpush1.bf16.msra.mxu0 %v1477_v57  ;;  %875 = vmatprep.subr.bf16.mxu1 %v1478_v58  ;;  %v1559_v57 = vld [vmem:[%s2122_s1 + $0x3a0] ss:$8 sps:$4 sm:$0xff]   ;;  %v1564_v58 = vld [vmem:[%s2122_s1 + $0x1b4] ss:$8 sps:$4 sm:$0xff]  }
  0x35   :  { %961 = vmatprep.subr.bf16.mxu0 %v1480_v59  ;;  %v1567_v59 = vld [vmem:[%s2122_s1 + $0x3b4] ss:$8 sps:$4 sm:$0xff]  }
  0x37   :  { %876 = vmatpush1.bf16.msra.mxu1 %v1482_v60  ;;  %v1562_v60 = vld [vmem:[%s2122_s1 + $0x1b0] ss:$8 sps:$4 sm:$0xff]  }
  0x38   :  { %962 = vmatpush1.bf16.msra.mxu0 %v1483_v61  ;;  %877 = vmatprep.subr.bf16.mxu1 %v1484_v62  ;;  %v1565_v61 = vld [vmem:[%s2122_s1 + $0x3b0] ss:$8 sps:$4 sm:$0xff]   ;;  %v1570_v62 = vld [vmem:[%s2122_s1 + $0x1c4] ss:$8 sps:$4 sm:$0xff]  }
  0x39   :  { %963 = vmatprep.subr.bf16.mxu0 %v1486_v63  ;;  %v1573_v63 = vld [vmem:[%s2122_s1 + $0x3c4] ss:$8 sps:$4 sm:$0xff]  }
  0x3b   :  { %878 = vmatpush1.bf16.msra.mxu1 %v1488_v0  ;;  %v1568_v0 = vld [vmem:[%s2122_s1 + $0x1c0] ss:$8 sps:$4 sm:$0xff]  }
  0x3c   :  { %964 = vmatpush1.bf16.msra.mxu0 %v1489_v1  ;;  %879 = vmatprep.subr.bf16.mxu1 %v1490_v2  ;;  %v1571_v1 = vld [vmem:[%s2122_s1 + $0x3c0] ss:$8 sps:$4 sm:$0xff]   ;;  %v1576_v2 = vld [vmem:[%s2122_s1 + $0x1d4] ss:$8 sps:$4 sm:$0xff]  }
  0x3d   :  { %965 = vmatprep.subr.bf16.mxu0 %v1492_v3  ;;  %v1579_v3 = vld [vmem:[%s2122_s1 + $0x3d4] ss:$8 sps:$4 sm:$0xff]  }
  0x3f   :  { %880 = vmatpush1.bf16.msra.mxu1 %v1494_v4  ;;  %v1574_v4 = vld [vmem:[%s2122_s1 + $0x1d0] ss:$8 sps:$4 sm:$0xff]  }
  0x40   :  { %966 = vmatpush1.bf16.msra.mxu0 %v1495_v5  ;;  %892 = vmatprep.subr.bf16.mxu1 %v1498_v6  ;;  %v1577_v5 = vld [vmem:[%s2122_s1 + $0x3d0] ss:$8 sps:$4 sm:$0xff]   ;;  %v1582_v6 = vld [vmem:[%s2122_s1 + $0x1e4] ss:$8 sps:$4 sm:$0xff]  }
  0x41   :  { %978 = vmatprep.subr.bf16.mxu0 %v1501_v7  ;;  %v1585_v7 = vld [vmem:[%s2122_s1 + $0x3e4] ss:$8 sps:$4 sm:$0xff]  }
  0x42   :  { %882 = vmatmul.mubr.bf16.vlgmr.msra.gmra.mrb[0].mxu1 %v1209_v8  ;;  %v1580_v8 = vld [vmem:[%s2122_s1 + $0x1e0] ss:$8 sps:$4 sm:$0xff]  }
  0x43   :  { %968 = vmatmul.mubr.bf16.vlgmr.msra.gmra.mrb[0].mxu0 %v1213_v10  ;;  %893 = vmatpush1.bf16.msra.mxu1 %v1496_v9  ;;  %v1583_v9 = vld [vmem:[%s2122_s1 + $0x3e0] ss:$8 sps:$4 sm:$0xff]   ;;  %v1588_v10 = vld [vmem:[%s2122_s1 + $0x1f4] ss:$8 sps:$4 sm:$0xff]  }
  0x44   :  { %979 = vmatpush1.bf16.msra.mxu0 %v1499_v11  ;;  %894 = vmatprep.subr.bf16.mxu1 %v1504_v12  ;;  %v1591_v11 = vld [vmem:[%s2122_s1 + $0x3f4] ss:$8 sps:$4 sm:$0xff]   ;;  %v1586_v12 = vld [vmem:[%s2122_s1 + $0x1f0] ss:$8 sps:$4 sm:$0xff]  }
  0x45   :  { %980 = vmatprep.subr.bf16.mxu0 %v1507_v13  ;;  %924 = vmatprep.mubr.bf16.mxu1 %v1212_v41  ;;  %v1589_v13 = vld [vmem:[%s2122_s1 + $0x3f0] ss:$8 sps:$4 sm:$0xff]  }
  0x46   :  { %1010 = vmatprep.mubr.bf16.mxu0 %v1216_v43 }
  0x47   :  { %895 = vmatpush1.bf16.msra.mxu1 %v1502_v14  ;;  %v1592_v14 = vld [vmem:[%s2124_s3 + $0x40] sm:$0xff]  }
  0x48   :  { %981 = vmatpush1.bf16.msra.mxu0 %v1505_v15  ;;  %896 = vmatprep.subr.bf16.mxu1 %v1510_v16  ;;  %v1211_v15 = vcombine.low %v1929_v36, %v1934_v37  ;;  %v1215_v16 = vcombine.low %v1939_v38, %v1944_v39 }
  0x49   :  { %982 = vmatprep.subr.bf16.mxu0 %v1513_v17  ;;  %v1593_v17 = vld [vmem:[%s2124_s3] sm:$0xff]  }
  0x4b   :  { %897 = vmatpush1.bf16.msra.mxu1 %v1508_v18  ;;  %v1594_v18 = vld [vmem:[%s2124_s3 + $0x48] sm:$0xff]  }
  0x4c   :  { %983 = vmatpush1.bf16.msra.mxu0 %v1511_v19  ;;  %898 = vmatprep.subr.bf16.mxu1 %v1516_v20  ;;  %v1595_v19 = vld [vmem:[%s2124_s3 + $0x8] sm:$0xff]   ;;  %v1596_v20 = vld [vmem:[%s2124_s3 + $0x50] sm:$0xff]  }
  0x4d   :  { %984 = vmatprep.subr.bf16.mxu0 %v1519_v21  ;;  %v1597_v21 = vld [vmem:[%s2124_s3 + $0x10] sm:$0xff]  }
  0x4f   :  { %899 = vmatpush1.bf16.msra.mxu1 %v1514_v22  ;;  %v1598_v22 = vld [vmem:[%s2124_s3 + $0x58] sm:$0xff]  }
  0x50   :  { %985 = vmatpush1.bf16.msra.mxu0 %v1517_v23  ;;  %900 = vmatprep.subr.bf16.mxu1 %v1522_v24  ;;  %v1599_v23 = vld [vmem:[%s2124_s3 + $0x18] sm:$0xff]   ;;  %v1600_v24 = vld [vmem:[%s2124_s3 + $0x60] sm:$0xff]  }
  0x51   :  { %986 = vmatprep.subr.bf16.mxu0 %v1525_v25  ;;  %v1601_v25 = vld [vmem:[%s2124_s3 + $0x20] sm:$0xff]  }
  0x53   :  { %901 = vmatpush1.bf16.msra.mxu1 %v1520_v26  ;;  %v1602_v26 = vld [vmem:[%s2124_s3 + $0x68] sm:$0xff]  }
  0x54   :  { %987 = vmatpush1.bf16.msra.mxu0 %v1523_v27  ;;  %902 = vmatprep.subr.bf16.mxu1 %v1528_v28  ;;  %v1603_v27 = vld [vmem:[%s2124_s3 + $0x28] sm:$0xff]   ;;  %v1604_v28 = vld [vmem:[%s2124_s3 + $0x70] sm:$0xff]  }
  0x55   :  { %988 = vmatprep.subr.bf16.mxu0 %v1531_v29  ;;  %v1605_v29 = vld [vmem:[%s2124_s3 + $0x30] sm:$0xff]  }
  0x57   :  { %903 = vmatpush1.bf16.msra.mxu1 %v1526_v30  ;;  %v1606_v30 = vld [vmem:[%s2124_s3 + $0x78] sm:$0xff]  }
  0x58   :  { %989 = vmatpush1.bf16.msra.mxu0 %v1529_v31  ;;  %904 = vmatprep.subr.bf16.mxu1 %v1534_v32  ;;  %v1607_v31 = vld [vmem:[%s2124_s3 + $0x38] sm:$0xff]   ;;  %v159_v32 = vlaneseq }
  0x59   :  { %990 = vmatprep.subr.bf16.mxu0 %v1537_v33 }
  0x5a   :  { %v160_v33 = vshrl.u32 %v159_v32, 7 }
  0x5b   :  { %905 = vmatpush1.bf16.msra.mxu1 %v1532_v34 }
  0x5c   :  { %991 = vmatpush1.bf16.msra.mxu0 %v1535_v35  ;;  %906 = vmatprep.subr.bf16.mxu1 %v1540_v40  ;;  %v161_v34 = vsub.s32 0, %v160_v33  ;;  %v157_v35 = vld [vmem:[%s2125_s2] sm:$0x3]  ;;  %v165_v36 = vsub.s32 1, %v160_v33 }
  0x5d   :  { %992 = vmatprep.subr.bf16.mxu0 %v1543_v42 }
  0x5e   :  { %v162_v37 = vrot.slane %v157_v35, %v161_v34  ;;  %v166_v38 = vrot.slane %v157_v35, %v165_v36 }
  0x5f   :  { %907 = vmatpush1.bf16.msra.mxu1 %v1538_v44 }
  0x60   :  { %993 = vmatpush1.bf16.msra.mxu0 %v1541_v45  ;;  %908 = vmatprep.subr.bf16.mxu1 %v1546_v46 }
  0x61   :  { %994 = vmatprep.subr.bf16.mxu0 %v1549_v47 }
  0x63   :  { %909 = vmatpush1.bf16.msra.mxu1 %v1544_v48 }
  0x64   :  { %995 = vmatpush1.bf16.msra.mxu0 %v1547_v49  ;;  %910 = vmatprep.subr.bf16.mxu1 %v1552_v50 }
  0x65   :  { %996 = vmatprep.subr.bf16.mxu0 %v1555_v51 }
  0x67   :  { %911 = vmatpush1.bf16.msra.mxu1 %v1550_v52 }
  0x68   :  { %997 = vmatpush1.bf16.msra.mxu0 %v1553_v53  ;;  %912 = vmatprep.subr.bf16.mxu1 %v1558_v54 }
  0x69   :  { %998 = vmatprep.subr.bf16.mxu0 %v1561_v55 }
  0x6b   :  { %913 = vmatpush1.bf16.msra.mxu1 %v1556_v56 }
  0x6c   :  { %999 = vmatpush1.bf16.msra.mxu0 %v1559_v57  ;;  %914 = vmatprep.subr.bf16.mxu1 %v1564_v58 }
  0x6d   :  { %1000 = vmatprep.subr.bf16.mxu0 %v1567_v59 }
  0x6f   :  { %915 = vmatpush1.bf16.msra.mxu1 %v1562_v60 }
  0x70   :  { %1001 = vmatpush1.bf16.msra.mxu0 %v1565_v61  ;;  %916 = vmatprep.subr.bf16.mxu1 %v1570_v62  ;;  %v1345_v62 = vld [vmem:[%s2126_s4] ss:$0 sm:$0xff] }
  0x71   :  { %1002 = vmatprep.subr.bf16.mxu0 %v1573_v63 }
  0x73   :  { %917 = vmatpush1.bf16.msra.mxu1 %v1568_v0 }
  0x74   :  { %1003 = vmatpush1.bf16.msra.mxu0 %v1571_v1  ;;  %918 = vmatprep.subr.bf16.mxu1 %v1576_v2 }
  0x75   :  { %1004 = vmatprep.subr.bf16.mxu0 %v1579_v3 }
  0x77   :  { %919 = vmatpush1.bf16.msra.mxu1 %v1574_v4 }
  0x78   :  { %1005 = vmatpush1.bf16.msra.mxu0 %v1577_v5  ;;  %920 = vmatprep.subr.bf16.mxu1 %v1582_v6 }
  0x79   :  { %1006 = vmatprep.subr.bf16.mxu0 %v1585_v7 }
  0x7b   :  { %921 = vmatpush1.bf16.msra.mxu1 %v1580_v8 }
  0x7c   :  { %1007 = vmatpush1.bf16.msra.mxu0 %v1583_v9  ;;  %922 = vmatprep.subr.bf16.mxu1 %v1588_v10 }
  0x7d   :  { %1008 = vmatprep.subr.bf16.mxu0 %v1591_v11 }
  0x7f   :  { %923 = vmatpush1.bf16.msra.mxu1 %v1586_v12 }
  0x80   :  { %1009 = vmatpush1.bf16.msra.mxu0 %v1589_v13  ;;  %1362 = vmatprep.subr.bf16.mxu1 %v1592_v14 }
  0x82   :  { %925 = vmatmul.mubr.bf16.vlgmr.msra.gmra.mrb[0].mxu1 %v1211_v15 }
  0x83   :  { %1011 = vmatmul.mubr.bf16.vlgmr.msra.gmra.mrb[0].mxu0 %v1215_v16  ;;  %1363 = vmatpush3.bf16.msra.mxu1 %v1593_v17 }
  0x84   :  { %1364 = vmatprep.subr.bf16.mxu1 %v1594_v18 }
  0x87   :  { %1365 = vmatpush3.bf16.msra.mxu1 %v1595_v19 }
  0x88   :  { %1366 = vmatprep.subr.bf16.mxu1 %v1596_v20 }
  0x8b   :  { %1367 = vmatpush3.bf16.msra.mxu1 %v1597_v21 }
  0x8c   :  { %1368 = vmatprep.subr.bf16.mxu1 %v1598_v22 }
  0x8f   :  { %1369 = vmatpush3.bf16.msra.mxu1 %v1599_v23 }
  0x90   :  { %1370 = vmatprep.subr.bf16.mxu1 %v1600_v24 }
  0x93   :  { %1371 = vmatpush3.bf16.msra.mxu1 %v1601_v25 }
  0x94   :  { %1372 = vmatprep.subr.bf16.mxu1 %v1602_v26 }
  0x97   :  { %1373 = vmatpush3.bf16.msra.mxu1 %v1603_v27 }
  0x98   :  { %1374 = vmatprep.subr.bf16.mxu1 %v1604_v28 }
  0x9b   :  { %1375 = vmatpush3.bf16.msra.mxu1 %v1605_v29 }
  0x9c   :  { %1376 = vmatprep.subr.bf16.mxu1 %v1606_v30 }
  0x9f   :  { %1377 = vmatpush3.bf16.msra.mxu1 %v1607_v31 }
 0x155   :  { %v926_v39 = vpop.f32.mrb[0].mxu1 }
 0x156   :  { %v1012_v40 = vpop.f32.mrb[0].mxu0  ;;  %v1384_v41 = vadd.f32 %v926_v39, %v162_v37  ;;  %v928_v42 = vpop.f32.mrb[1].mxu1 }
 0x157   :  { %v1014_v43 = vpop.f32.mrb[1].mxu0  ;;  %v1386_v44 = vadd.f32 %v928_v42, %v166_v38  ;;  %v930_v45 = vpop.f32.mrb[2].mxu1 }
 0x158   :  { %v1016_v46 = vpop.f32.mrb[2].mxu0  ;;  %v1385_v47 = vadd.f32 %v1384_v41, %v1012_v40  ;;  %v1388_v48 = vadd.f32 %v930_v45, %v162_v37  ;;  %v932_v49 = vpop.f32.mrb[3].mxu1 }
 0x159   :  { %v1018_v50 = vpop.f32.mrb[3].mxu0  ;;  %v1387_v51 = vadd.f32 %v1386_v44, %v1014_v43  ;;  %v1390_v52 = vadd.f32 %v932_v49, %v166_v38 }
 0x15a   :  { %v1389_v53 = vadd.f32 %v1388_v48, %v1016_v46  ;;  %v1021_v55 = vmax.f32 %v1385_v47, 0.0 }
 0x15b   :  { %v1391_v54 = vadd.f32 %v1390_v52, %v1018_v50  ;;  %v1022_v57 = vmax.f32 %v1387_v51, 0.0 }
 0x15c   :  { %v1023_v56 = vmax.f32 %v1389_v53, 0.0 }
 0x15d   :  { %v1024_v58 = vmax.f32 %v1391_v54, 0.0 }
 0x15e   :  { %v1025_v59 = vpack.c.bf16 %v1023_v56, %v1021_v55 }
 0x15f   :  { %v1026_v60 = vpack.c.bf16 %v1024_v58, %v1022_v57 }
 0x161   :  { %1194 = vmatprep.mubr.bf16.mxu1 %v1026_v60 }
 0x162   :  { %1195 = vmatmul.mubr.bf16.vlgmr.msra.gmra.mrb[4].mxu1 %v1025_v59 }
 0x235   :  { %v1378_v61 = vpop.f32.mrb[4].mxu1 }
 0x236   :  { %v1379_v63 = vpop.f32.mrb[5].mxu1 }
 0x237   :  { %v1380_v0 = vadd.f32 %v1379_v63, %v1378_v61  ;;  %v1381_v1 = vpop.f32.mrb[6].mxu1 }
 0x238   :  { %v1382_v2 = vpop.f32.mrb[7].mxu1 }
 0x239   :  { %v1197_v3 = vadd.f32 %v1380_v0, %v1345_v62  ;;  %v1383_v4 = vadd.f32 %v1382_v2, %v1381_v1 }
 0x23b   :  { %1203 = vst [vmem:[%s2127_s5] sm:$0xff] %v1197_v3  ;;  %v1200_v5 = vadd.f32 %v1383_v4, %v1345_v62 }
 0x23d   :  { %1204 = vst [vmem:[%s2127_s5 + $0x8] sm:$0xff] %v1200_v5 }

</bundles_post_ra>
